<compile_context>
chip_gen: v6e
topology: v6e:2x2x1
jax: 0.10.0
libtpu: 0.0.40
codegen_flags: <defaults>
</compile_context>

<pallas_src>
import math

import numpy as np
import jax
import jax.numpy as jnp
from jax.experimental import pallas as pl
from jax.experimental.pallas import tpu as pltpu

F32 = jnp.float32
BN_EPS = 1e-5


def _gelu(x):
    # tanh-form GELU: one EUP tanh + a handful of VALU ops; |err| ~3e-4 vs erf GELU.
    c = 0.7978845608028654  # sqrt(2/pi)
    return 0.5 * x * (1.0 + jnp.tanh(c * (x + 0.044715 * x * x * x)))


# ---------------------------------------------------------------------------
# fused two-block kernel
# ---------------------------------------------------------------------------
def _make_fused_kernel(*, B, L, ka, kb, proj_a, proj_b, share_h):
    P = max(ka // 2, kb // 2)       # shared per-segment padding (rows)
    S = L + 2 * P                   # rows per batch segment
    Nw = B * S                      # batch-folded working rows
    nA = 13 if proj_a else 10
    nB = 13 if proj_b else 10

    def kernel(*refs):
        x_ref = refs[0]                              # (B, Cin, L)   NCL input
        pool_ref, expand_ref = refs[1], refs[2]      # (B, Nw), (Nw, B) constants
        prm_a = refs[3:3 + nA]
        prm_b = refs[3 + nA:3 + nA + nB]
        o_ref = refs[3 + nA + nB]                    # (B, Cout, L)  NCL output
        scratch = refs[3 + nA + nB + 1:]
        xbuf = scratch[0]                            # (Nbuf, Cin)
        habuf = scratch[1]                           # (Nbuf, C_a)
        hbbuf = scratch[1] if share_h else scratch[2]

        # Zero the padded buffers once; pad rows stay zero for the whole kernel,
        # which is what implements "same" padding for every conv below.
        xbuf[...] = jnp.zeros_like(xbuf)
        habuf[...] = jnp.zeros_like(habuf)
        if not share_h:
            hbbuf[...] = jnp.zeros_like(hbbuf)

        pool = pool_ref[...]        # 1/L at data rows of batch b
        expand = expand_ref[...]    # 1.0 at data rows of batch b

        def conv_bn(src, w_ref, s_ref, h_ref, k):
            """src: (Nbuf, Cin) padded batch-folded value -> conv+BN, (Nw, Cout)."""
            pc = k // 2
            base = P - pc
            acc = jnp.dot(src[base:base + Nw, :], w_ref[0],
                          preferred_element_type=F32)
            for t in range(1, k):
                acc = acc + jnp.dot(src[base + t:base + t + Nw, :], w_ref[t],
                                    preferred_element_type=F32)
            return acc * s_ref[...] + h_ref[...]     # folded conv-bias + BN

        def scatter_data_rows(buf_ref, val):
            """Write the data rows of a (Nw, C) value into a padded buffer."""
            for b in range(B):
                buf_ref[2 * P + b * S:2 * P + b * S + L, :] = \
                    val[b * S + P:b * S + P + L, :]

        def run_block(in_buf_ref, stage_buf_ref, prm, k, proj):
            if proj:
                (w1, s1, h1, w2, s2, h2, sw1, sb1, sw2, sb2, rw, rs, rh) = prm
            else:
                (w1, s1, h1, w2, s2, h2, sw1, sb1, sw2, sb2) = prm
            src = in_buf_ref[...]
            ident = src[P:P + Nw, :]                 # unshifted (d=0) view
            if proj:                                 # 1x1 conv + BN (folded)
                res = (jnp.dot(ident, rw[...], preferred_element_type=F32)
                       * rs[...] + rh[...])
            else:
                res = ident                          # identity residual

            # conv1 + BN + GELU  (Dropout == identity at inference)
            h = _gelu(conv_bn(src, w1, s1, h1, k))
            scatter_data_rows(stage_buf_ref, h)

            # conv2 + BN
            y = conv_bn(stage_buf_ref[...], w2, s2, h2, k)     # (Nw, C)

            # squeeze-excitation: per-batch mean over L -> FC -> ReLU -> FC -> sigmoid,
            # batch-folded via constant pooling / broadcast matrices (MXU).
            pooled = jnp.dot(pool, y, preferred_element_type=F32)          # (B, C)
            z = jnp.maximum(
                jnp.dot(pooled, sw1[...], preferred_element_type=F32) + sb1[...], 0.0)
            e = jax.nn.sigmoid(
                jnp.dot(z, sw2[...], preferred_element_type=F32) + sb2[...])
            exc = jnp.dot(expand, e, preferred_element_type=F32)           # (Nw, C)

            # excite, add residual, final GELU (pad rows hold garbage; never read)
            return _gelu(y * exc + res)

        # ---- NCL -> batch-folded channels-last, done in-kernel (no wrapper ops) ----
        for b in range(B):
            xbuf[2 * P + b * S:2 * P + b * S + L, :] = x_ref[b].T

        out_a = run_block(xbuf, habuf, prm_a, ka, proj_a)      # block A (projected)
        scatter_data_rows(habuf, out_a)
        out_b = run_block(habuf, hbbuf, prm_b, kb, proj_b)     # block B (identity)

        # ---- back to NCL for the output, done in-kernel (no wrapper ops) ----
        for b in range(B):
            o_ref[b] = out_b[b * S + P:b * S + P + L, :].T

    return kernel


def fused_forward(x_ncl, prep_a, prep_b):
    """x_ncl: (B, C_in, L) float32, PyTorch NCL layout. Returns (B, C_out, L)."""
    B, Cin, L = x_ncl.shape
    ka, ca_in, CA = prep_a["w1"].shape           # (k, Cin, Cout)
    kb, cb_in, CB = prep_b["w1"].shape
    assert ca_in == Cin and cb_in == CA, "block chaining requires matching channels"
    assert ka % 2 == 1 and kb % 2 == 1, \
        "padding=k//2 gives 'same' output length only for odd kernel sizes"
    proj_a, proj_b = "rw" in prep_a, "rw" in prep_b
    assert proj_a or Cin == CA
    assert proj_b or CA == CB

    P = max(ka // 2, kb // 2)
    S = L + 2 * P
    Nw = B * S
    Nbuf = Nw + 2 * P

    # Constant pooling / broadcast matrices for the batch-folded squeeze-excitation
    # (numpy at trace time -> jit constants, no extra runtime XLA ops).
    pool_np = np.zeros((B, Nw), np.float32)
    expand_np = np.zeros((Nw, B), np.float32)
    for b in range(B):
        pool_np[b, b * S + P:b * S + P + L] = 1.0 / L
        expand_np[b * S + P:b * S + P + L, b] = 1.0

    def plist(q, proj):
        keys = ["w1", "s1", "h1", "w2", "s2", "h2", "sw1", "sb1", "sw2", "sb2"]
        if proj:
            keys += ["rw", "rs", "rh"]
        return [q[k] for k in keys]

    args = ([x_ncl.astype(F32), jnp.asarray(pool_np), jnp.asarray(expand_np)]
            + plist(prep_a, proj_a) + plist(prep_b, proj_b))

    share_h = (CA == CB)
    scratch = [pltpu.VMEM((Nbuf, Cin), F32), pltpu.VMEM((Nbuf, CA), F32)]
    if not share_h:
        scratch.append(pltpu.VMEM((Nbuf, CB), F32))

    kernel = _make_fused_kernel(B=B, L=L, ka=ka, kb=kb,
                                proj_a=proj_a, proj_b=proj_b, share_h=share_h)
    return pl.pallas_call(
        kernel,
        out_shape=jax.ShapeDtypeStruct((B, CB, L), F32),
        in_specs=[pl.BlockSpec(memory_space=pltpu.MemorySpace.VMEM)] * len(args),
        out_specs=pl.BlockSpec(memory_space=pltpu.MemorySpace.VMEM),
        scratch_shapes=scratch,
        # TODO(synk): for large B / L add a ("parallel",) grid over batch / L tiles
        # (2 TCs on v7x) and set pltpu.CompilerParams(vmem_limit_bytes=...) so tiles
        # respect 64 MiB (v7x) / 16 MiB default-scoped (v5e) VMEM.
    )(*args)


# ---------------------------------------------------------------------------
# parameters: PyTorch-layout init + prep (BN folding, kernel-friendly layouts)
# ---------------------------------------------------------------------------
def init_block_params(key, in_ch, out_ch, kernel, se_ratio=0.25):
    keys = jax.random.split(key, 8)

    def conv_init(k_, cout, cin, ksz):
        kw, kb_ = jax.random.split(k_)
        bound = 1.0 / math.sqrt(cin * ksz)
        w = jax.random.uniform(kw, (cout, cin, ksz), F32, -bound, bound)
        b = jax.random.uniform(kb_, (cout,), F32, -bound, bound)
        return w, b

    def bn_init(k_, c):
        k1, k2, k3, k4 = jax.random.split(k_, 4)
        return dict(g=1.0 + 0.1 * jax.random.normal(k1, (c,), F32),
                    b=0.1 * jax.random.normal(k2, (c,), F32),
                    m=0.1 * jax.random.normal(k3, (c,), F32),
                    v=jax.random.uniform(k4, (c,), F32, 0.5, 1.5))

    se_ch = max(1, int(out_ch * se_ratio))
    p = {}
    p["w1"], p["b1"] = conv_init(keys[0], out_ch, in_ch, kernel)
    p["bn1"] = bn_init(keys[1], out_ch)
    p["w2"], p["b2"] = conv_init(keys[2], out_ch, out_ch, kernel)
    p["bn2"] = bn_init(keys[3], out_ch)
    p["se_w1"], p["se_b1"] = conv_init(keys[4], se_ch, out_ch, 1)
    p["se_w2"], p["se_b2"] = conv_init(keys[5], out_ch, se_ch, 1)
    if in_ch != out_ch:
        p["res_w"], p["res_b"] = conv_init(keys[6], out_ch, in_ch, 1)
        p["res_bn"] = bn_init(keys[7], out_ch)
    return p


def prepare_block_params(p):
    """Fold conv bias + BatchNorm (eval) into scale/shift; lay weights out for the kernel."""
    def fold(bn, conv_b):
        s = bn["g"] / jnp.sqrt(bn["v"] + BN_EPS)
        return s.reshape(1, -1), (bn["b"] - bn["m"] * s + conv_b * s).reshape(1, -1)

    q = {}
    q["w1"] = jnp.transpose(p["w1"], (2, 1, 0))            # (k, Cin, Cout)
    q["s1"], q["h1"] = fold(p["bn1"], p["b1"])
    q["w2"] = jnp.transpose(p["w2"], (2, 1, 0))            # (k, Cout, Cout)
    q["s2"], q["h2"] = fold(p["bn2"], p["b2"])
    q["sw1"] = jnp.transpose(p["se_w1"][:, :, 0])          # (Cout, se_ch)
    q["sb1"] = p["se_b1"].reshape(1, -1)
    q["sw2"] = jnp.transpose(p["se_w2"][:, :, 0])          # (se_ch, Cout)
    q["sb2"] = p["se_b2"].reshape(1, -1)
    if "res_w" in p:
        q["rw"] = jnp.transpose(p["res_w"][:, :, 0])       # (Cin, Cout)
        q["rs"], q["rh"] = fold(p["res_bn"], p["res_b"])
    return q


# ---------------------------------------------------------------------------
# pure-XLA reference (independent path: lax.conv_general_dilated + exact erf GELU)
# ---------------------------------------------------------------------------
def _reference_block(x, p):
    pad = p["w1"].shape[-1] // 2

    def conv(inp, w, b, pd):
        y = jax.lax.conv_general_dilated(
            inp, w, window_strides=(1,), padding=[(pd, pd)],
            dimension_numbers=("NCH", "OIH", "NCH"),
            precision=jax.lax.Precision.HIGHEST)
        return y + b[None, :, None]

    def bn(inp, s):
        sc = s["g"] / jnp.sqrt(s["v"] + BN_EPS)
        return (inp - s["m"][None, :, None]) * sc[None, :, None] + s["b"][None, :, None]

    gelu = lambda v: jax.nn.gelu(v, approximate=False)     # PyTorch nn.GELU() default
    residual = bn(conv(x, p["res_w"], p["res_b"], 0), p["res_bn"]) if "res_w" in p else x
    out = gelu(bn(conv(x, p["w1"], p["b1"], pad), p["bn1"]))
    out = bn(conv(out, p["w2"], p["b2"], pad), p["bn2"])
    se = jnp.mean(out, axis=2, keepdims=True)
    se = jnp.maximum(conv(se, p["se_w1"], p["se_b1"], 0), 0.0)
    se = jax.nn.sigmoid(conv(se, p["se_w2"], p["se_b2"], 0))
    return gelu(out * se + residual)


# ---------------------------------------------------------------------------
if __name__ == "__main__":
    B, C_IN, L = 2, 4, 16
    key = jax.random.PRNGKey(0)
    kx, kpa, kpb = jax.random.split(key, 3)

    x = jax.random.normal(kx, (B, C_IN, L), F32)
    params_a = init_block_params(kpa, in_ch=C_IN, out_ch=16, kernel=5)  # projected residual
    params_b = init_block_params(kpb, in_ch=16, out_ch=16, kernel=3)    # identity residual
    prep_a = prepare_block_params(params_a)
    prep_b = prepare_block_params(params_b)

    out = jax.jit(fused_forward)(x, prep_a, prep_b)
    out = jax.block_until_ready(out)

    ref = jax.jit(lambda xx, pa, pb: _reference_block(_reference_block(xx, pa), pb))(
        x, params_a, params_b)
    ref = jax.block_until_ready(ref)

    assert out.shape == (B, 16, L), out.shape
    assert bool(jnp.all(jnp.isfinite(out)))
    err = float(jnp.max(jnp.abs(out - ref)))
    assert err < 5e-2, f"mismatch vs XLA reference: {err}"
    print("KERNEL_OK")
</pallas_src>

<mosaic_0001>
module attributes {stable_mosaic.version = 11 : i64} {
  func.func @kernel(%arg0: memref<2x4x16xf32, #tpu.memory_space<vmem>>, %arg1: memref<2x40xf32, #tpu.memory_space<vmem>>, %arg2: memref<40x2xf32, #tpu.memory_space<vmem>>, %arg3: memref<5x4x16xf32, #tpu.memory_space<vmem>>, %arg4: memref<1x16xf32, #tpu.memory_space<vmem>>, %arg5: memref<1x16xf32, #tpu.memory_space<vmem>>, %arg6: memref<5x16x16xf32, #tpu.memory_space<vmem>>, %arg7: memref<1x16xf32, #tpu.memory_space<vmem>>, %arg8: memref<1x16xf32, #tpu.memory_space<vmem>>, %arg9: memref<16x4xf32, #tpu.memory_space<vmem>>, %arg10: memref<1x4xf32, #tpu.memory_space<vmem>>, %arg11: memref<4x16xf32, #tpu.memory_space<vmem>>, %arg12: memref<1x16xf32, #tpu.memory_space<vmem>>, %arg13: memref<4x16xf32, #tpu.memory_space<vmem>>, %arg14: memref<1x16xf32, #tpu.memory_space<vmem>>, %arg15: memref<1x16xf32, #tpu.memory_space<vmem>>, %arg16: memref<3x16x16xf32, #tpu.memory_space<vmem>>, %arg17: memref<1x16xf32, #tpu.memory_space<vmem>>, %arg18: memref<1x16xf32, #tpu.memory_space<vmem>>, %arg19: memref<3x16x16xf32, #tpu.memory_space<vmem>>, %arg20: memref<1x16xf32, #tpu.memory_space<vmem>>, %arg21: memref<1x16xf32, #tpu.memory_space<vmem>>, %arg22: memref<16x4xf32, #tpu.memory_space<vmem>>, %arg23: memref<1x4xf32, #tpu.memory_space<vmem>>, %arg24: memref<4x16xf32, #tpu.memory_space<vmem>>, %arg25: memref<1x16xf32, #tpu.memory_space<vmem>>, %arg26: memref<2x16x16xf32, #tpu.memory_space<vmem>>, %arg27: memref<44x4xf32, #tpu.memory_space<vmem>>, %arg28: memref<44x16xf32, #tpu.memory_space<vmem>>) attributes {dimension_semantics = [], scalar_prefetch = 0 : i64, scratch_operands = 2 : i64, tpu.core_type = #tpu.core_type<tc>} {
    %cst = arith.constant 0.000000e+00 : f32
    %0 = vector.broadcast %cst : f32 to vector<44x4xf32>
    %c0 = arith.constant 0 : index
    %c0_0 = arith.constant 0 : index
    %1 = vector.load %arg27[%c0, %c0_0] : memref<44x4xf32, #tpu.memory_space<vmem>>, vector<44x4xf32>
    tpu.vector_store %arg27[%c0, %c0_0], %0 {strides = array<i32>} : memref<44x4xf32, #tpu.memory_space<vmem>>, vector<44x4xf32>,
    %cst_1 = arith.constant 0.000000e+00 : f32
    %2 = vector.broadcast %cst_1 : f32 to vector<44x16xf32>
    %c0_2 = arith.constant 0 : index
    %c0_3 = arith.constant 0 : index
    %3 = vector.load %arg28[%c0_2, %c0_3] : memref<44x16xf32, #tpu.memory_space<vmem>>, vector<44x16xf32>
    tpu.vector_store %arg28[%c0_2, %c0_3], %2 {strides = array<i32>} : memref<44x16xf32, #tpu.memory_space<vmem>>, vector<44x16xf32>,
    %c0_4 = arith.constant 0 : index
    %c0_5 = arith.constant 0 : index
    %4 = vector.load %arg1[%c0_4, %c0_5] : memref<2x40xf32, #tpu.memory_space<vmem>>, vector<2x40xf32>
    %c0_6 = arith.constant 0 : index
    %c0_7 = arith.constant 0 : index
    %5 = vector.load %arg2[%c0_6, %c0_7] : memref<40x2xf32, #tpu.memory_space<vmem>>, vector<40x2xf32>
    %c0_8 = arith.constant 0 : index
    %c0_9 = arith.constant 0 : index
    %c0_10 = arith.constant 0 : index
    %6 = vector.load %arg0[%c0_8, %c0_9, %c0_10] : memref<2x4x16xf32, #tpu.memory_space<vmem>>, vector<1x4x16xf32>
    %7 = vector.shape_cast %6 : vector<1x4x16xf32> to vector<4x16xf32>
    %8 = tpu.transpose %7, [1, 0] : vector<4x16xf32> -> vector<16x4xf32>
    %c4 = arith.constant 4 : index
    %c0_11 = arith.constant 0 : index
    %9 = vector.load %arg27[%c4, %c0_11] : memref<44x4xf32, #tpu.memory_space<vmem>>, vector<16x4xf32>
    tpu.vector_store %arg27[%c4, %c0_11], %8 {strides = array<i32>} : memref<44x4xf32, #tpu.memory_space<vmem>>, vector<16x4xf32>,
    %c1 = arith.constant 1 : index
    %c0_12 = arith.constant 0 : index
    %c0_13 = arith.constant 0 : index
    %10 = vector.load %arg0[%c1, %c0_12, %c0_13] : memref<2x4x16xf32, #tpu.memory_space<vmem>>, vector<1x4x16xf32>
    %11 = vector.shape_cast %10 : vector<1x4x16xf32> to vector<4x16xf32>
    %12 = tpu.transpose %11, [1, 0] : vector<4x16xf32> -> vector<16x4xf32>
    %c24 = arith.constant 24 : index
    %c0_14 = arith.constant 0 : index
    %13 = vector.load %arg27[%c24, %c0_14] : memref<44x4xf32, #tpu.memory_space<vmem>>, vector<16x4xf32>
    tpu.vector_store %arg27[%c24, %c0_14], %12 {strides = array<i32>} : memref<44x4xf32, #tpu.memory_space<vmem>>, vector<16x4xf32>,
    %c0_15 = arith.constant 0 : index
    %c0_16 = arith.constant 0 : index
    %14 = vector.load %arg27[%c0_15, %c0_16] : memref<44x4xf32, #tpu.memory_space<vmem>>, vector<44x4xf32>
    %15 = vector.extract_strided_slice %14 {offsets = [2, 0], sizes = [40, 4], strides = [1, 1]} : vector<44x4xf32> to vector<40x4xf32>
    %c0_17 = arith.constant 0 : index
    %c0_18 = arith.constant 0 : index
    %16 = vector.load %arg13[%c0_17, %c0_18] : memref<4x16xf32, #tpu.memory_space<vmem>>, vector<4x16xf32>
    %cst_19 = arith.constant dense<0.000000e+00> : vector<40x16xf32>
    %17 = tpu.matmul %15, %16, %cst_19 {dimension_numbers = #tpu.dot_dimension_numbers<[1], [0], [0], [1], [0, 0, 1, 1], [], []>} : vector<40x4xf32>, vector<4x16xf32>, vector<40x16xf32> -> vector<40x16xf32>
    %c0_20 = arith.constant 0 : index
    %c0_21 = arith.constant 0 : index
    %18 = vector.load %arg14[%c0_20, %c0_21] : memref<1x16xf32, #tpu.memory_space<vmem>>, vector<1x16xf32>
    %19 = vector.broadcast %18 : vector<1x16xf32> to vector<40x16xf32>
    %20 = arith.mulf %17, %19 : vector<40x16xf32>
    %c0_22 = arith.constant 0 : index
    %c0_23 = arith.constant 0 : index
    %21 = vector.load %arg15[%c0_22, %c0_23] : memref<1x16xf32, #tpu.memory_space<vmem>>, vector<1x16xf32>
    %22 = vector.broadcast %21 : vector<1x16xf32> to vector<40x16xf32>
    %23 = arith.addf %20, %22 : vector<40x16xf32>
    %24 = vector.extract_strided_slice %14 {offsets = [0, 0], sizes = [40, 4], strides = [1, 1]} : vector<44x4xf32> to vector<40x4xf32>
    %c0_24 = arith.constant 0 : index
    %c0_25 = arith.constant 0 : index
    %c0_26 = arith.constant 0 : index
    %25 = vector.load %arg3[%c0_24, %c0_25, %c0_26] : memref<5x4x16xf32, #tpu.memory_space<vmem>>, vector<1x4x16xf32>
    %26 = vector.shape_cast %25 : vector<1x4x16xf32> to vector<4x16xf32>
    %cst_27 = arith.constant dense<0.000000e+00> : vector<40x16xf32>
    %27 = tpu.matmul %24, %26, %cst_27 {dimension_numbers = #tpu.dot_dimension_numbers<[1], [0], [0], [1], [0, 0, 1, 1], [], []>} : vector<40x4xf32>, vector<4x16xf32>, vector<40x16xf32> -> vector<40x16xf32>
    %28 = vector.extract_strided_slice %14 {offsets = [1, 0], sizes = [40, 4], strides = [1, 1]} : vector<44x4xf32> to vector<40x4xf32>
    %c1_28 = arith.constant 1 : index
    %c0_29 = arith.constant 0 : index
    %c0_30 = arith.constant 0 : index
    %29 = vector.load %arg3[%c1_28, %c0_29, %c0_30] : memref<5x4x16xf32, #tpu.memory_space<vmem>>, vector<1x4x16xf32>
    %30 = vector.shape_cast %29 : vector<1x4x16xf32> to vector<4x16xf32>
    %cst_31 = arith.constant dense<0.000000e+00> : vector<40x16xf32>
    %31 = tpu.matmul %28, %30, %cst_31 {dimension_numbers = #tpu.dot_dimension_numbers<[1], [0], [0], [1], [0, 0, 1, 1], [], []>} : vector<40x4xf32>, vector<4x16xf32>, vector<40x16xf32> -> vector<40x16xf32>
    %32 = arith.addf %27, %31 : vector<40x16xf32>
    %33 = vector.extract_strided_slice %14 {offsets = [2, 0], sizes = [40, 4], strides = [1, 1]} : vector<44x4xf32> to vector<40x4xf32>
    %c2 = arith.constant 2 : index
    %c0_32 = arith.constant 0 : index
    %c0_33 = arith.constant 0 : index
    %34 = vector.load %arg3[%c2, %c0_32, %c0_33] : memref<5x4x16xf32, #tpu.memory_space<vmem>>, vector<1x4x16xf32>
    %35 = vector.shape_cast %34 : vector<1x4x16xf32> to vector<4x16xf32>
    %cst_34 = arith.constant dense<0.000000e+00> : vector<40x16xf32>
    %36 = tpu.matmul %33, %35, %cst_34 {dimension_numbers = #tpu.dot_dimension_numbers<[1], [0], [0], [1], [0, 0, 1, 1], [], []>} : vector<40x4xf32>, vector<4x16xf32>, vector<40x16xf32> -> vector<40x16xf32>
    %37 = arith.addf %32, %36 : vector<40x16xf32>
    %38 = vector.extract_strided_slice %14 {offsets = [3, 0], sizes = [40, 4], strides = [1, 1]} : vector<44x4xf32> to vector<40x4xf32>
    %c3 = arith.constant 3 : index
    %c0_35 = arith.constant 0 : index
    %c0_36 = arith.constant 0 : index
    %39 = vector.load %arg3[%c3, %c0_35, %c0_36] : memref<5x4x16xf32, #tpu.memory_space<vmem>>, vector<1x4x16xf32>
    %40 = vector.shape_cast %39 : vector<1x4x16xf32> to vector<4x16xf32>
    %cst_37 = arith.constant dense<0.000000e+00> : vector<40x16xf32>
    %41 = tpu.matmul %38, %40, %cst_37 {dimension_numbers = #tpu.dot_dimension_numbers<[1], [0], [0], [1], [0, 0, 1, 1], [], []>} : vector<40x4xf32>, vector<4x16xf32>, vector<40x16xf32> -> vector<40x16xf32>
    %42 = arith.addf %37, %41 : vector<40x16xf32>
    %43 = vector.extract_strided_slice %14 {offsets = [4, 0], sizes = [40, 4], strides = [1, 1]} : vector<44x4xf32> to vector<40x4xf32>
    %c4_38 = arith.constant 4 : index
    %c0_39 = arith.constant 0 : index
    %c0_40 = arith.constant 0 : index
    %44 = vector.load %arg3[%c4_38, %c0_39, %c0_40] : memref<5x4x16xf32, #tpu.memory_space<vmem>>, vector<1x4x16xf32>
    %45 = vector.shape_cast %44 : vector<1x4x16xf32> to vector<4x16xf32>
    %cst_41 = arith.constant dense<0.000000e+00> : vector<40x16xf32>
    %46 = tpu.matmul %43, %45, %cst_41 {dimension_numbers = #tpu.dot_dimension_numbers<[1], [0], [0], [1], [0, 0, 1, 1], [], []>} : vector<40x4xf32>, vector<4x16xf32>, vector<40x16xf32> -> vector<40x16xf32>
    %47 = arith.addf %42, %46 : vector<40x16xf32>
    %c0_42 = arith.constant 0 : index
    %c0_43 = arith.constant 0 : index
    %48 = vector.load %arg4[%c0_42, %c0_43] : memref<1x16xf32, #tpu.memory_space<vmem>>, vector<1x16xf32>
    %49 = vector.broadcast %48 : vector<1x16xf32> to vector<40x16xf32>
    %50 = arith.mulf %47, %49 : vector<40x16xf32>
    %c0_44 = arith.constant 0 : index
    %c0_45 = arith.constant 0 : index
    %51 = vector.load %arg5[%c0_44, %c0_45] : memref<1x16xf32, #tpu.memory_space<vmem>>, vector<1x16xf32>
    %52 = vector.broadcast %51 : vector<1x16xf32> to vector<40x16xf32>
    %53 = arith.addf %50, %52 : vector<40x16xf32>
    %cst_46 = arith.constant 5.000000e-01 : f32
    %54 = vector.broadcast %cst_46 : f32 to vector<40x16xf32>
    %55 = arith.mulf %54, %53 : vector<40x16xf32>
    %cst_47 = arith.constant 4.471500e-02 : f32
    %56 = vector.broadcast %cst_47 : f32 to vector<40x16xf32>
    %57 = arith.mulf %56, %53 : vector<40x16xf32>
    %58 = arith.mulf %57, %53 : vector<40x16xf32>
    %59 = arith.mulf %58, %53 : vector<40x16xf32>
    %60 = arith.addf %53, %59 : vector<40x16xf32>
    %cst_48 = arith.constant 0.797884583 : f32
    %61 = vector.broadcast %cst_48 : f32 to vector<40x16xf32>
    %62 = arith.mulf %61, %60 : vector<40x16xf32>
    %63 = math.tanh %62 : vector<40x16xf32>
    %cst_49 = arith.constant 1.000000e+00 : f32
    %64 = vector.broadcast %cst_49 : f32 to vector<40x16xf32>
    %65 = arith.addf %64, %63 : vector<40x16xf32>
    %66 = arith.mulf %55, %65 : vector<40x16xf32>
    %67 = vector.extract_strided_slice %66 {offsets = [2, 0], sizes = [16, 16], strides = [1, 1]} : vector<40x16xf32> to vector<16x16xf32>
    %c4_50 = arith.constant 4 : index
    %c0_51 = arith.constant 0 : index
    %68 = vector.load %arg28[%c4_50, %c0_51] : memref<44x16xf32, #tpu.memory_space<vmem>>, vector<16x16xf32>
    tpu.vector_store %arg28[%c4_50, %c0_51], %67 {strides = array<i32>} : memref<44x16xf32, #tpu.memory_space<vmem>>, vector<16x16xf32>,
    %69 = vector.extract_strided_slice %66 {offsets = [22, 0], sizes = [16, 16], strides = [1, 1]} : vector<40x16xf32> to vector<16x16xf32>
    %c24_52 = arith.constant 24 : index
    %c0_53 = arith.constant 0 : index
    %70 = vector.load %arg28[%c24_52, %c0_53] : memref<44x16xf32, #tpu.memory_space<vmem>>, vector<16x16xf32>
    tpu.vector_store %arg28[%c24_52, %c0_53], %69 {strides = array<i32>} : memref<44x16xf32, #tpu.memory_space<vmem>>, vector<16x16xf32>,
    %c0_54 = arith.constant 0 : index
    %c0_55 = arith.constant 0 : index
    %71 = vector.load %arg28[%c0_54, %c0_55] : memref<44x16xf32, #tpu.memory_space<vmem>>, vector<44x16xf32>
    %72 = vector.extract_strided_slice %71 {offsets = [0, 0], sizes = [40, 16], strides = [1, 1]} : vector<44x16xf32> to vector<40x16xf32>
    %c0_56 = arith.constant 0 : index
    %c0_57 = arith.constant 0 : index
    %c0_58 = arith.constant 0 : index
    %73 = vector.load %arg6[%c0_56, %c0_57, %c0_58] : memref<5x16x16xf32, #tpu.memory_space<vmem>>, vector<1x16x16xf32>
    %74 = vector.shape_cast %73 : vector<1x16x16xf32> to vector<16x16xf32>
    %cst_59 = arith.constant dense<0.000000e+00> : vector<40x16xf32>
    %75 = tpu.matmul %72, %74, %cst_59 {dimension_numbers = #tpu.dot_dimension_numbers<[1], [0], [0], [1], [0, 0, 1, 1], [], []>} : vector<40x16xf32>, vector<16x16xf32>, vector<40x16xf32> -> vector<40x16xf32>
    %76 = vector.extract_strided_slice %71 {offsets = [1, 0], sizes = [40, 16], strides = [1, 1]} : vector<44x16xf32> to vector<40x16xf32>
    %c1_60 = arith.constant 1 : index
    %c0_61 = arith.constant 0 : index
    %c0_62 = arith.constant 0 : index
    %77 = vector.load %arg6[%c1_60, %c0_61, %c0_62] : memref<5x16x16xf32, #tpu.memory_space<vmem>>, vector<1x16x16xf32>
    %78 = vector.shape_cast %77 : vector<1x16x16xf32> to vector<16x16xf32>
    %cst_63 = arith.constant dense<0.000000e+00> : vector<40x16xf32>
    %79 = tpu.matmul %76, %78, %cst_63 {dimension_numbers = #tpu.dot_dimension_numbers<[1], [0], [0], [1], [0, 0, 1, 1], [], []>} : vector<40x16xf32>, vector<16x16xf32>, vector<40x16xf32> -> vector<40x16xf32>
    %80 = arith.addf %75, %79 : vector<40x16xf32>
    %81 = vector.extract_strided_slice %71 {offsets = [2, 0], sizes = [40, 16], strides = [1, 1]} : vector<44x16xf32> to vector<40x16xf32>
    %c2_64 = arith.constant 2 : index
    %c0_65 = arith.constant 0 : index
    %c0_66 = arith.constant 0 : index
    %82 = vector.load %arg6[%c2_64, %c0_65, %c0_66] : memref<5x16x16xf32, #tpu.memory_space<vmem>>, vector<1x16x16xf32>
    %83 = vector.shape_cast %82 : vector<1x16x16xf32> to vector<16x16xf32>
    %cst_67 = arith.constant dense<0.000000e+00> : vector<40x16xf32>
    %84 = tpu.matmul %81, %83, %cst_67 {dimension_numbers = #tpu.dot_dimension_numbers<[1], [0], [0], [1], [0, 0, 1, 1], [], []>} : vector<40x16xf32>, vector<16x16xf32>, vector<40x16xf32> -> vector<40x16xf32>
    %85 = arith.addf %80, %84 : vector<40x16xf32>
    %86 = vector.extract_strided_slice %71 {offsets = [3, 0], sizes = [40, 16], strides = [1, 1]} : vector<44x16xf32> to vector<40x16xf32>
    %c3_68 = arith.constant 3 : index
    %c0_69 = arith.constant 0 : index
    %c0_70 = arith.constant 0 : index
    %87 = vector.load %arg6[%c3_68, %c0_69, %c0_70] : memref<5x16x16xf32, #tpu.memory_space<vmem>>, vector<1x16x16xf32>
    %88 = vector.shape_cast %87 : vector<1x16x16xf32> to vector<16x16xf32>
    %cst_71 = arith.constant dense<0.000000e+00> : vector<40x16xf32>
    %89 = tpu.matmul %86, %88, %cst_71 {dimension_numbers = #tpu.dot_dimension_numbers<[1], [0], [0], [1], [0, 0, 1, 1], [], []>} : vector<40x16xf32>, vector<16x16xf32>, vector<40x16xf32> -> vector<40x16xf32>
    %90 = arith.addf %85, %89 : vector<40x16xf32>
    %91 = vector.extract_strided_slice %71 {offsets = [4, 0], sizes = [40, 16], strides = [1, 1]} : vector<44x16xf32> to vector<40x16xf32>
    %c4_72 = arith.constant 4 : index
    %c0_73 = arith.constant 0 : index
    %c0_74 = arith.constant 0 : index
    %92 = vector.load %arg6[%c4_72, %c0_73, %c0_74] : memref<5x16x16xf32, #tpu.memory_space<vmem>>, vector<1x16x16xf32>
    %93 = vector.shape_cast %92 : vector<1x16x16xf32> to vector<16x16xf32>
    %cst_75 = arith.constant dense<0.000000e+00> : vector<40x16xf32>
    %94 = tpu.matmul %91, %93, %cst_75 {dimension_numbers = #tpu.dot_dimension_numbers<[1], [0], [0], [1], [0, 0, 1, 1], [], []>} : vector<40x16xf32>, vector<16x16xf32>, vector<40x16xf32> -> vector<40x16xf32>
    %95 = arith.addf %90, %94 : vector<40x16xf32>
    %c0_76 = arith.constant 0 : index
    %c0_77 = arith.constant 0 : index
    %96 = vector.load %arg7[%c0_76, %c0_77] : memref<1x16xf32, #tpu.memory_space<vmem>>, vector<1x16xf32>
    %97 = vector.broadcast %96 : vector<1x16xf32> to vector<40x16xf32>
    %98 = arith.mulf %95, %97 : vector<40x16xf32>
    %c0_78 = arith.constant 0 : index
    %c0_79 = arith.constant 0 : index
    %99 = vector.load %arg8[%c0_78, %c0_79] : memref<1x16xf32, #tpu.memory_space<vmem>>, vector<1x16xf32>
    %100 = vector.broadcast %99 : vector<1x16xf32> to vector<40x16xf32>
    %101 = arith.addf %98, %100 : vector<40x16xf32>
    %cst_80 = arith.constant dense<0.000000e+00> : vector<2x16xf32>
    %102 = tpu.matmul %4, %101, %cst_80 {dimension_numbers = #tpu.dot_dimension_numbers<[1], [0], [0], [1], [0, 0, 1, 1], [], []>} : vector<2x40xf32>, vector<40x16xf32>, vector<2x16xf32> -> vector<2x16xf32>
    %c0_81 = arith.constant 0 : index
    %c0_82 = arith.constant 0 : index
    %103 = vector.load %arg9[%c0_81, %c0_82] : memref<16x4xf32, #tpu.memory_space<vmem>>, vector<16x4xf32>
    %cst_83 = arith.constant dense<0.000000e+00> : vector<2x4xf32>
    %104 = tpu.matmul %102, %103, %cst_83 {dimension_numbers = #tpu.dot_dimension_numbers<[1], [0], [0], [1], [0, 0, 1, 1], [], []>} : vector<2x16xf32>, vector<16x4xf32>, vector<2x4xf32> -> vector<2x4xf32>
    %c0_84 = arith.constant 0 : index
    %c0_85 = arith.constant 0 : index
    %105 = vector.load %arg10[%c0_84, %c0_85] : memref<1x4xf32, #tpu.memory_space<vmem>>, vector<1x4xf32>
    %106 = vector.broadcast %105 : vector<1x4xf32> to vector<2x4xf32>
    %107 = arith.addf %104, %106 : vector<2x4xf32>
    %cst_86 = arith.constant 0.000000e+00 : f32
    %108 = vector.broadcast %cst_86 : f32 to vector<2x4xf32>
    %109 = arith.maximumf %107, %108 : vector<2x4xf32>
    %c0_87 = arith.constant 0 : index
    %c0_88 = arith.constant 0 : index
    %110 = vector.load %arg11[%c0_87, %c0_88] : memref<4x16xf32, #tpu.memory_space<vmem>>, vector<4x16xf32>
    %cst_89 = arith.constant dense<0.000000e+00> : vector<2x16xf32>
    %111 = tpu.matmul %109, %110, %cst_89 {dimension_numbers = #tpu.dot_dimension_numbers<[1], [0], [0], [1], [0, 0, 1, 1], [], []>} : vector<2x4xf32>, vector<4x16xf32>, vector<2x16xf32> -> vector<2x16xf32>
    %c0_90 = arith.constant 0 : index
    %c0_91 = arith.constant 0 : index
    %112 = vector.load %arg12[%c0_90, %c0_91] : memref<1x16xf32, #tpu.memory_space<vmem>>, vector<1x16xf32>
    %113 = vector.broadcast %112 : vector<1x16xf32> to vector<2x16xf32>
    %114 = arith.addf %111, %113 : vector<2x16xf32>
    %115 = arith.negf %114 : vector<2x16xf32>
    %116 = math.exp %115 : vector<2x16xf32>
    %cst_92 = arith.constant 1.000000e+00 : f32
    %117 = vector.broadcast %cst_92 : f32 to vector<2x16xf32>
    %118 = arith.addf %117, %116 : vector<2x16xf32>
    %119 = arith.divf %117, %118 : vector<2x16xf32>
    %cst_93 = arith.constant dense<0.000000e+00> : vector<40x16xf32>
    %120 = tpu.matmul %5, %119, %cst_93 {dimension_numbers = #tpu.dot_dimension_numbers<[1], [0], [0], [1], [0, 0, 1, 1], [], []>} : vector<40x2xf32>, vector<2x16xf32>, vector<40x16xf32> -> vector<40x16xf32>
    %121 = arith.mulf %101, %120 : vector<40x16xf32>
    %122 = arith.addf %121, %23 : vector<40x16xf32>
    %cst_94 = arith.constant 5.000000e-01 : f32
    %123 = vector.broadcast %cst_94 : f32 to vector<40x16xf32>
    %124 = arith.mulf %123, %122 : vector<40x16xf32>
    %cst_95 = arith.constant 4.471500e-02 : f32
    %125 = vector.broadcast %cst_95 : f32 to vector<40x16xf32>
    %126 = arith.mulf %125, %122 : vector<40x16xf32>
    %127 = arith.mulf %126, %122 : vector<40x16xf32>
    %128 = arith.mulf %127, %122 : vector<40x16xf32>
    %129 = arith.addf %122, %128 : vector<40x16xf32>
    %cst_96 = arith.constant 0.797884583 : f32
    %130 = vector.broadcast %cst_96 : f32 to vector<40x16xf32>
    %131 = arith.mulf %130, %129 : vector<40x16xf32>
    %132 = math.tanh %131 : vector<40x16xf32>
    %cst_97 = arith.constant 1.000000e+00 : f32
    %133 = vector.broadcast %cst_97 : f32 to vector<40x16xf32>
    %134 = arith.addf %133, %132 : vector<40x16xf32>
    %135 = arith.mulf %124, %134 : vector<40x16xf32>
    %136 = vector.extract_strided_slice %135 {offsets = [2, 0], sizes = [16, 16], strides = [1, 1]} : vector<40x16xf32> to vector<16x16xf32>
    %c4_98 = arith.constant 4 : index
    %c0_99 = arith.constant 0 : index
    %137 = vector.load %arg28[%c4_98, %c0_99] : memref<44x16xf32, #tpu.memory_space<vmem>>, vector<16x16xf32>
    tpu.vector_store %arg28[%c4_98, %c0_99], %136 {strides = array<i32>} : memref<44x16xf32, #tpu.memory_space<vmem>>, vector<16x16xf32>,
    %138 = vector.extract_strided_slice %135 {offsets = [22, 0], sizes = [16, 16], strides = [1, 1]} : vector<40x16xf32> to vector<16x16xf32>
    %c24_100 = arith.constant 24 : index
    %c0_101 = arith.constant 0 : index
    %139 = vector.load %arg28[%c24_100, %c0_101] : memref<44x16xf32, #tpu.memory_space<vmem>>, vector<16x16xf32>
    tpu.vector_store %arg28[%c24_100, %c0_101], %138 {strides = array<i32>} : memref<44x16xf32, #tpu.memory_space<vmem>>, vector<16x16xf32>,
    %c0_102 = arith.constant 0 : index
    %c0_103 = arith.constant 0 : index
    %140 = vector.load %arg28[%c0_102, %c0_103] : memref<44x16xf32, #tpu.memory_space<vmem>>, vector<44x16xf32>
    %141 = vector.extract_strided_slice %140 {offsets = [2, 0], sizes = [40, 16], strides = [1, 1]} : vector<44x16xf32> to vector<40x16xf32>
    %142 = vector.extract_strided_slice %140 {offsets = [1, 0], sizes = [40, 16], strides = [1, 1]} : vector<44x16xf32> to vector<40x16xf32>
    %c0_104 = arith.constant 0 : index
    %c0_105 = arith.constant 0 : index
    %c0_106 = arith.constant 0 : index
    %143 = vector.load %arg16[%c0_104, %c0_105, %c0_106] : memref<3x16x16xf32, #tpu.memory_space<vmem>>, vector<1x16x16xf32>
    %144 = vector.shape_cast %143 : vector<1x16x16xf32> to vector<16x16xf32>
    %cst_107 = arith.constant dense<0.000000e+00> : vector<40x16xf32>
    %145 = tpu.matmul %142, %144, %cst_107 {dimension_numbers = #tpu.dot_dimension_numbers<[1], [0], [0], [1], [0, 0, 1, 1], [], []>} : vector<40x16xf32>, vector<16x16xf32>, vector<40x16xf32> -> vector<40x16xf32>
    %146 = vector.extract_strided_slice %140 {offsets = [2, 0], sizes = [40, 16], strides = [1, 1]} : vector<44x16xf32> to vector<40x16xf32>
    %c1_108 = arith.constant 1 : index
    %c0_109 = arith.constant 0 : index
    %c0_110 = arith.constant 0 : index
    %147 = vector.load %arg16[%c1_108, %c0_109, %c0_110] : memref<3x16x16xf32, #tpu.memory_space<vmem>>, vector<1x16x16xf32>
    %148 = vector.shape_cast %147 : vector<1x16x16xf32> to vector<16x16xf32>
    %cst_111 = arith.constant dense<0.000000e+00> : vector<40x16xf32>
    %149 = tpu.matmul %146, %148, %cst_111 {dimension_numbers = #tpu.dot_dimension_numbers<[1], [0], [0], [1], [0, 0, 1, 1], [], []>} : vector<40x16xf32>, vector<16x16xf32>, vector<40x16xf32> -> vector<40x16xf32>
    %150 = arith.addf %145, %149 : vector<40x16xf32>
    %151 = vector.extract_strided_slice %140 {offsets = [3, 0], sizes = [40, 16], strides = [1, 1]} : vector<44x16xf32> to vector<40x16xf32>
    %c2_112 = arith.constant 2 : index
    %c0_113 = arith.constant 0 : index
    %c0_114 = arith.constant 0 : index
    %152 = vector.load %arg16[%c2_112, %c0_113, %c0_114] : memref<3x16x16xf32, #tpu.memory_space<vmem>>, vector<1x16x16xf32>
    %153 = vector.shape_cast %152 : vector<1x16x16xf32> to vector<16x16xf32>
    %cst_115 = arith.constant dense<0.000000e+00> : vector<40x16xf32>
    %154 = tpu.matmul %151, %153, %cst_115 {dimension_numbers = #tpu.dot_dimension_numbers<[1], [0], [0], [1], [0, 0, 1, 1], [], []>} : vector<40x16xf32>, vector<16x16xf32>, vector<40x16xf32> -> vector<40x16xf32>
    %155 = arith.addf %150, %154 : vector<40x16xf32>
    %c0_116 = arith.constant 0 : index
    %c0_117 = arith.constant 0 : index
    %156 = vector.load %arg17[%c0_116, %c0_117] : memref<1x16xf32, #tpu.memory_space<vmem>>, vector<1x16xf32>
    %157 = vector.broadcast %156 : vector<1x16xf32> to vector<40x16xf32>
    %158 = arith.mulf %155, %157 : vector<40x16xf32>
    %c0_118 = arith.constant 0 : index
    %c0_119 = arith.constant 0 : index
    %159 = vector.load %arg18[%c0_118, %c0_119] : memref<1x16xf32, #tpu.memory_space<vmem>>, vector<1x16xf32>
    %160 = vector.broadcast %159 : vector<1x16xf32> to vector<40x16xf32>
    %161 = arith.addf %158, %160 : vector<40x16xf32>
    %cst_120 = arith.constant 5.000000e-01 : f32
    %162 = vector.broadcast %cst_120 : f32 to vector<40x16xf32>
    %163 = arith.mulf %162, %161 : vector<40x16xf32>
    %cst_121 = arith.constant 4.471500e-02 : f32
    %164 = vector.broadcast %cst_121 : f32 to vector<40x16xf32>
    %165 = arith.mulf %164, %161 : vector<40x16xf32>
    %166 = arith.mulf %165, %161 : vector<40x16xf32>
    %167 = arith.mulf %166, %161 : vector<40x16xf32>
    %168 = arith.addf %161, %167 : vector<40x16xf32>
    %cst_122 = arith.constant 0.797884583 : f32
    %169 = vector.broadcast %cst_122 : f32 to vector<40x16xf32>
    %170 = arith.mulf %169, %168 : vector<40x16xf32>
    %171 = math.tanh %170 : vector<40x16xf32>
    %cst_123 = arith.constant 1.000000e+00 : f32
    %172 = vector.broadcast %cst_123 : f32 to vector<40x16xf32>
    %173 = arith.addf %172, %171 : vector<40x16xf32>
    %174 = arith.mulf %163, %173 : vector<40x16xf32>
    %175 = vector.extract_strided_slice %174 {offsets = [2, 0], sizes = [16, 16], strides = [1, 1]} : vector<40x16xf32> to vector<16x16xf32>
    %c4_124 = arith.constant 4 : index
    %c0_125 = arith.constant 0 : index
    %176 = vector.load %arg28[%c4_124, %c0_125] : memref<44x16xf32, #tpu.memory_space<vmem>>, vector<16x16xf32>
    tpu.vector_store %arg28[%c4_124, %c0_125], %175 {strides = array<i32>} : memref<44x16xf32, #tpu.memory_space<vmem>>, vector<16x16xf32>,
    %177 = vector.extract_strided_slice %174 {offsets = [22, 0], sizes = [16, 16], strides = [1, 1]} : vector<40x16xf32> to vector<16x16xf32>
    %c24_126 = arith.constant 24 : index
    %c0_127 = arith.constant 0 : index
    %178 = vector.load %arg28[%c24_126, %c0_127] : memref<44x16xf32, #tpu.memory_space<vmem>>, vector<16x16xf32>
    tpu.vector_store %arg28[%c24_126, %c0_127], %177 {strides = array<i32>} : memref<44x16xf32, #tpu.memory_space<vmem>>, vector<16x16xf32>,
    %c0_128 = arith.constant 0 : index
    %c0_129 = arith.constant 0 : index
    %179 = vector.load %arg28[%c0_128, %c0_129] : memref<44x16xf32, #tpu.memory_space<vmem>>, vector<44x16xf32>
    %180 = vector.extract_strided_slice %179 {offsets = [1, 0], sizes = [40, 16], strides = [1, 1]} : vector<44x16xf32> to vector<40x16xf32>
    %c0_130 = arith.constant 0 : index
    %c0_131 = arith.constant 0 : index
    %c0_132 = arith.constant 0 : index
    %181 = vector.load %arg19[%c0_130, %c0_131, %c0_132] : memref<3x16x16xf32, #tpu.memory_space<vmem>>, vector<1x16x16xf32>
    %182 = vector.shape_cast %181 : vector<1x16x16xf32> to vector<16x16xf32>
    %cst_133 = arith.constant dense<0.000000e+00> : vector<40x16xf32>
    %183 = tpu.matmul %180, %182, %cst_133 {dimension_numbers = #tpu.dot_dimension_numbers<[1], [0], [0], [1], [0, 0, 1, 1], [], []>} : vector<40x16xf32>, vector<16x16xf32>, vector<40x16xf32> -> vector<40x16xf32>
    %184 = vector.extract_strided_slice %179 {offsets = [2, 0], sizes = [40, 16], strides = [1, 1]} : vector<44x16xf32> to vector<40x16xf32>
    %c1_134 = arith.constant 1 : index
    %c0_135 = arith.constant 0 : index
    %c0_136 = arith.constant 0 : index
    %185 = vector.load %arg19[%c1_134, %c0_135, %c0_136] : memref<3x16x16xf32, #tpu.memory_space<vmem>>, vector<1x16x16xf32>
    %186 = vector.shape_cast %185 : vector<1x16x16xf32> to vector<16x16xf32>
    %cst_137 = arith.constant dense<0.000000e+00> : vector<40x16xf32>
    %187 = tpu.matmul %184, %186, %cst_137 {dimension_numbers = #tpu.dot_dimension_numbers<[1], [0], [0], [1], [0, 0, 1, 1], [], []>} : vector<40x16xf32>, vector<16x16xf32>, vector<40x16xf32> -> vector<40x16xf32>
    %188 = arith.addf %183, %187 : vector<40x16xf32>
    %189 = vector.extract_strided_slice %179 {offsets = [3, 0], sizes = [40, 16], strides = [1, 1]} : vector<44x16xf32> to vector<40x16xf32>
    %c2_138 = arith.constant 2 : index
    %c0_139 = arith.constant 0 : index
    %c0_140 = arith.constant 0 : index
    %190 = vector.load %arg19[%c2_138, %c0_139, %c0_140] : memref<3x16x16xf32, #tpu.memory_space<vmem>>, vector<1x16x16xf32>
    %191 = vector.shape_cast %190 : vector<1x16x16xf32> to vector<16x16xf32>
    %cst_141 = arith.constant dense<0.000000e+00> : vector<40x16xf32>
    %192 = tpu.matmul %189, %191, %cst_141 {dimension_numbers = #tpu.dot_dimension_numbers<[1], [0], [0], [1], [0, 0, 1, 1], [], []>} : vector<40x16xf32>, vector<16x16xf32>, vector<40x16xf32> -> vector<40x16xf32>
    %193 = arith.addf %188, %192 : vector<40x16xf32>
    %c0_142 = arith.constant 0 : index
    %c0_143 = arith.constant 0 : index
    %194 = vector.load %arg20[%c0_142, %c0_143] : memref<1x16xf32, #tpu.memory_space<vmem>>, vector<1x16xf32>
    %195 = vector.broadcast %194 : vector<1x16xf32> to vector<40x16xf32>
    %196 = arith.mulf %193, %195 : vector<40x16xf32>
    %c0_144 = arith.constant 0 : index
    %c0_145 = arith.constant 0 : index
    %197 = vector.load %arg21[%c0_144, %c0_145] : memref<1x16xf32, #tpu.memory_space<vmem>>, vector<1x16xf32>
    %198 = vector.broadcast %197 : vector<1x16xf32> to vector<40x16xf32>
    %199 = arith.addf %196, %198 : vector<40x16xf32>
    %cst_146 = arith.constant dense<0.000000e+00> : vector<2x16xf32>
    %200 = tpu.matmul %4, %199, %cst_146 {dimension_numbers = #tpu.dot_dimension_numbers<[1], [0], [0], [1], [0, 0, 1, 1], [], []>} : vector<2x40xf32>, vector<40x16xf32>, vector<2x16xf32> -> vector<2x16xf32>
    %c0_147 = arith.constant 0 : index
    %c0_148 = arith.constant 0 : index
    %201 = vector.load %arg22[%c0_147, %c0_148] : memref<16x4xf32, #tpu.memory_space<vmem>>, vector<16x4xf32>
    %cst_149 = arith.constant dense<0.000000e+00> : vector<2x4xf32>
    %202 = tpu.matmul %200, %201, %cst_149 {dimension_numbers = #tpu.dot_dimension_numbers<[1], [0], [0], [1], [0, 0, 1, 1], [], []>} : vector<2x16xf32>, vector<16x4xf32>, vector<2x4xf32> -> vector<2x4xf32>
    %c0_150 = arith.constant 0 : index
    %c0_151 = arith.constant 0 : index
    %203 = vector.load %arg23[%c0_150, %c0_151] : memref<1x4xf32, #tpu.memory_space<vmem>>, vector<1x4xf32>
    %204 = vector.broadcast %203 : vector<1x4xf32> to vector<2x4xf32>
    %205 = arith.addf %202, %204 : vector<2x4xf32>
    %cst_152 = arith.constant 0.000000e+00 : f32
    %206 = vector.broadcast %cst_152 : f32 to vector<2x4xf32>
    %207 = arith.maximumf %205, %206 : vector<2x4xf32>
    %c0_153 = arith.constant 0 : index
    %c0_154 = arith.constant 0 : index
    %208 = vector.load %arg24[%c0_153, %c0_154] : memref<4x16xf32, #tpu.memory_space<vmem>>, vector<4x16xf32>
    %cst_155 = arith.constant dense<0.000000e+00> : vector<2x16xf32>
    %209 = tpu.matmul %207, %208, %cst_155 {dimension_numbers = #tpu.dot_dimension_numbers<[1], [0], [0], [1], [0, 0, 1, 1], [], []>} : vector<2x4xf32>, vector<4x16xf32>, vector<2x16xf32> -> vector<2x16xf32>
    %c0_156 = arith.constant 0 : index
    %c0_157 = arith.constant 0 : index
    %210 = vector.load %arg25[%c0_156, %c0_157] : memref<1x16xf32, #tpu.memory_space<vmem>>, vector<1x16xf32>
    %211 = vector.broadcast %210 : vector<1x16xf32> to vector<2x16xf32>
    %212 = arith.addf %209, %211 : vector<2x16xf32>
    %213 = arith.negf %212 : vector<2x16xf32>
    %214 = math.exp %213 : vector<2x16xf32>
    %cst_158 = arith.constant 1.000000e+00 : f32
    %215 = vector.broadcast %cst_158 : f32 to vector<2x16xf32>
    %216 = arith.addf %215, %214 : vector<2x16xf32>
    %217 = arith.divf %215, %216 : vector<2x16xf32>
    %cst_159 = arith.constant dense<0.000000e+00> : vector<40x16xf32>
    %218 = tpu.matmul %5, %217, %cst_159 {dimension_numbers = #tpu.dot_dimension_numbers<[1], [0], [0], [1], [0, 0, 1, 1], [], []>} : vector<40x2xf32>, vector<2x16xf32>, vector<40x16xf32> -> vector<40x16xf32>
    %219 = arith.mulf %199, %218 : vector<40x16xf32>
    %220 = arith.addf %219, %141 : vector<40x16xf32>
    %cst_160 = arith.constant 5.000000e-01 : f32
    %221 = vector.broadcast %cst_160 : f32 to vector<40x16xf32>
    %222 = arith.mulf %221, %220 : vector<40x16xf32>
    %cst_161 = arith.constant 4.471500e-02 : f32
    %223 = vector.broadcast %cst_161 : f32 to vector<40x16xf32>
    %224 = arith.mulf %223, %220 : vector<40x16xf32>
    %225 = arith.mulf %224, %220 : vector<40x16xf32>
    %226 = arith.mulf %225, %220 : vector<40x16xf32>
    %227 = arith.addf %220, %226 : vector<40x16xf32>
    %cst_162 = arith.constant 0.797884583 : f32
    %228 = vector.broadcast %cst_162 : f32 to vector<40x16xf32>
    %229 = arith.mulf %228, %227 : vector<40x16xf32>
    %230 = math.tanh %229 : vector<40x16xf32>
    %cst_163 = arith.constant 1.000000e+00 : f32
    %231 = vector.broadcast %cst_163 : f32 to vector<40x16xf32>
    %232 = arith.addf %231, %230 : vector<40x16xf32>
    %233 = arith.mulf %222, %232 : vector<40x16xf32>
    %234 = vector.extract_strided_slice %233 {offsets = [2, 0], sizes = [16, 16], strides = [1, 1]} : vector<40x16xf32> to vector<16x16xf32>
    %235 = tpu.transpose %234, [1, 0] : vector<16x16xf32> -> vector<16x16xf32>
    %c0_164 = arith.constant 0 : index
    %c0_165 = arith.constant 0 : index
    %c0_166 = arith.constant 0 : index
    %236 = vector.load %arg26[%c0_164, %c0_165, %c0_166] : memref<2x16x16xf32, #tpu.memory_space<vmem>>, vector<1x16x16xf32>
    %237 = vector.shape_cast %236 : vector<1x16x16xf32> to vector<16x16xf32>
    %238 = vector.shape_cast %235 : vector<16x16xf32> to vector<1x16x16xf32>
    tpu.vector_store %arg26[%c0_164, %c0_165, %c0_166], %238 {strides = array<i32>} : memref<2x16x16xf32, #tpu.memory_space<vmem>>, vector<1x16x16xf32>,
    %239 = vector.extract_strided_slice %233 {offsets = [22, 0], sizes = [16, 16], strides = [1, 1]} : vector<40x16xf32> to vector<16x16xf32>
    %240 = tpu.transpose %239, [1, 0] : vector<16x16xf32> -> vector<16x16xf32>
    %c1_167 = arith.constant 1 : index
    %c0_168 = arith.constant 0 : index
    %c0_169 = arith.constant 0 : index
    %241 = vector.load %arg26[%c1_167, %c0_168, %c0_169] : memref<2x16x16xf32, #tpu.memory_space<vmem>>, vector<1x16x16xf32>
    %242 = vector.shape_cast %241 : vector<1x16x16xf32> to vector<16x16xf32>
    %243 = vector.shape_cast %240 : vector<16x16xf32> to vector<1x16x16xf32>
    tpu.vector_store %arg26[%c1_167, %c0_168, %c0_169], %243 {strides = array<i32>} : memref<2x16x16xf32, #tpu.memory_space<vmem>>, vector<1x16x16xf32>,
    return
  }
}

</mosaic_0001>

<bundles_post_ra>
// kernel: fused_forward.1
= control target key start
LH: loop header
LB: loop body
LE: loop exit
PB: predicated region body
PF: predicated region fallthrough
CT: control target
= control target key end

     0   :  { %s5733_s0 = inlined_call_operand.vmem [shape: f32[2,4,16], index: 0, kind: input, shape index: {}]   ;;  %s5734_s1 = inlined_call_operand.vmem [shape: f32[2,40], index: 1, kind: input, shape index: {}]   ;;  %s5735_s2 = inlined_call_operand.hbm [shape: f32[40,2], index: 2, kind: input, shape index: {}]   ;;  %s5736_s3 = inlined_call_operand.vmem [shape: f32[5,4,16], index: 3, kind: input, shape index: {}]   ;;  %s5737_s4 = inlined_call_operand.hbm [shape: f32[1,16], index: 4, kind: input, shape index: {}]   ;;  %s5738_s5 = inlined_call_operand.hbm [shape: f32[1,16], index: 5, kind: input, shape index: {}]   ;;  %s5739_s6 = inlined_call_operand.hbm [shape: f32[5,16,16], index: 6, kind: input, shape index: {}]   ;;  %s5740_s7 = inlined_call_operand.hbm [shape: f32[1,16], index: 7, kind: input, shape index: {}]   ;;  %s5741_s8 = inlined_call_operand.hbm [shape: f32[1,16], index: 8, kind: input, shape index: {}]   ;;  %s5742_s9 = inlined_call_operand.vmem [shape: f32[16,4], index: 9, kind: input, shape index: {}]   ;;  %s5743_s10 = inlined_call_operand.hbm [shape: f32[1,4], index: 10, kind: input, shape index: {}]   ;;  %s5744_s11 = inlined_call_operand.hbm [shape: f32[4,16], index: 11, kind: input, shape index: {}]   ;;  %s5745_s12 = inlined_call_operand.hbm [shape: f32[1,16], index: 12, kind: input, shape index: {}]   ;;  %s5746_s13 = inlined_call_operand.hbm [shape: f32[4,16], index: 13, kind: input, shape index: {}]   ;;  %s5747_s14 = inlined_call_operand.hbm [shape: f32[1,16], index: 14, kind: input, shape index: {}]   ;;  %s5748_s15 = inlined_call_operand.hbm [shape: f32[1,16], index: 15, kind: input, shape index: {}]   ;;  %s5749_s16 = inlined_call_operand.vmem [shape: f32[3,16,16], index: 16, kind: input, shape index: {}]   ;;  %s5750_s17 = inlined_call_operand.hbm [shape: f32[1,16], index: 17, kind: input, shape index: {}]   ;;  %s5751_s18 = inlined_call_operand.hbm [shape: f32[1,16], index: 18, kind: input, shape index: {}]   ;;  %s5752_s19 = inlined_call_operand.hbm [shape: f32[3,16,16], index: 19, kind: input, shape index: {}]   ;;  %s5753_s20 = inlined_call_operand.hbm [shape: f32[1,16], index: 20, kind: input, shape index: {}]   ;;  %s5754_s21 = inlined_call_operand.hbm [shape: f32[1,16], index: 21, kind: input, shape index: {}]   ;;  %s5755_s22 = inlined_call_operand.vmem [shape: f32[16,4], index: 22, kind: input, shape index: {}]   ;;  %s5756_s23 = inlined_call_operand.hbm [shape: f32[1,4], index: 23, kind: input, shape index: {}]   ;;  %s5757_s24 = inlined_call_operand.hbm [shape: f32[4,16], index: 24, kind: input, shape index: {}]   ;;  %s5758_s25 = inlined_call_operand.hbm [shape: f32[1,16], index: 25, kind: input, shape index: {}]   ;;  %s5759_s26 = inlined_call_operand.hbm [shape: f32[2,16,16], index: 26, kind: output, shape index: {}]  }
   0x1   :  { %5763 = sst [smem:[#allocation49_spill]] %s5733_s0 }
   0x2   :  { %5764 = sst [smem:[#allocation50_spill]] %s5734_s1 }
   0x3   :  { %5765 = sst [smem:[#allocation51_spill]] %s5735_s2 }
   0x4   :  { %5766 = sst [smem:[#allocation52_spill]] %s5736_s3 }
   0x5   :  { %5767 = sst [smem:[#allocation53_spill]] %s5737_s4 }
   0x6   :  { %5768 = sst [smem:[#allocation54_spill]] %s5738_s5 }
   0x7   :  { %5769 = sst [smem:[#allocation55_spill]] %s5739_s6 }
   0x8   :  { %5770 = sst [smem:[#allocation56_spill]] %s5740_s7 }
   0x9   :  { %5771 = sst [smem:[#allocation57_spill]] %s5741_s8 }
   0xa   :  { %5772 = sst [smem:[#allocation58_spill]] %s5742_s9 }
   0xb   :  { %5773 = sst [smem:[#allocation59_spill]] %s5743_s10 }
   0xc   :  { %5774 = sst [smem:[#allocation60_spill]] %s5759_s26 }
   0xd   :  { %31 = vsyncpa [#allocation5], 0 }
   0xe   :  { %32 = vsyncpa [#allocation8], 0 }
   0xf   :  { %33 = vsyncpa [#allocation11], 0 }
  0x10   :  { %34 = vsyncpa [#allocation14], 0 }
  0x11   :  { %35 = vsyncpa [#allocation17], 0 }
  0x12   :  { %36 = vsyncpa [#allocation20], 0 }
  0x13   :  { %37 = vsyncpa [#allocation23], 0 }
  0x14   :  { %38 = vsyncpa [#allocation26], 0 }
  0x15   :  { %39 = vsyncpa [#allocation29], 0 }
  0x16   :  { %40 = vsyncpa [#allocation32], 0 }
  0x17   :  { %41 = vsyncpa [#allocation35], 0 }
  0x18   :  { %42 = vsyncpa [#allocation6], 0  ;;  %s4760_s27 = smov [#allocation7]  }
  0x19   :  { %s67_s3 = sshll.u32 %s4760_s27, 4  ;;  %s68_s3 = int_to_ptr.vmem [resolvable:$true] %s67_s3 }
  0x1a   :  { %s4324_s7 = scalar_lea.vmem %s68_s3, 16  ;;  %s4328_s28 = scalar_lea.vmem %s68_s3, 32 }
  0x1b   :  { %p4325_p0 = scmp.ne.s32.totalorder %s68_s3, %s4324_s7  ;;  %p4329_p1 = scmp.lt.s32.totalorder %s68_s3, %s68_s3 }
  0x1c   :  { %p4330_p2 = scmp.lt.s32.totalorder %s4328_s28, %s4324_s7 }
  0x1e   :  { %p4331_p3 = por %p4330_p2, %p4329_p1 }
  0x20   :  { %p4332_p4 = pnand %p4331_p3, %p4325_p0 }
  0x22   :  { %4335 = shalt.err (!%p4332_p4)
}
  0x23   :  { %s5775_s29 = sld [smem:[#allocation53_spill]]  ;;  %s4761_s0 = smov [#allocation10]  }
  0x24   :  { %s86_s9 = sshll.u32 %s4761_s0, 4  ;;  %s4762_s30 = smov [#allocation13]   ;;  %s87_s9 = int_to_ptr.vmem [resolvable:$true] %s86_s9 }
  0x25   :  { %s109_s2 = sshll.u32 %s4762_s30, 4  ;;  %s4344_s5 = scalar_lea.vmem %s87_s9, 1280  ;;  %s110_s2 = int_to_ptr.vmem [resolvable:$true] %s109_s2 }
  0x26   :  { %p4345_p5 = scmp.ne.s32.totalorder %s87_s9, %s4344_s5  ;;  %p4349_p6 = scmp.lt.s32.totalorder %s87_s9, %s87_s9 }
  0x27   :  { %p4350_p7 = scmp.lt.s32.totalorder %s4344_s5, %s4344_s5 }
  0x29   :  { %70 = dma.hbm_to_vmem [thread:$0]  %s5775_s29, 16, %s68_s3, [#allocation8]  }
  0x2a   :  { %p4351_p8 = por %p4350_p7, %p4349_p6 }
  0x2c   :  { %p4352_p9 = pnand %p4351_p8, %p4345_p5 }
  0x2e   :  { %4355 = shalt.err (!%p4352_p9)
}
  0x2f   :  { %s4763_s10 = smov 128   ;;  %s4764_s6 = smov 8  }
  0x30   :  { %s5776_s3 = sld [smem:[#allocation55_spill]]  ;;  %s4364_s7 = scalar_lea.vmem %s110_s2, 16 }
  0x31   :  { %p4365_p10 = scmp.ne.s32.totalorder %s110_s2, %s4364_s7  ;;  %s4368_s28 = scalar_lea.vmem %s110_s2, 32 }
  0x32   :  { %p4369_p11 = scmp.lt.s32.totalorder %s110_s2, %s110_s2  ;;  %p4370_p12 = scmp.lt.s32.totalorder %s4368_s28, %s4364_s7 }
  0x34   :  { %p4371_p13 = por %p4370_p12, %p4369_p11 }
  0x36   :  { %92 = dma.hbm_to_vmem [thread:$0]  %s5776_s3, 1280, %s87_s9, [#allocation11], %s4763_s10, %s4763_s10, %s4764_s6  }
  0x37   :  { %p4372_p0 = pnand %p4371_p13, %p4365_p10 }
  0x39   :  { %4375 = shalt.err (!%p4372_p0)
}
  0x3a   :  { %s5777_s29 = sld [smem:[#allocation57_spill]]  ;;  %s4765_s0 = smov [#allocation16]  }
  0x3b   :  { %s131_s30 = sshll.u32 %s4765_s0, 4  ;;  %s4766_s5 = smov [#allocation19]   ;;  %s132_s30 = int_to_ptr.vmem [resolvable:$true] %s131_s30 }
  0x3c   :  { %s151_s26 = sshll.u32 %s4766_s5, 4  ;;  %s4384_s1 = scalar_lea.vmem %s132_s30, 64  ;;  %s152_s26 = int_to_ptr.vmem [resolvable:$true] %s151_s26 }
  0x3d   :  { %p4385_p1 = scmp.ne.s32.totalorder %s132_s30, %s4384_s1  ;;  %p4389_p2 = scmp.lt.s32.totalorder %s132_s30, %s132_s30 }
  0x3e   :  { %p4390_p3 = scmp.lt.s32.totalorder %s4384_s1, %s4384_s1 }
  0x40   :  { %112 = dma.hbm_to_vmem [thread:$0]  %s5777_s29, 16, %s110_s2, [#allocation14]  }
  0x41   :  { %p4391_p4 = por %p4390_p3, %p4389_p2 }
  0x43   :  { %p4392_p5 = pnand %p4391_p4, %p4385_p1 }
  0x45   :  { %4395 = shalt.err (!%p4392_p5)
}
  0x46   :  { %134 = dma.hbm_to_vmem [thread:$0]  %s5744_s11, 64, %s132_s30, [#allocation17]  }
  0x47   :  { %s4404_s3 = scalar_lea.vmem %s152_s26, 64  ;;  %p4409_p7 = scmp.lt.s32.totalorder %s152_s26, %s152_s26 }
  0x48   :  { %p4405_p6 = scmp.ne.s32.totalorder %s152_s26, %s4404_s3  ;;  %p4410_p8 = scmp.lt.s32.totalorder %s4404_s3, %s4404_s3 }
  0x4a   :  { %p4411_p9 = por %p4410_p8, %p4409_p7 }
  0x4c   :  { %p4412_p10 = pnand %p4411_p9, %p4405_p6 }
  0x4e   :  { %4415 = shalt.err (!%p4412_p10)
}
  0x4f   :  { %154 = dma.hbm_to_vmem [thread:$0]  %s5746_s13, 64, %s152_s26, [#allocation20]  }
  0x50   :  { %s4767_s28 = smov [#allocation22]   ;;  %s4768_s4 = smov [#allocation25]  }
  0x51   :  { %s171_s8 = sshll.u32 %s4767_s28, 4  ;;  %s193_s29 = sshll.u32 %s4768_s4, 4  ;;  %s172_s8 = int_to_ptr.vmem [resolvable:$true] %s171_s8  ;;  %s194_s29 = int_to_ptr.vmem [resolvable:$true] %s193_s29 }
  0x52   :  { %s4424_s0 = scalar_lea.vmem %s172_s8, 16  ;;  %s4428_s11 = scalar_lea.vmem %s172_s8, 32 }
  0x53   :  { %p4425_p11 = scmp.ne.s32.totalorder %s172_s8, %s4424_s0  ;;  %p4429_p12 = scmp.lt.s32.totalorder %s172_s8, %s172_s8 }
  0x54   :  { %p4430_p13 = scmp.lt.s32.totalorder %s4428_s11, %s4424_s0 }
  0x56   :  { %p4431_p0 = por %p4430_p13, %p4429_p12 }
  0x58   :  { %p4432_p1 = pnand %p4431_p0, %p4425_p11 }
  0x5a   :  { %4435 = shalt.err (!%p4432_p1)
}
  0x5b   :  { %174 = dma.hbm_to_vmem [thread:$0]  %s5748_s15, 16, %s172_s8, [#allocation23]  }
  0x5c   :  { %s4444_s1 = scalar_lea.vmem %s194_s29, 16  ;;  %s4448_s13 = scalar_lea.vmem %s194_s29, 32 }
  0x5d   :  { %p4445_p2 = scmp.ne.s32.totalorder %s194_s29, %s4444_s1  ;;  %p4449_p3 = scmp.lt.s32.totalorder %s194_s29, %s194_s29 }
  0x5e   :  { %p4450_p4 = scmp.lt.s32.totalorder %s4448_s13, %s4444_s1 }
  0x60   :  { %p4451_p5 = por %p4450_p4, %p4449_p3 }
  0x62   :  { %p4452_p6 = pnand %p4451_p5, %p4445_p2 }
  0x64   :  { %4455 = shalt.err (!%p4452_p6)
}
  0x65   :  { %196 = dma.hbm_to_vmem [thread:$0]  %s5751_s18, 16, %s194_s29, [#allocation26]  }
  0x66   :  { %s4769_s27 = smov [#allocation28]   ;;  %s4770_s2 = smov [#allocation31]  }
  0x67   :  { %s215_s3 = sshll.u32 %s4769_s27, 4  ;;  %s237_s7 = sshll.u32 %s4770_s2, 4  ;;  %s216_s3 = int_to_ptr.vmem [resolvable:$true] %s215_s3  ;;  %s238_s7 = int_to_ptr.vmem [resolvable:$true] %s237_s7 }
  0x68   :  { %s4464_s28 = scalar_lea.vmem %s216_s3, 16  ;;  %s4468_s15 = scalar_lea.vmem %s216_s3, 32 }
  0x69   :  { %p4465_p7 = scmp.ne.s32.totalorder %s216_s3, %s4464_s28  ;;  %p4469_p8 = scmp.lt.s32.totalorder %s216_s3, %s216_s3 }
  0x6a   :  { %p4470_p9 = scmp.lt.s32.totalorder %s4468_s15, %s4464_s28 }
  0x6c   :  { %p4471_p10 = por %p4470_p9, %p4469_p8 }
  0x6e   :  { %p4472_p11 = pnand %p4471_p10, %p4465_p7 }
  0x70   :  { %4475 = shalt.err (!%p4472_p11)
}
  0x71   :  { %218 = dma.hbm_to_vmem [thread:$0]  %s5753_s20, 16, %s216_s3, [#allocation29]  }
  0x72   :  { %s4484_s0 = scalar_lea.vmem %s238_s7, 16  ;;  %s4488_s18 = scalar_lea.vmem %s238_s7, 32 }
  0x73   :  { %p4485_p12 = scmp.ne.s32.totalorder %s238_s7, %s4484_s0  ;;  %p4489_p13 = scmp.lt.s32.totalorder %s238_s7, %s238_s7 }
  0x74   :  { %p4490_p0 = scmp.lt.s32.totalorder %s4488_s18, %s4484_s0 }
  0x76   :  { %p4491_p1 = por %p4490_p0, %p4489_p13 }
  0x78   :  { %p4492_p2 = pnand %p4491_p1, %p4485_p12 }
  0x7a   :  { %4495 = shalt.err (!%p4492_p2)
}
  0x7b   :  { %240 = dma.hbm_to_vmem [thread:$0]  %s5756_s23, 16, %s238_s7, [#allocation32]  }
  0x7c   :  { %s4771_s30 = smov [#allocation4]   ;;  %s4772_s1 = smov [#allocation9]  }
  0x7d   :  { %s52_s5 = sshll.u32 %s4771_s30, 4  ;;  %s77_s13 = sshll.u32 %s4772_s1, 4  ;;  %s53_s5 = int_to_ptr.vmem [resolvable:$true] %s52_s5  ;;  %s78_s13 = int_to_ptr.vmem [resolvable:$true] %s77_s13 }
  0x7e   :  { %s4504_s26 = scalar_lea.vmem %s53_s5, 640  ;;  %p4509_p4 = scmp.lt.s32.totalorder %s53_s5, %s53_s5 }
  0x7f   :  { %p4505_p3 = scmp.ne.s32.totalorder %s53_s5, %s4504_s26  ;;  %p4510_p5 = scmp.lt.s32.totalorder %s4504_s26, %s4504_s26 }
  0x81   :  { %p4511_p6 = por %p4510_p5, %p4509_p4 }
  0x83   :  { %p4512_p7 = pnand %p4511_p6, %p4505_p3 }
  0x85   :  { %4515 = shalt.err (!%p4512_p7)
}
  0x86   :  { %s5778_s27 = sld [smem:[#allocation51_spill]]  ;;  %s4524_s23 = scalar_lea.vmem %s78_s13, 16 }
  0x87   :  { %p4525_p8 = scmp.ne.s32.totalorder %s78_s13, %s4524_s23  ;;  %s4528_s3 = scalar_lea.vmem %s78_s13, 32 }
  0x88   :  { %p4529_p9 = scmp.lt.s32.totalorder %s78_s13, %s78_s13  ;;  %p4530_p10 = scmp.lt.s32.totalorder %s4528_s3, %s4524_s23 }
  0x8a   :  { %p4531_p11 = por %p4530_p10, %p4529_p9 }
  0x8c   :  { %58 = dma.hbm_to_vmem [thread:$0]  %s5778_s27, 640, %s53_s5, [#allocation5], %s4763_s10, %s4763_s10, %s4764_s6  }
  0x8d   :  { %p4532_p12 = pnand %p4531_p11, %p4525_p8 }
  0x8f   :  { %4535 = shalt.err (!%p4532_p12)
}
  0x90   :  { %s5779_s28 = sld [smem:[#allocation54_spill]]  ;;  %s4773_s15 = smov [#allocation12]  }
  0x91   :  { %s99_s8 = sshll.u32 %s4773_s15, 4  ;;  %s4774_s4 = smov [#allocation15]   ;;  %s100_s8 = int_to_ptr.vmem [resolvable:$true] %s99_s8 }
  0x92   :  { %s121_s0 = sshll.u32 %s4774_s4, 4  ;;  %s4544_s18 = scalar_lea.vmem %s100_s8, 16  ;;  %s122_s0 = int_to_ptr.vmem [resolvable:$true] %s121_s0 }
  0x93   :  { %p4545_p13 = scmp.ne.s32.totalorder %s100_s8, %s4544_s18  ;;  %s4548_s29 = scalar_lea.vmem %s100_s8, 32 }
  0x94   :  { %p4549_p0 = scmp.lt.s32.totalorder %s100_s8, %s100_s8  ;;  %p4550_p1 = scmp.lt.s32.totalorder %s4548_s29, %s4544_s18 }
  0x96   :  { %80 = dma.hbm_to_vmem [thread:$0]  %s5779_s28, 16, %s78_s13, [#allocation8]  }
  0x97   :  { %p4551_p2 = por %p4550_p1, %p4549_p0 }
  0x99   :  { %p4552_p3 = pnand %p4551_p2, %p4545_p13 }
  0x9b   :  { %4555 = shalt.err (!%p4552_p3)
}
  0x9c   :  { %s5780_s5 = sld [smem:[#allocation56_spill]]  ;;  %s4564_s1 = scalar_lea.vmem %s122_s0, 16 }
  0x9d   :  { %p4565_p4 = scmp.ne.s32.totalorder %s122_s0, %s4564_s1  ;;  %s4568_s13 = scalar_lea.vmem %s122_s0, 32 }
  0x9e   :  { %p4569_p5 = scmp.lt.s32.totalorder %s122_s0, %s122_s0  ;;  %p4570_p6 = scmp.lt.s32.totalorder %s4568_s13, %s4564_s1 }
  0xa0   :  { %p4571_p7 = por %p4570_p6, %p4569_p5 }
  0xa2   :  { %102 = dma.hbm_to_vmem [thread:$0]  %s5780_s5, 16, %s100_s8, [#allocation11]  }
  0xa3   :  { %p4572_p8 = pnand %p4571_p7, %p4565_p4 }
  0xa5   :  { %4575 = shalt.err (!%p4572_p8)
}
  0xa6   :  { %s5781_s9 = sld [smem:[#allocation59_spill]]  ;;  %s4775_s27 = smov [#allocation18]  }
  0xa7   :  { %s141_s23 = sshll.u32 %s4775_s27, 4  ;;  %s4776_s3 = smov [#allocation21]   ;;  %s142_s23 = int_to_ptr.vmem [resolvable:$true] %s141_s23 }
  0xa8   :  { %s161_s2 = sshll.u32 %s4776_s3, 4  ;;  %s4584_s7 = scalar_lea.vmem %s142_s23, 16  ;;  %s162_s2 = int_to_ptr.vmem [resolvable:$true] %s161_s2 }
  0xa9   :  { %p4585_p9 = scmp.ne.s32.totalorder %s142_s23, %s4584_s7  ;;  %s4588_s28 = scalar_lea.vmem %s142_s23, 32 }
  0xaa   :  { %p4589_p10 = scmp.lt.s32.totalorder %s142_s23, %s142_s23  ;;  %p4590_p11 = scmp.lt.s32.totalorder %s4588_s28, %s4584_s7 }
  0xac   :  { %124 = dma.hbm_to_vmem [thread:$0]  %s5781_s9, 16, %s122_s0, [#allocation14]  }
  0xad   :  { %p4591_p12 = por %p4590_p11, %p4589_p10 }
  0xaf   :  { %p4592_p13 = pnand %p4591_p12, %p4585_p9 }
  0xb1   :  { %4595 = shalt.err (!%p4592_p13)
}
  0xb2   :  { %144 = dma.hbm_to_vmem [thread:$0]  %s5745_s12, 16, %s142_s23, [#allocation17]  }
  0xb3   :  { %s4604_s4 = scalar_lea.vmem %s162_s2, 16  ;;  %s4608_s0 = scalar_lea.vmem %s162_s2, 32 }
  0xb4   :  { %p4605_p0 = scmp.ne.s32.totalorder %s162_s2, %s4604_s4  ;;  %p4609_p1 = scmp.lt.s32.totalorder %s162_s2, %s162_s2 }
  0xb5   :  { %p4610_p2 = scmp.lt.s32.totalorder %s4608_s0, %s4604_s4 }
  0xb7   :  { %p4611_p3 = por %p4610_p2, %p4609_p1 }
  0xb9   :  { %p4612_p4 = pnand %p4611_p3, %p4605_p0 }
  0xbb   :  { %4615 = shalt.err (!%p4612_p4)
}
  0xbc   :  { %164 = dma.hbm_to_vmem [thread:$0]  %s5747_s14, 16, %s162_s2, [#allocation20]  }
  0xbd   :  { %s4777_s11 = smov [#allocation24]   ;;  %s4778_s5 = smov [#allocation27]  }
  0xbe   :  { %s183_s30 = sshll.u32 %s4777_s11, 4  ;;  %s202_s1 = sshll.u32 %s4778_s5, 4  ;;  %s184_s30 = int_to_ptr.vmem [resolvable:$true] %s183_s30  ;;  %s203_s1 = int_to_ptr.vmem [resolvable:$true] %s202_s1 }
  0xbf   :  { %s4624_s13 = scalar_lea.vmem %s184_s30, 16  ;;  %s4628_s12 = scalar_lea.vmem %s184_s30, 32 }
  0xc0   :  { %p4625_p5 = scmp.ne.s32.totalorder %s184_s30, %s4624_s13  ;;  %p4629_p6 = scmp.lt.s32.totalorder %s184_s30, %s184_s30 }
  0xc1   :  { %p4630_p7 = scmp.lt.s32.totalorder %s4628_s12, %s4624_s13 }
  0xc3   :  { %p4631_p8 = por %p4630_p7, %p4629_p6 }
  0xc5   :  { %p4632_p9 = pnand %p4631_p8, %p4625_p5 }
  0xc7   :  { %4635 = shalt.err (!%p4632_p9)
}
  0xc8   :  { %186 = dma.hbm_to_vmem [thread:$0]  %s5750_s17, 16, %s184_s30, [#allocation23]  }
  0xc9   :  { %s4644_s9 = scalar_lea.vmem %s203_s1, 768  ;;  %p4649_p11 = scmp.lt.s32.totalorder %s203_s1, %s203_s1 }
  0xca   :  { %p4645_p10 = scmp.ne.s32.totalorder %s203_s1, %s4644_s9  ;;  %p4650_p12 = scmp.lt.s32.totalorder %s4644_s9, %s4644_s9 }
  0xcc   :  { %p4651_p13 = por %p4650_p12, %p4649_p11 }
  0xce   :  { %p4652_p0 = pnand %p4651_p13, %p4645_p10 }
  0xd0   :  { %4655 = shalt.err (!%p4652_p0)
}
  0xd1   :  { %208 = dma.hbm_to_vmem [thread:$0]  %s5752_s19, 768, %s203_s1, [#allocation26], %s4763_s10, %s4763_s10, %s4764_s6  }
  0xd2   :  { %s4779_s23 = smov [#allocation30]   ;;  %s4780_s2 = smov [#allocation33]  }
  0xd3   :  { %s225_s3 = sshll.u32 %s4779_s23, 4  ;;  %s247_s17 = sshll.u32 %s4780_s2, 4  ;;  %s226_s3 = int_to_ptr.vmem [resolvable:$true] %s225_s3  ;;  %s248_s17 = int_to_ptr.vmem [resolvable:$true] %s247_s17 }
  0xd4   :  { %s4664_s7 = scalar_lea.vmem %s226_s3, 16  ;;  %s4668_s28 = scalar_lea.vmem %s226_s3, 32 }
  0xd5   :  { %p4665_p1 = scmp.ne.s32.totalorder %s226_s3, %s4664_s7  ;;  %p4669_p2 = scmp.lt.s32.totalorder %s226_s3, %s226_s3 }
  0xd6   :  { %p4670_p3 = scmp.lt.s32.totalorder %s4668_s28, %s4664_s7 }
  0xd8   :  { %p4671_p4 = por %p4670_p3, %p4669_p2 }
  0xda   :  { %p4672_p5 = pnand %p4671_p4, %p4665_p1 }
  0xdc   :  { %4675 = shalt.err (!%p4672_p5)
}
  0xdd   :  { %228 = dma.hbm_to_vmem [thread:$0]  %s5754_s21, 16, %s226_s3, [#allocation29]  }
  0xde   :  { %s4684_s4 = scalar_lea.vmem %s248_s17, 64  ;;  %p4689_p7 = scmp.lt.s32.totalorder %s248_s17, %s248_s17 }
  0xdf   :  { %p4685_p6 = scmp.ne.s32.totalorder %s248_s17, %s4684_s4  ;;  %p4690_p8 = scmp.lt.s32.totalorder %s4684_s4, %s4684_s4 }
  0xe1   :  { %p4691_p9 = por %p4690_p8, %p4689_p7 }
  0xe3   :  { %p4692_p10 = pnand %p4691_p9, %p4685_p6 }
  0xe5   :  { %4695 = shalt.err (!%p4692_p10)
}
  0xe6   :  { %250 = dma.hbm_to_vmem [thread:$0]  %s5757_s24, 64, %s248_s17, [#allocation32]  }
  0xe7   :  { %s4781_s18 = smov [#allocation34]  }
  0xe8   :  { %s257_s29 = sshll.u32 %s4781_s18, 4  ;;  %s258_s29 = int_to_ptr.vmem [resolvable:$true] %s257_s29 }
  0xe9   :  { %s4704_s11 = scalar_lea.vmem %s258_s29, 16  ;;  %s4708_s30 = scalar_lea.vmem %s258_s29, 32 }
  0xea   :  { %p4705_p11 = scmp.ne.s32.totalorder %s258_s29, %s4704_s11  ;;  %p4709_p12 = scmp.lt.s32.totalorder %s258_s29, %s258_s29 }
  0xeb   :  { %p4710_p13 = scmp.lt.s32.totalorder %s4708_s30, %s4704_s11 }
  0xed   :  { %p4711_p0 = por %p4710_p13, %p4709_p12 }
  0xef   :  { %p4712_p1 = pnand %p4711_p0, %p4705_p11 }
  0xf1   :  { %4715 = shalt.err (!%p4712_p1)
}
  0xf2   :  { %260 = dma.hbm_to_vmem [thread:$0]  %s5758_s25, 16, %s258_s29, [#allocation35]  }
  0xf3   :  { %4736 = dma.done.wait [#allocation5], 640  }
  0xf4   :  { %4737 = vsyncadd [#allocation5], 4294966656 }
  0xf5   :  { %4738 = dma.done.wait [#allocation8], 32  }
  0xf6   :  { %4739 = vsyncadd [#allocation8], 4294967264 }
  0xf7   :  { %4740 = dma.done.wait [#allocation11], 1296  }
  0xf8   :  { %4741 = vsyncadd [#allocation11], 4294966000 }
  0xf9   :  { %4742 = dma.done.wait [#allocation14], 32  }
  0xfa   :  { %4743 = vsyncadd [#allocation14], 4294967264 }
  0xfb   :  { %4744 = dma.done.wait [#allocation17], 80  }
  0xfc   :  { %4745 = vsyncadd [#allocation17], 4294967216 }
  0xfd   :  { %4746 = dma.done.wait [#allocation20], 80  }
  0xfe   :  { %4747 = vsyncadd [#allocation20], 4294967216 }
  0xff   :  { %4748 = dma.done.wait [#allocation23], 32  }
 0x100   :  { %4749 = vsyncadd [#allocation23], 4294967264 }
 0x101   :  { %4750 = dma.done.wait [#allocation26], 784  }
 0x102   :  { %4751 = vsyncadd [#allocation26], 4294966512 }
 0x103   :  { %4752 = dma.done.wait [#allocation29], 32  }
 0x104   :  { %4753 = vsyncadd [#allocation29], 4294967264 }
 0x105   :  { %4754 = dma.done.wait [#allocation32], 80  }
 0x106   :  { %4755 = vsyncadd [#allocation32], 4294967216 }
 0x107   :  { %4756 = dma.done.wait [#allocation35], 16  }
 0x108   :  { %4757 = vsyncadd [#allocation35], 4294967280  ;;  %vm321_vm0 = vcmask 31744   ;;  %v4782_v0 = vmov 0.0   ;;  %s5782_s1 = sld [smem:[#allocation49_spill]]  ;;  %vm327_vm1 = vcmask 27648  }
 0x109   :  { %325 = vst.msk [vmem:[#allocation2 + $0x18] sm:$0xff] %vm321_vm0, %v4782_v0  ;;  %322 = vst.msk [vmem:[#allocation2] sm:$0xff] %vm321_vm0, %v4782_v0  ;;  %4241 = vmatprep.subr.mxu1 %v4782_v0  ;;  %3846 = vmatprep.subr.mxu0 %v4782_v0  ;;  %v420_v3 = vld [vmem:[#allocation19] sm:$0xf]  ;;  %vm449_vm2 = vcmask 1043456   ;;  %vm4783_vm3 = vmmov 0  }
 0x10a   :  { %323 = vst.msk [vmem:[#allocation2 + $0x8] sm:$0xff] %vm321_vm0, %v4782_v0  ;;  %324 = vst.msk [vmem:[#allocation2 + $0x10] sm:$0xff] %vm321_vm0, %v4782_v0  ;;  %4242 = vmatpush3.msk.msra.mxu1 %vm449_vm2, %v420_v3  ;;  %3857 = vmatprep.mubr.msk.f32.mxu1 %vm4783_vm3, %v4782_v0  ;;  %vm427_vm4 = vcmask 1045504   ;;  %s5783_s9 = sld [smem:[#allocation52_spill]]  ;;  %vm570_vm5 = vcmask 1046528   ;;  %vm890_vm6 = vcmask 1044480  }
 0x10b   :  { %326 = vst.msk [vmem:[#allocation2 + $0x20] sm:$0xff] %vm321_vm0, %v4782_v0  ;;  %3863 = vmatprep.subr.mxu1 %v4782_v0  ;;  %3847 = vmatpush3.msk.msra.mxu0 %vm449_vm2, %v420_v3  ;;  %vm329_vm7 = vcmask 130048   ;;  %v1217_v63 = vld [vmem:[#allocation10 + $0x8] sm:$0xff]  ;;  %v1219_v3 = vld [vmem:[#allocation10 + $0x10] sm:$0xff]  ;;  %vm335_vm8 = vcmask 125952   ;;  %vm1200_vm9 = vcmask 130050  }
 0x10c   :  { %328 = vst.msk [vmem:[#allocation2 + $0x28] sm:$0xf] %vm327_vm1, %v4782_v0  ;;  %3848 = vmatprep.mubr.msk.f32.mxu0 %vm4783_vm3, %v4782_v0  ;;  %3880 = vmatprep.subr.mxu0 %v4782_v0  ;;  %vm1203_vm10 = vcmask 123904   ;;  %vm1205_vm11 = vcmask 130054   ;;  %vm1208_vm12 = vcmask 128000   ;;  %s5784_s4 = sld [smem:[#allocation50_spill]] }
 0x10d   :  { %330 = vst.msk [vmem:[#allocation3] sm:$0xff] %vm329_vm7, %v4782_v0  ;;  %331 = vst.msk [vmem:[#allocation3 + $0x8] sm:$0xff] %vm329_vm7, %v4782_v0  ;;  %vm1819_vm13 = vcmask 326656   ;;  %s5785_s18 = sld [smem:[#allocation58_spill]]  ;;  %vm2082_vm14 = vcmask 1041408   ;;  %vm2066_vm15 = vcmask 15360  }
 0x10e   :  { %v3563_v1 = vld [vmem:[%s5782_s1 + $0x4] sm:$0xf]  ;;  %v343_v2 = vld [vmem:[%s5782_s1] sm:$0xf]  ;;  %332 = vst.msk [vmem:[#allocation3 + $0x10] sm:$0xff] %vm329_vm7, %v4782_v0  ;;  %333 = vst.msk [vmem:[#allocation3 + $0x18] sm:$0xff] %vm329_vm7, %v4782_v0 }
 0x10f   :  { %380 = vxpose.xlu0.b32.start.end [1/1] (short) (narrow) %v3563_v1, 16  ;;  %334 = vst.msk [vmem:[#allocation3 + $0x20] sm:$0xff] %vm329_vm7, %v4782_v0  ;;  %v1216_v1 = vld [vmem:[#allocation10] sm:$0xff] }
 0x110   :  { %v3572_v13 = vld [vmem:[%s5783_s9 + $0x4] sm:$0xf]  ;;  %v567_v28 = vld [vmem:[%s5783_s9] sm:$0xf]  ;;  %v3585_v29 = vld [vmem:[%s5783_s9 + $0x8] sm:$0xf] }
 0x111   :  { %v3592_v38 = vld [vmem:[%s5783_s9 + $0xc] sm:$0xf]  ;;  %v3599_v40 = vld [vmem:[%s5783_s9 + $0x10] sm:$0xf]  ;;  %336 = vst.msk [vmem:[#allocation3 + $0x28] sm:$0xf] %vm335_vm8, %v4782_v0 }
 0x113   :  { %v5023_v10 = vld [vmem:[#allocation2 + $0x28] sm:$0xf] }
 0x114   :  { %344 = vxpose.xlu0.b32.start.end [1/1] (short) (narrow) %v343_v2, 16  ;;  %v437_v15 = vrot.slane %v5023_v10, 2  ;;  %v580_v37 = vrot.slane %v5023_v10, 1  ;;  %v900_v55 = vrot.slane %v5023_v10, 3  ;;  %v1021_v61 = vrot.slane %v5023_v10, 4  ;;  %v1220_v2 = vld [vmem:[#allocation10 + $0x18] sm:$0xff] }
 0x18b   :  { %v396_v4 = vpop.trf.xlu0 }
 0x18c   :  { %412 = vst.msk [vmem:[#allocation2 + $0x18] sm:$0xff] %vm321_vm0, %v396_v4 }
 0x18f   :  { %v397_v5 = vpop.trf.xlu0 }
 0x190   :  { %413 = vst.msk [vmem:[#allocation2 + $0x20] sm:$0xff] %vm321_vm0, %v397_v5 }
 0x193   :  { %v360_v6 = vpop.trf.xlu0  ;;  %v5019_v7 = vld [vmem:[#allocation2 + $0x18] sm:$0xff] }
 0x194   :  { %376 = vst.msk [vmem:[#allocation2 + $0x4] sm:$0xff] %vm321_vm0, %v360_v6  ;;  %v433_v11 = vrot.slane %v5019_v7, 2  ;;  %v576_v32 = vrot.slane %v5019_v7, 1  ;;  %v896_v47 = vrot.slane %v5019_v7, 3  ;;  %v1017_v56 = vrot.slane %v5019_v7, 4 }
 0x197   :  { %v361_v8 = vpop.trf.xlu0  ;;  %v5021_v9 = vld [vmem:[#allocation2 + $0x20] sm:$0xff] }
 0x198   :  { %377 = vst.msk [vmem:[#allocation2 + $0xc] sm:$0xff] %vm321_vm0, %v361_v8  ;;  %v435_v12 = vrot.slane %v5021_v9, 2  ;;  %v578_v35 = vrot.slane %v5021_v9, 1  ;;  %v898_v51 = vrot.slane %v5021_v9, 3  ;;  %v1019_v59 = vrot.slane %v5021_v9, 4 }
 0x19a   :  { %v5032_v14 = vsel %vm427_vm4, %v433_v11, %v435_v12  ;;  %v5044_v17 = vsel %vm427_vm4, %v435_v12, %v437_v15  ;;  %v579_v36 = vsel %vm570_vm5, %v576_v32, %v578_v35  ;;  %v581_v39 = vsel %vm570_vm5, %v578_v35, %v580_v37 }
 0x19b   :  { %3858 = vmatmul.mubr.msk.f32.vlgmr.msra.gmra.mxu1 %vm321_vm0, %v5032_v14  ;;  %v5040_v16 = vld [vmem:[#allocation2] sm:$0xff]  ;;  %v899_v53 = vsel %vm890_vm6, %v896_v47, %v898_v51  ;;  %v901_v57 = vsel %vm890_vm6, %v898_v51, %v900_v55  ;;  %v1020_v60 = vsel %vm449_vm2, %v1017_v56, %v1019_v59  ;;  %v1022_v62 = vsel %vm449_vm2, %v1019_v59, %v1021_v61 }
 0x19c   :  { %3860 = vmatprep.mubr.msk.f32.mxu1 %vm4783_vm3, %v4782_v0  ;;  %3864 = vmatpush3.msk.msra.mxu1 %vm449_vm2, %v3572_v13  ;;  %v428_v20 = vrot.slane %v5040_v16, 2  ;;  %v571_v22 = vrot.slane %v5040_v16, 1  ;;  %v891_v42 = vrot.slane %v5040_v16, 3  ;;  %v1012_v48 = vrot.slane %v5040_v16, 4 }
 0x19d   :  { %3897 = vmatprep.subr.mxu1 %v4782_v0 }
 0x19f   :  { %3861 = vmatmul.mubr.msk.f32.gmra.mxu1 %vm321_vm0, %v5044_v17  ;;  %v5048_v18 = vld [vmem:[#allocation2 + $0x8] sm:$0xff]  ;;  %v5050_v19 = vld [vmem:[#allocation2 + $0x10] sm:$0xff] }
 0x1a0   :  { %3865 = vmatprep.mubr.msk.f32.mxu1 %vm4783_vm3, %v4782_v0  ;;  %v429_v21 = vrot.slane %v5048_v18, 2  ;;  %v572_v23 = vrot.slane %v5048_v18, 1  ;;  %v431_v26 = vrot.slane %v5050_v19, 2  ;;  %v574_v27 = vrot.slane %v5050_v19, 1 }
 0x1a1   :  { %v892_v41 = vrot.slane %v5048_v18, 3  ;;  %v894_v44 = vrot.slane %v5050_v19, 3  ;;  %v1013_v46 = vrot.slane %v5048_v18, 4  ;;  %v1015_v52 = vrot.slane %v5050_v19, 4 }
 0x1a2   :  { %v430_v24 = vsel %vm427_vm4, %v428_v20, %v429_v21  ;;  %v573_v25 = vsel %vm570_vm5, %v571_v22, %v572_v23  ;;  %v432_v30 = vsel %vm427_vm4, %v429_v21, %v431_v26  ;;  %v575_v31 = vsel %vm570_vm5, %v572_v23, %v574_v27 }
 0x1a3   :  { %3849 = vmatmul.mubr.msk.f32.vlgmr.msra.gmra.mxu0 %vm321_vm0, %v430_v24  ;;  %3866 = vmatmul.mubr.msk.f32.vlgmr.msra.gmra.mxu1 %vm321_vm0, %v573_v25  ;;  %v434_v33 = vsel %vm427_vm4, %v431_v26, %v433_v11  ;;  %v577_v34 = vsel %vm570_vm5, %v574_v27, %v576_v32  ;;  %v893_v43 = vsel %vm890_vm6, %v891_v42, %v892_v41 }
 0x1a4   :  { %3851 = vmatprep.mubr.msk.f32.mxu0 %vm4783_vm3, %v4782_v0  ;;  %3868 = vmatprep.mubr.msk.f32.mxu1 %vm4783_vm3, %v4782_v0  ;;  %v895_v45 = vsel %vm890_vm6, %v892_v41, %v894_v44  ;;  %v897_v49 = vsel %vm890_vm6, %v894_v44, %v896_v47  ;;  %v1014_v50 = vsel %vm449_vm2, %v1012_v48, %v1013_v46 }
 0x1a5   :  { %3881 = vmatpush3.msk.msra.mxu0 %vm449_vm2, %v567_v28  ;;  %3898 = vmatpush3.msk.msra.mxu1 %vm449_vm2, %v3585_v29  ;;  %v1016_v54 = vsel %vm449_vm2, %v1013_v46, %v1015_v52  ;;  %v1018_v58 = vsel %vm449_vm2, %v1015_v52, %v1017_v56 }
 0x1a6   :  { %3914 = vmatprep.subr.mxu0 %v4782_v0  ;;  %3931 = vmatprep.subr.mxu1 %v4782_v0 }
 0x1a7   :  { %3852 = vmatmul.mubr.msk.f32.gmra.mxu0 %vm321_vm0, %v432_v30  ;;  %3869 = vmatmul.mubr.msk.f32.gmra.mxu1 %vm321_vm0, %v575_v31 }
 0x1a8   :  { %3854 = vmatprep.mubr.msk.f32.mxu0 %vm4783_vm3, %v4782_v0  ;;  %3871 = vmatprep.mubr.msk.f32.mxu1 %vm4783_vm3, %v4782_v0 }
 0x1ab   :  { %3855 = vmatmul.mubr.msk.f32.gmra.mxu0 %vm321_vm0, %v434_v33  ;;  %3872 = vmatmul.mubr.msk.f32.gmra.mxu1 %vm321_vm0, %v577_v34 }
 0x1ac   :  { %3874 = vmatprep.mubr.msk.f32.mxu1 %vm4783_vm3, %v4782_v0  ;;  %3882 = vmatprep.mubr.msk.f32.mxu0 %vm4783_vm3, %v4782_v0 }
 0x1af   :  { %3875 = vmatmul.mubr.msk.f32.gmra.mxu1 %vm321_vm0, %v579_v36  ;;  %3883 = vmatmul.mubr.msk.f32.vlgmr.msra.gmra.mxu0 %vm321_vm0, %v5040_v16 }
 0x1b0   :  { %3877 = vmatprep.mubr.msk.f32.mxu1 %vm4783_vm3, %v4782_v0  ;;  %3885 = vmatprep.mubr.msk.f32.mxu0 %vm4783_vm3, %v4782_v0 }
 0x1b1   :  { %3915 = vmatpush3.msk.msra.mxu0 %vm449_vm2, %v3592_v38 }
 0x1b2   :  { %3948 = vmatprep.subr.mxu0 %v4782_v0 }
 0x1b3   :  { %3878 = vmatmul.mubr.msk.f32.gmra.mxu1 %vm321_vm0, %v581_v39  ;;  %3886 = vmatmul.mubr.msk.f32.gmra.mxu0 %vm321_vm0, %v5048_v18 }
 0x1b4   :  { %3888 = vmatprep.mubr.msk.f32.mxu0 %vm4783_vm3, %v4782_v0  ;;  %3899 = vmatprep.mubr.msk.f32.mxu1 %vm4783_vm3, %v4782_v0 }
 0x1b7   :  { %3889 = vmatmul.mubr.msk.f32.gmra.mxu0 %vm321_vm0, %v5050_v19  ;;  %3900 = vmatmul.mubr.msk.f32.vlgmr.msra.gmra.mxu1 %vm321_vm0, %v430_v24 }
 0x1b8   :  { %3891 = vmatprep.mubr.msk.f32.mxu0 %vm4783_vm3, %v4782_v0  ;;  %3902 = vmatprep.mubr.msk.f32.mxu1 %vm4783_vm3, %v4782_v0 }
 0x1b9   :  { %3932 = vmatpush3.msk.msra.mxu1 %vm449_vm2, %v3599_v40 }
 0x1ba   :  { %3967 = vmatprep.subr.mxu1 %v4782_v0 }
 0x1bb   :  { %3892 = vmatmul.mubr.msk.f32.gmra.mxu0 %vm321_vm0, %v5019_v7  ;;  %3903 = vmatmul.mubr.msk.f32.gmra.mxu1 %vm321_vm0, %v432_v30 }
 0x1bc   :  { %3894 = vmatprep.mubr.msk.f32.mxu0 %vm4783_vm3, %v4782_v0  ;;  %3905 = vmatprep.mubr.msk.f32.mxu1 %vm4783_vm3, %v4782_v0 }
 0x1bf   :  { %3895 = vmatmul.mubr.msk.f32.gmra.mxu0 %vm321_vm0, %v5021_v9  ;;  %3906 = vmatmul.mubr.msk.f32.gmra.mxu1 %vm321_vm0, %v434_v33 }
 0x1c0   :  { %3908 = vmatprep.mubr.msk.f32.mxu1 %vm4783_vm3, %v4782_v0  ;;  %3916 = vmatprep.mubr.msk.f32.mxu0 %vm4783_vm3, %v4782_v0 }
 0x1c3   :  { %3909 = vmatmul.mubr.msk.f32.gmra.mxu1 %vm321_vm0, %v5032_v14  ;;  %3917 = vmatmul.mubr.msk.f32.vlgmr.msra.gmra.mxu0 %vm321_vm0, %v893_v43 }
 0x1c4   :  { %3911 = vmatprep.mubr.msk.f32.mxu1 %vm4783_vm3, %v4782_v0  ;;  %3919 = vmatprep.mubr.msk.f32.mxu0 %vm4783_vm3, %v4782_v0 }
 0x1c5   :  { %3949 = vmatpush3.msra.mxu0 %v1220_v2 }
 0x1c6   :  { %3950 = vmatprep.subr.mxu0 %v4782_v0 }
 0x1c7   :  { %3912 = vmatmul.mubr.msk.f32.gmra.mxu1 %vm321_vm0, %v5044_v17  ;;  %3920 = vmatmul.mubr.msk.f32.gmra.mxu0 %vm321_vm0, %v895_v45 }
 0x1c8   :  { %3922 = vmatprep.mubr.msk.f32.mxu0 %vm4783_vm3, %v4782_v0  ;;  %3933 = vmatprep.mubr.msk.f32.mxu1 %vm4783_vm3, %v4782_v0 }
 0x1c9   :  { %3951 = vmatpush3.msra.mxu0 %v1219_v3 }
 0x1ca   :  { %3986 = vmatprep.subr.mxu0 %v4782_v0 }
 0x1cb   :  { %3923 = vmatmul.mubr.msk.f32.gmra.mxu0 %vm321_vm0, %v897_v49  ;;  %3934 = vmatmul.mubr.msk.f32.vlgmr.msra.gmra.mxu1 %vm321_vm0, %v1014_v50 }
 0x1cc   :  { %3925 = vmatprep.mubr.msk.f32.mxu0 %vm4783_vm3, %v4782_v0  ;;  %3936 = vmatprep.mubr.msk.f32.mxu1 %vm4783_vm3, %v4782_v0 }
 0x1cd   :  { %3968 = vmatpush3.msra.mxu1 %v1217_v63 }
 0x1ce   :  { %3969 = vmatprep.subr.mxu1 %v4782_v0 }
 0x1cf   :  { %3926 = vmatmul.mubr.msk.f32.gmra.mxu0 %vm321_vm0, %v899_v53  ;;  %3937 = vmatmul.mubr.msk.f32.gmra.mxu1 %vm321_vm0, %v1016_v54  ;;  %v3606_v54 = vld [vmem:[#allocation7] ss:$0 sm:$0xff] }
 0x1d0   :  { %3928 = vmatprep.mubr.msk.f32.mxu0 %vm4783_vm3, %v4782_v0  ;;  %3939 = vmatprep.mubr.msk.f32.mxu1 %vm4783_vm3, %v4782_v0 }
 0x1d1   :  { %3970 = vmatpush3.msra.mxu1 %v1216_v1 }
 0x1d2   :  { %4005 = vmatprep.subr.mxu1 %v4782_v0 }
 0x1d3   :  { %3929 = vmatmul.mubr.msk.f32.gmra.mxu0 %vm321_vm0, %v901_v57  ;;  %3940 = vmatmul.mubr.msk.f32.gmra.mxu1 %vm321_vm0, %v1018_v58  ;;  %v3607_v57 = vld [vmem:[#allocation9] ss:$0 sm:$0xff] }
 0x1d4   :  { %3942 = vmatprep.mubr.msk.f32.mxu1 %vm4783_vm3, %v4782_v0  ;;  %3952 = vmatprep.mubr.msk.f32.mxu0 %vm4783_vm3, %v4782_v0 }
 0x1d7   :  { %3943 = vmatmul.mubr.msk.f32.gmra.mxu1 %vm321_vm0, %v1020_v60 }
 0x1d8   :  { %3945 = vmatprep.mubr.msk.f32.mxu1 %vm4783_vm3, %v4782_v0 }
 0x1db   :  { %3946 = vmatmul.mubr.msk.f32.gmra.mxu1 %vm321_vm0, %v1022_v62 }
 0x1dc   :  { %3971 = vmatprep.mubr.msk.f32.mxu1 %vm4783_vm3, %v4782_v0 }
 0x25b   :  { %v5219_v4 = vpop.f32.mrf.mxu1 }
 0x25d   :  { %v3859_v5 = vpop.f32.mrf.mxu1 }
 0x25f   :  { %v5221_v6 = vpop.f32.mrf.mxu1 }
 0x261   :  { %v3862_v7 = vpop.f32.mrf.mxu1 }
 0x263   :  { %v5223_v8 = vpop.f32.mrf.mxu0  ;;  %v661_v9 = vpop.f32.mrf.mxu1 }
 0x265   :  { %v3850_v10 = vpop.f32.mrf.mxu0  ;;  %v3867_v11 = vpop.f32.mrf.mxu1 }
 0x267   :  { %v5225_v12 = vpop.f32.mrf.mxu0  ;;  %v666_v13 = vpop.f32.mrf.mxu1 }
 0x269   :  { %v3853_v14 = vpop.f32.mrf.mxu0  ;;  %v3870_v15 = vpop.f32.mrf.mxu1 }
 0x26b   :  { %v5227_v16 = vpop.f32.mrf.mxu0  ;;  %v671_v17 = vpop.f32.mrf.mxu1 }
 0x26d   :  { %v3856_v18 = vpop.f32.mrf.mxu0  ;;  %v3873_v19 = vpop.f32.mrf.mxu1 }
 0x26f   :  { %v676_v20 = vpop.f32.mrf.mxu1  ;;  %v764_v21 = vpop.f32.mrf.mxu0 }
 0x270   :  { %v765_v44 = vadd.f32 %v764_v21, %v661_v9 }
 0x271   :  { %v3876_v22 = vpop.f32.mrf.mxu1  ;;  %v3884_v23 = vpop.f32.mrf.mxu0 }
 0x273   :  { %v681_v24 = vpop.f32.mrf.mxu1  ;;  %v769_v25 = vpop.f32.mrf.mxu0 }
 0x274   :  { %v770_v50 = vadd.f32 %v769_v25, %v666_v13 }
 0x275   :  { %v3879_v26 = vpop.f32.mrf.mxu1  ;;  %v3887_v27 = vpop.f32.mrf.mxu0 }
 0x277   :  { %v774_v28 = vpop.f32.mrf.mxu0  ;;  %v859_v29 = vpop.f32.mrf.mxu1 }
 0x278   :  { %v883_v47 = vadd.f32 %v859_v29, %v765_v44  ;;  %v775_v60 = vadd.f32 %v774_v28, %v671_v17 }
 0x279   :  { %v3890_v30 = vpop.f32.mrf.mxu0  ;;  %v3901_v31 = vpop.f32.mrf.mxu1 }
 0x27b   :  { %v779_v32 = vpop.f32.mrf.mxu0  ;;  %v864_v33 = vpop.f32.mrf.mxu1 }
 0x27c   :  { %v884_v55 = vadd.f32 %v864_v33, %v770_v50  ;;  %v780_v10 = vadd.f32 %v779_v32, %v676_v20 }
 0x27d   :  { %v3893_v34 = vpop.f32.mrf.mxu0  ;;  %v3904_v35 = vpop.f32.mrf.mxu1 }
 0x27f   :  { %v784_v36 = vpop.f32.mrf.mxu0  ;;  %v869_v37 = vpop.f32.mrf.mxu1 }
 0x280   :  { %v885_v2 = vadd.f32 %v869_v37, %v775_v60  ;;  %v785_v17 = vadd.f32 %v784_v36, %v681_v24 }
 0x281   :  { %v3896_v38 = vpop.f32.mrf.mxu0  ;;  %v3907_v39 = vpop.f32.mrf.mxu1 }
 0x283   :  { %v874_v40 = vpop.f32.mrf.mxu1  ;;  %v981_v41 = vpop.f32.mrf.mxu0 }
 0x284   :  { %v1005_v51 = vadd.f32 %v981_v41, %v883_v47  ;;  %v886_v19 = vadd.f32 %v874_v40, %v780_v10 }
 0x285   :  { %v3910_v42 = vpop.f32.mrf.mxu1  ;;  %v3918_v43 = vpop.f32.mrf.mxu0 }
 0x287   :  { %v879_v45 = vpop.f32.mrf.mxu1  ;;  %v986_v46 = vpop.f32.mrf.mxu0 }
 0x288   :  { %v1006_v61 = vadd.f32 %v986_v46, %v884_v55  ;;  %v887_v31 = vadd.f32 %v879_v45, %v785_v17 }
 0x289   :  { %v3913_v48 = vpop.f32.mrf.mxu1  ;;  %v3921_v49 = vpop.f32.mrf.mxu0 }
 0x28b   :  { %v991_v52 = vpop.f32.mrf.mxu0  ;;  %v1102_v53 = vpop.f32.mrf.mxu1 }
 0x28c   :  { %v1126_v56 = vadd.f32 %v1102_v53, %v1005_v51  ;;  %v1007_v11 = vadd.f32 %v991_v52, %v885_v2 }
 0x28d   :  { %v3924_v58 = vpop.f32.mrf.mxu0  ;;  %v3935_v59 = vpop.f32.mrf.mxu1 }
 0x28e   :  { %v1138_v62 = vmul.f32 %v3606_v54, %v1126_v56 }
 0x28f   :  { %v996_v63 = vpop.f32.mrf.mxu0  ;;  %v1107_v1 = vpop.f32.mrf.mxu1 }
 0x290   :  { %v1150_v3 = vadd.f32 %v3607_v57, %v1138_v62  ;;  %v1127_v5 = vadd.f32 %v1107_v1, %v1006_v61  ;;  %v1008_v28 = vadd.f32 %v996_v63, %v886_v19 }
 0x291   :  { %v3927_v7 = vpop.f32.mrf.mxu0  ;;  %v3938_v9 = vpop.f32.mrf.mxu1 }
 0x292   :  { %v1160_v13 = vmul.f32 0.044715, %v1150_v3  ;;  %v1139_v14 = vmul.f32 %v3606_v54, %v1127_v5  ;;  %v1155_v2 = vmul.f32 0.5, %v1150_v3 }
 0x293   :  { %v1001_v15 = vpop.f32.mrf.mxu0  ;;  %v1112_v18 = vpop.f32.mrf.mxu1 }
 0x294   :  { %v1165_v21 = vmul.f32 %v1160_v13, %v1150_v3  ;;  %v1151_v22 = vadd.f32 %v3607_v57, %v1139_v14  ;;  %v1128_v23 = vadd.f32 %v1112_v18, %v1007_v11  ;;  %v1009_v40 = vadd.f32 %v1001_v15, %v887_v31 }
 0x295   :  { %v3930_v25 = vpop.f32.mrf.mxu0  ;;  %v3941_v26 = vpop.f32.mrf.mxu1 }
 0x296   :  { %v1170_v27 = vmul.f32 %v1165_v21, %v1150_v3  ;;  %v1161_v29 = vmul.f32 0.044715, %v1151_v22  ;;  %v1140_v30 = vmul.f32 %v3606_v54, %v1128_v23 }
 0x297   :  { %v1117_v33 = vpop.f32.mrf.mxu1 }
 0x298   :  { %v1175_v34 = vadd.f32 %v1170_v27, %v1150_v3  ;;  %v1166_v20 = vmul.f32 %v1161_v29, %v1151_v22  ;;  %v1152_v32 = vadd.f32 %v3607_v57, %v1140_v30  ;;  %v1129_v35 = vadd.f32 %v1117_v33, %v1008_v28  ;;  %v1559_v3 = vld [vmem:[#allocation10 + $0x38] sm:$0xff] }
 0x299   :  { %v3944_v37 = vpop.f32.mrf.mxu1 }
 0x29a   :  { %v1180_v38 = vmul.f32 0.7978846, %v1175_v34  ;;  %v1171_v39 = vmul.f32 %v1166_v20, %v1151_v22  ;;  %v1162_v41 = vmul.f32 0.044715, %v1152_v32  ;;  %v1141_v42 = vmul.f32 %v3606_v54, %v1129_v35  ;;  %v1440_v20 = vld [vmem:[#allocation10 + $0x28] sm:$0xff]  ;;  %v1439_v37 = vld [vmem:[#allocation10 + $0x20] sm:$0xff] }
 0x29b   :  { %v1122_v43 = vpop.f32.mrf.mxu1  ;;  %v1157_v14 = vmul.f32 0.5, %v1152_v32 }
 0x29c   :  { %4268 = vtanh.f32 %v1180_v38  ;;  %v1176_v24 = vadd.f32 %v1171_v39, %v1151_v22  ;;  %v1167_v36 = vmul.f32 %v1162_v41, %v1152_v32  ;;  %v1130_v44 = vadd.f32 %v1122_v43, %v1009_v40 }
 0x29d   :  { %v1153_v46 = vadd.f32 %v3607_v57, %v1141_v42  ;;  %v3947_v47 = vpop.f32.mrf.mxu1 }
 0x29e   :  { %v1181_v48 = vmul.f32 0.7978846, %v1176_v24  ;;  %v1172_v45 = vmul.f32 %v1167_v36, %v1152_v32  ;;  %v1142_v49 = vmul.f32 %v3606_v54, %v1130_v44  ;;  %v5281_v36 = vld [vmem:[#allocation3 + $0x28] sm:$0xf] }
 0x29f   :  { %v1163_v50 = vmul.f32 0.044715, %v1153_v46  ;;  %v1158_v23 = vmul.f32 0.5, %v1153_v46  ;;  %v1236_v47 = vrot.slane %v5281_v36, 1 }
 0x2a0   :  { %4270 = vtanh.f32 %v1181_v48  ;;  %v1177_v51 = vadd.f32 %v1172_v45, %v1152_v32  ;;  %v1154_v52 = vadd.f32 %v3607_v57, %v1142_v49  ;;  %v1156_v57 = vmul.f32 0.5, %v1151_v22  ;;  %v1558_v22 = vld [vmem:[#allocation10 + $0x30] sm:$0xff] }
 0x2a1   :  { %v1168_v53 = vmul.f32 %v1163_v50, %v1153_v46 }
 0x2a2   :  { %v1182_v55 = vmul.f32 0.7978846, %v1177_v51  ;;  %v1164_v56 = vmul.f32 0.044715, %v1154_v52  ;;  %v1159_v28 = vmul.f32 0.5, %v1154_v52 }
 0x2a3   :  { %v1173_v58 = vmul.f32 %v1168_v53, %v1153_v46 }
 0x2a4   :  { %4272 = vtanh.f32 %v1182_v55  ;;  %v1169_v59 = vmul.f32 %v1164_v56, %v1154_v52 }
 0x2a5   :  { %v1178_v60 = vadd.f32 %v1173_v58, %v1153_v46  ;;  %v1678_v58 = vld [vmem:[#allocation10 + $0x48] sm:$0xff] }
 0x2a6   :  { %v1174_v61 = vmul.f32 %v1169_v59, %v1154_v52 }
 0x2a7   :  { %v1183_v62 = vmul.f32 0.7978846, %v1178_v60 }
 0x2a8   :  { %v1179_v63 = vadd.f32 %v1174_v61, %v1154_v52 }
 0x2a9   :  { %v4269_v1 = vpop.eup %4268  ;;  %4274 = vtanh.f32 %v1183_v62 }
 0x2aa   :  { %v1190_v5 = vadd.f32 1.0, %v4269_v1  ;;  %v1184_v7 = vmul.f32 0.7978846, %v1179_v63  ;;  %v1677_v63 = vld [vmem:[#allocation10 + $0x40] sm:$0xff] }
 0x2ac   :  { %v1195_v54 = vmul.f32 %v1190_v5, %v1155_v2  ;;  %4276 = vtanh.f32 %v1184_v7  ;;  %v1569_v2 = vrot.slane %v5281_v36, 3 }
 0x2ad   :  { %v4271_v9 = vpop.eup %4270 }
 0x2ae   :  { %1201 = vst.msk [vmem:[#allocation3 + $0x2] sm:$0xfc] %vm1200_vm9, %v1195_v54  ;;  %v1191_v10 = vadd.f32 1.0, %v4271_v9 }
 0x2b0   :  { %v1196_v11 = vmul.f32 %v1191_v10, %v1156_v57  ;;  %v1450_v57 = vrot.slane %v5281_v36, 2 }
 0x2b1   :  { %v4273_v13 = vpop.eup %4272 }
 0x2b2   :  { %1202 = vst.msk [vmem:[#allocation3 + $0xa] sm:$0xff] %vm329_vm7, %v1196_v11  ;;  %v1192_v15 = vadd.f32 1.0, %v4273_v13 }
 0x2b4   :  { %v1197_v18 = vmul.f32 %v1192_v15, %v1157_v14 }
 0x2b5   :  { %v5231_v19 = vld [vmem:[#allocation3] sm:$0xff] }
 0x2b6   :  { %v4275_v21 = vpop.eup %4274  ;;  %1204 = vst.msk [vmem:[#allocation3 + $0x12] sm:$0x3] %vm1203_vm10, %v1197_v18  ;;  %3972 = vmatmul.mubr.msk.f32.vlgmr.msra.gmra.mxu1 %vm329_vm7, %v5231_v19  ;;  %v1227_v30 = vrot.slane %v5231_v19, 1  ;;  %v1560_v46 = vrot.slane %v5231_v19, 3  ;;  %v1441_v53 = vrot.slane %v5231_v19, 2  ;;  %v1679_v13 = vrot.slane %v5231_v19, 4 }
 0x2b7   :  { %1206 = vst.msk [vmem:[#allocation3 + $0x12] sm:$0xc0] %vm1205_vm11, %v1197_v18  ;;  %v1193_v17 = vadd.f32 1.0, %v4275_v21  ;;  %3974 = vmatprep.mubr.msk.f32.mxu1 %vm4783_vm3, %v4782_v0  ;;  %4006 = vmatpush3.msra.mxu1 %v1559_v3 }
 0x2b8   :  { %4007 = vmatprep.subr.mxu1 %v4782_v0 }
 0x2b9   :  { %v4277_v25 = vpop.eup %4276  ;;  %v1198_v26 = vmul.f32 %v1193_v17, %v1158_v23  ;;  %v5240_v27 = vld [vmem:[#allocation3 + $0x8] sm:$0xff]  ;;  %4008 = vmatpush3.msra.mxu1 %v1558_v22  ;;  %v1688_v23 = vrot.slane %v5281_v36, 4 }
 0x2ba   :  { %v1194_v29 = vadd.f32 1.0, %v4277_v25  ;;  %3975 = vmatmul.mubr.msk.f32.gmra.mxu1 %vm329_vm7, %v5240_v27  ;;  %v1228_v31 = vrot.slane %v5240_v27, 1  ;;  %4043 = vmatprep.subr.mxu1 %v4782_v0  ;;  %v1561_v24 = vrot.slane %v5240_v27, 3  ;;  %v1442_v50 = vrot.slane %v5240_v27, 2 }
 0x2bb   :  { %1207 = vst.msk [vmem:[#allocation3 + $0x1a] sm:$0xff] %vm329_vm7, %v1198_v26  ;;  %3977 = vmatprep.mubr.msk.f32.mxu1 %vm4783_vm3, %v4782_v0  ;;  %v1680_v11 = vrot.slane %v5240_v27, 4 }
 0x2bc   :  { %v1199_v33 = vmul.f32 %v1194_v29, %v1159_v28  ;;  %v1229_v34 = vsel %vm570_vm5, %v1227_v30, %v1228_v31  ;;  %v1562_v48 = vsel %vm890_vm6, %v1560_v46, %v1561_v24  ;;  %v1443_v55 = vsel %vm427_vm4, %v1441_v53, %v1442_v50 }
 0x2bd   :  { %3953 = vmatmul.mubr.msk.f32.vlgmr.msra.gmra.mxu0 %vm329_vm7, %v1229_v34  ;;  %v5252_v32 = vld [vmem:[#allocation3 + $0x10] sm:$0xff]  ;;  %v1681_v14 = vsel %vm449_vm2, %v1679_v13, %v1680_v11 }
 0x2be   :  { %1209 = vst.msk [vmem:[#allocation3 + $0x22] sm:$0x3f] %vm1208_vm12, %v1199_v33  ;;  %3978 = vmatmul.mubr.msk.f32.gmra.mxu1 %vm329_vm7, %v5252_v32  ;;  %3955 = vmatprep.mubr.msk.f32.mxu0 %vm4783_vm3, %v4782_v0  ;;  %v1230_v35 = vrot.slane %v5252_v32, 1  ;;  %v1563_v45 = vrot.slane %v5252_v32, 3  ;;  %v1444_v56 = vrot.slane %v5252_v32, 2  ;;  %v1682_v15 = vrot.slane %v5252_v32, 4 }
 0x2bf   :  { %3980 = vmatprep.mubr.msk.f32.mxu1 %vm4783_vm3, %v4782_v0  ;;  %3987 = vmatpush3.msra.mxu0 %v1440_v20 }
 0x2c0   :  { %v1231_v38 = vsel %vm570_vm5, %v1228_v31, %v1230_v35  ;;  %3988 = vmatprep.subr.mxu0 %v4782_v0  ;;  %v1564_v51 = vsel %vm890_vm6, %v1561_v24, %v1563_v45  ;;  %v1445_v61 = vsel %vm427_vm4, %v1442_v50, %v1444_v56  ;;  %v1683_v18 = vsel %vm449_vm2, %v1680_v11, %v1682_v15 }
 0x2c1   :  { %3956 = vmatmul.mubr.msk.f32.gmra.mxu0 %vm329_vm7, %v1231_v38 }
 0x2c2   :  { %v5265_v39 = vld [vmem:[#allocation3 + $0x18] sm:$0xff]  ;;  %3958 = vmatprep.mubr.msk.f32.mxu0 %vm4783_vm3, %v4782_v0  ;;  %3989 = vmatpush3.msra.mxu0 %v1439_v37 }
 0x2c3   :  { %3981 = vmatmul.mubr.msk.f32.gmra.mxu1 %vm329_vm7, %v5265_v39  ;;  %v1232_v40 = vrot.slane %v5265_v39, 1  ;;  %4024 = vmatprep.subr.mxu0 %v4782_v0  ;;  %v1565_v52 = vrot.slane %v5265_v39, 3  ;;  %v1446_v62 = vrot.slane %v5265_v39, 2  ;;  %v1684_v3 = vrot.slane %v5265_v39, 4 }
 0x2c4   :  { %3983 = vmatprep.mubr.msk.f32.mxu1 %vm4783_vm3, %v4782_v0 }
 0x2c5   :  { %v1233_v41 = vsel %vm570_vm5, %v1230_v35, %v1232_v40  ;;  %v5276_v42 = vld [vmem:[#allocation3 + $0x20] sm:$0xff]  ;;  %v1566_v59 = vsel %vm890_vm6, %v1563_v45, %v1565_v52  ;;  %v1447_v5 = vsel %vm427_vm4, %v1444_v56, %v1446_v62  ;;  %v1685_v19 = vsel %vm449_vm2, %v1682_v15, %v1684_v3 }
 0x2c6   :  { %3959 = vmatmul.mubr.msk.f32.gmra.mxu0 %vm329_vm7, %v1233_v41  ;;  %v1234_v43 = vrot.slane %v5276_v42, 1  ;;  %v1567_v60 = vrot.slane %v5276_v42, 3  ;;  %v1448_v7 = vrot.slane %v5276_v42, 2  ;;  %v1686_v21 = vrot.slane %v5276_v42, 4 }
 0x2c7   :  { %3984 = vmatmul.mubr.msk.f32.gmra.mxu1 %vm329_vm7, %v5276_v42  ;;  %3961 = vmatprep.mubr.msk.f32.mxu0 %vm4783_vm3, %v4782_v0 }
 0x2c8   :  { %v1235_v44 = vsel %vm570_vm5, %v1232_v40, %v1234_v43  ;;  %4009 = vmatprep.mubr.msk.f32.mxu1 %vm4783_vm3, %v4782_v0  ;;  %v1237_v49 = vsel %vm570_vm5, %v1234_v43, %v1236_v47  ;;  %v1568_v1 = vsel %vm890_vm6, %v1565_v52, %v1567_v60  ;;  %v1570_v54 = vsel %vm890_vm6, %v1567_v60, %v1569_v2 }
 0x2c9   :  { %v1449_v9 = vsel %vm427_vm4, %v1446_v62, %v1448_v7  ;;  %v1451_v10 = vsel %vm427_vm4, %v1448_v7, %v1450_v57  ;;  %v1687_v22 = vsel %vm449_vm2, %v1684_v3, %v1686_v21  ;;  %v1689_v17 = vsel %vm449_vm2, %v1686_v21, %v1688_v23 }
 0x2ca   :  { %3962 = vmatmul.mubr.msk.f32.gmra.mxu0 %vm329_vm7, %v1235_v44 }
 0x2cb   :  { %4010 = vmatmul.mubr.msk.f32.vlgmr.msra.gmra.mxu1 %vm329_vm7, %v1562_v48  ;;  %3964 = vmatprep.mubr.msk.f32.mxu0 %vm4783_vm3, %v4782_v0 }
 0x2cc   :  { %4012 = vmatprep.mubr.msk.f32.mxu1 %vm4783_vm3, %v4782_v0 }
 0x2ce   :  { %3965 = vmatmul.mubr.msk.f32.gmra.mxu0 %vm329_vm7, %v1237_v49 }
 0x2cf   :  { %4013 = vmatmul.mubr.msk.f32.gmra.mxu1 %vm329_vm7, %v1564_v51  ;;  %3990 = vmatprep.mubr.msk.f32.mxu0 %vm4783_vm3, %v4782_v0 }
 0x2d0   :  { %4015 = vmatprep.mubr.msk.f32.mxu1 %vm4783_vm3, %v4782_v0 }
 0x2d2   :  { %3991 = vmatmul.mubr.msk.f32.vlgmr.msra.gmra.mxu0 %vm329_vm7, %v1443_v55 }
 0x2d3   :  { %4016 = vmatmul.mubr.msk.f32.gmra.mxu1 %vm329_vm7, %v1566_v59  ;;  %3993 = vmatprep.mubr.msk.f32.mxu0 %vm4783_vm3, %v4782_v0 }
 0x2d4   :  { %4018 = vmatprep.mubr.msk.f32.mxu1 %vm4783_vm3, %v4782_v0  ;;  %4025 = vmatpush3.msra.mxu0 %v1678_v58 }
 0x2d5   :  { %4026 = vmatprep.subr.mxu0 %v4782_v0 }
 0x2d6   :  { %3994 = vmatmul.mubr.msk.f32.gmra.mxu0 %vm329_vm7, %v1445_v61 }
 0x2d7   :  { %4019 = vmatmul.mubr.msk.f32.gmra.mxu1 %vm329_vm7, %v1568_v1  ;;  %3996 = vmatprep.mubr.msk.f32.mxu0 %vm4783_vm3, %v4782_v0 }
 0x2d8   :  { %4021 = vmatprep.mubr.msk.f32.mxu1 %vm4783_vm3, %v4782_v0  ;;  %4027 = vmatpush3.msra.mxu0 %v1677_v63 }
 0x2d9   :  { %4085 = vmatprep.subr.mxu0 %v4782_v0 }
 0x2da   :  { %3997 = vmatmul.mubr.msk.f32.gmra.mxu0 %vm329_vm7, %v1447_v5 }
 0x2db   :  { %4022 = vmatmul.mubr.msk.f32.gmra.mxu1 %vm329_vm7, %v1570_v54  ;;  %3999 = vmatprep.mubr.msk.f32.mxu0 %vm4783_vm3, %v4782_v0 }
 0x2dc   :  { %4053 = vmatprep.mubr.msk.f32.mxu1 %vm4783_vm3, %v4782_v0 }
 0x2de   :  { %4000 = vmatmul.mubr.msk.f32.gmra.mxu0 %vm329_vm7, %v1449_v9 }
 0x2df   :  { %4002 = vmatprep.mubr.msk.f32.mxu0 %vm4783_vm3, %v4782_v0 }
 0x2e2   :  { %4003 = vmatmul.mubr.msk.f32.gmra.mxu0 %vm329_vm7, %v1451_v10 }
 0x2e3   :  { %4028 = vmatprep.mubr.msk.f32.mxu0 %vm4783_vm3, %v4782_v0 }
 0x2e6   :  { %4029 = vmatmul.mubr.msk.f32.vlgmr.msra.gmra.mxu0 %vm329_vm7, %v1681_v14 }
 0x2e7   :  { %4031 = vmatprep.mubr.msk.f32.mxu0 %vm4783_vm3, %v4782_v0 }
 0x2ea   :  { %4032 = vmatmul.mubr.msk.f32.gmra.mxu0 %vm329_vm7, %v1683_v18 }
 0x2eb   :  { %4034 = vmatprep.mubr.msk.f32.mxu0 %vm4783_vm3, %v4782_v0 }
 0x2ee   :  { %4035 = vmatmul.mubr.msk.f32.gmra.mxu0 %vm329_vm7, %v1685_v19 }
 0x2ef   :  { %4037 = vmatprep.mubr.msk.f32.mxu0 %vm4783_vm3, %v4782_v0 }
 0x2f2   :  { %4038 = vmatmul.mubr.msk.f32.gmra.mxu0 %vm329_vm7, %v1687_v22 }
 0x2f3   :  { %4040 = vmatprep.mubr.msk.f32.mxu0 %vm4783_vm3, %v4782_v0 }
 0x2f6   :  { %4041 = vmatmul.mubr.msk.f32.gmra.mxu0 %vm329_vm7, %v1689_v17 }
 0x2f7   :  { %4089 = vmatprep.mubr.msk.f32.mxu0 %vm4783_vm3, %v4782_v0 }
 0x376   :  { %v1414_v25 = vpop.f32.mrf.mxu1 }
 0x378   :  { %v3973_v26 = vpop.f32.mrf.mxu1 }
 0x37a   :  { %v1419_v27 = vpop.f32.mrf.mxu1 }
 0x37c   :  { %v3976_v28 = vpop.f32.mrf.mxu1 }
 0x37d   :  { %v1314_v29 = vpop.f32.mrf.mxu0 }
 0x37e   :  { %v1424_v30 = vpop.f32.mrf.mxu1  ;;  %v1415_v21 = vadd.f32 %v1414_v25, %v1314_v29 }
 0x37f   :  { %v3954_v31 = vpop.f32.mrf.mxu0 }
 0x380   :  { %v3979_v33 = vpop.f32.mrf.mxu1 }
 0x381   :  { %v1319_v34 = vpop.f32.mrf.mxu0 }
 0x382   :  { %v1420_v15 = vadd.f32 %v1419_v27, %v1319_v34 }
 0x383   :  { %v1429_v20 = vpop.f32.mrf.mxu1  ;;  %v3957_v32 = vpop.f32.mrf.mxu0 }
 0x385   :  { %v3982_v35 = vpop.f32.mrf.mxu1 }
 0x386   :  { %v1324_v37 = vpop.f32.mrf.mxu0 }
 0x387   :  { %v1434_v38 = vpop.f32.mrf.mxu1  ;;  %v1425_v10 = vadd.f32 %v1424_v30, %v1324_v37  ;;  %v3633_v30 = vld [vmem:[#allocation12] ss:$0 sm:$0xff] }
 0x388   :  { %v3960_v39 = vpop.f32.mrf.mxu0 }
 0x389   :  { %v3985_v40 = vpop.f32.mrf.mxu1 }
 0x38a   :  { %v1329_v41 = vpop.f32.mrf.mxu0 }
 0x38b   :  { %v1647_v42 = vpop.f32.mrf.mxu1  ;;  %v1430_v9 = vadd.f32 %v1429_v20, %v1329_v41  ;;  %v3634_v41 = vld [vmem:[#allocation13] ss:$0 sm:$0xff] }
 0x38c   :  { %v3963_v43 = vpop.f32.mrf.mxu0 }
 0x38d   :  { %v4011_v24 = vpop.f32.mrf.mxu1 }
 0x38e   :  { %v1334_v36 = vpop.f32.mrf.mxu0 }
 0x38f   :  { %v1652_v44 = vpop.f32.mrf.mxu1  ;;  %v1435_v11 = vadd.f32 %v1434_v38, %v1334_v36 }
 0x390   :  { %v3966_v46 = vpop.f32.mrf.mxu0 }
 0x391   :  { %v4014_v47 = vpop.f32.mrf.mxu1 }
 0x392   :  { %v1528_v48 = vpop.f32.mrf.mxu0 }
 0x393   :  { %v1657_v45 = vpop.f32.mrf.mxu1  ;;  %v1552_v26 = vadd.f32 %v1528_v48, %v1415_v21  ;;  %v5397_v48 = vld [vmem:[%s5784_s4] sm:$0x3]  ;;  %v3571_v21 = vld [vmem:[#allocation22] ss:$0 sm:$0xff] }
 0x394   :  { %v3992_v49 = vpop.f32.mrf.mxu0 }
 0x395   :  { %v4017_v50 = vpop.f32.mrf.mxu1  ;;  %v1671_v38 = vadd.f32 %v1647_v42, %v1552_v26  ;;  %v1893_v49 = vld [vmem:[%s5785_s18] sm:$0xff] }
 0x396   :  { %v1533_v51 = vpop.f32.mrf.mxu0 }
 0x397   :  { %v1662_v52 = vpop.f32.mrf.mxu1  ;;  %v1553_v22 = vadd.f32 %v1533_v51, %v1420_v15  ;;  %v3648_v15 = vld [vmem:[%s5749_s16 + $0x10] sm:$0xff] }
 0x398   :  { %v3995_v53 = vpop.f32.mrf.mxu0 }
 0x399   :  { %v4020_v55 = vpop.f32.mrf.mxu1  ;;  %v1672_v35 = vadd.f32 %v1652_v44, %v1553_v22  ;;  %v3636_v53 = vld [vmem:[#allocation15] ss:$0 sm:$0xff] }
 0x39a   :  { %v1538_v56 = vpop.f32.mrf.mxu0 }
 0x39b   :  { %v1667_v58 = vpop.f32.mrf.mxu1  ;;  %v1554_v18 = vadd.f32 %v1538_v56, %v1425_v10  ;;  %v5442_v10 = vld [vmem:[#allocation4 + $0x18] sm:$0xff] }
 0x39c   :  { %v3998_v59 = vpop.f32.mrf.mxu0 }
 0x39d   :  { %v4023_v60 = vpop.f32.mrf.mxu1  ;;  %v1673_v28 = vadd.f32 %v1657_v45, %v1554_v18  ;;  %v1894_v45 = vld [vmem:[%s5785_s18 + $0x8] sm:$0xff]  ;;  %v2243_v18 = vld [vmem:[%s5749_s16] sm:$0xff] }
 0x39e   :  { %v1543_v61 = vpop.f32.mrf.mxu0  ;;  %v3638_v60 = vld [vmem:[#allocation18] ss:$0 sm:$0xff] }
 0x39f   :  { %v1555_v13 = vadd.f32 %v1543_v61, %v1430_v9  ;;  %v5430_v9 = vld [vmem:[#allocation4 + $0x8] sm:$0xff] }
 0x3a0   :  { %v4001_v62 = vpop.f32.mrf.mxu0 }
 0x3a1   :  { %v1674_v23 = vadd.f32 %v1662_v52, %v1555_v13  ;;  %v1976_v52 = vld [vmem:[#allocation16] sm:$0xf]  ;;  %v3649_v13 = vld [vmem:[%s5749_s16 + $0x18] sm:$0xff] }
 0x3a2   :  { %v1548_v63 = vpop.f32.mrf.mxu0  ;;  %4086 = vmatpush3.msra.mxu0 %v3649_v13 }
 0x3a3   :  { %v1556_v3 = vadd.f32 %v1548_v63, %v1435_v11  ;;  %v5448_v11 = vld [vmem:[#allocation4 + $0x20] sm:$0xff]  ;;  %4087 = vmatprep.subr.mxu0 %v4782_v0 }
 0x3a4   :  { %v4004_v1 = vpop.f32.mrf.mxu0  ;;  %4088 = vmatpush3.msra.mxu0 %v3648_v15 }
 0x3a5   :  { %v1675_v33 = vadd.f32 %v1667_v58, %v1556_v3  ;;  %4123 = vmatprep.subr.mxu0 %v4782_v0  ;;  %v3570_v3 = vld [vmem:[#allocation21] ss:$0 sm:$0xff] }
 0x3a6   :  { %v1766_v2 = vpop.f32.mrf.mxu0 }
 0x3a7   :  { %v1790_v43 = vadd.f32 %v1766_v2, %v1671_v38 }
 0x3a8   :  { %v4030_v5 = vpop.f32.mrf.mxu0 }
 0x3a9   :  { %v1802_v44 = vmul.f32 %v3633_v30, %v1790_v43 }
 0x3aa   :  { %v1771_v7 = vpop.f32.mrf.mxu0 }
 0x3ab   :  { %v1791_v40 = vadd.f32 %v1771_v7, %v1672_v35  ;;  %v5391_v47 = vadd.f32 %v3634_v41, %v1802_v44  ;;  %v5422_v7 = vld [vmem:[#allocation4] sm:$0xff]  ;;  %v552_v35 = vmul.f32 %v3570_v3, %v5227_v16  ;;  %v554_v16 = vmul.f32 %v3570_v3, %v5221_v6 }
 0x3ac   :  { %v4033_v54 = vpop.f32.mrf.mxu0 }
 0x3ad   :  { %v1803_v24 = vmul.f32 %v3633_v30, %v1791_v40  ;;  %v564_v40 = vadd.f32 %v3571_v21, %v552_v35 }
 0x3ae   :  { %v1776_v57 = vpop.f32.mrf.mxu0 }
 0x3af   :  { %v1792_v20 = vadd.f32 %v1776_v57, %v1673_v28  ;;  %v5387_v42 = vadd.f32 %v3634_v41, %v1803_v24  ;;  %v5436_v57 = vld [vmem:[#allocation4 + $0x10] sm:$0xff] }
 0x3b0   :  { %v4036_v14 = vpop.f32.mrf.mxu0 }
 0x3b1   :  { %v1804_v25 = vmul.f32 %v3633_v30, %v1792_v20  ;;  %v2244_v14 = vld [vmem:[%s5749_s16 + $0x8] sm:$0xff] }
 0x3b2   :  { %v1781_v19 = vpop.f32.mrf.mxu0 }
 0x3b3   :  { %v1793_v31 = vadd.f32 %v1781_v19, %v1674_v23  ;;  %v5383_v46 = vadd.f32 %v3634_v41, %v1804_v25  ;;  %v550_v19 = vmul.f32 %v3570_v3, %v5223_v8 }
 0x3b4   :  { %v4039_v17 = vpop.f32.mrf.mxu0 }
 0x3b5   :  { %v1805_v27 = vmul.f32 %v3633_v30, %v1793_v31  ;;  %v562_v23 = vadd.f32 %v3571_v21, %v550_v19  ;;  %v551_v17 = vmul.f32 %v3570_v3, %v5225_v12 }
 0x3b6   :  { %v1786_v32 = vpop.f32.mrf.mxu0 }
 0x3b7   :  { %v1794_v39 = vadd.f32 %v1786_v32, %v1675_v33  ;;  %v5379_v36 = vadd.f32 %v3634_v41, %v1805_v27  ;;  %v563_v32 = vadd.f32 %v3571_v21, %v551_v17 }
 0x3b8   :  { %v4042_v37 = vpop.f32.mrf.mxu0 }
 0x3b9   :  { %v1806_v34 = vmul.f32 %v3633_v30, %v1794_v39 }
 0x3bb   :  { %v5377_v29 = vadd.f32 %v3634_v41, %v1806_v34  ;;  %v553_v41 = vmul.f32 %v3570_v3, %v5219_v4  ;;  %v566_v4 = vadd.f32 %v3571_v21, %v554_v16  ;;  %v3661_v16 = vld [vmem:[%s5749_s16 + $0x28] sm:$0xff] }
 0x3bd   :  { %4044 = vmatpush3.msra.mxu1 %v5377_v29 }
 0x3be   :  { %4045 = vmatprep.subr.mxu1 %v4782_v0 }
 0x3bf   :  { %4046 = vmatpush3.msra.mxu1 %v5379_v36 }
 0x3c0   :  { %4047 = vmatprep.subr.mxu1 %v4782_v0 }
 0x3c1   :  { %4048 = vmatpush3.msra.mxu1 %v5383_v46 }
 0x3c2   :  { %4049 = vmatprep.subr.mxu1 %v4782_v0 }
 0x3c3   :  { %4050 = vmatpush3.msra.mxu1 %v5387_v42 }
 0x3c4   :  { %4051 = vmatprep.subr.mxu1 %v4782_v0 }
 0x3c5   :  { %4052 = vmatpush3.msra.mxu1 %v5391_v47 }
 0x3c6   :  { %4054 = vmatmul.mubr.msk.f32.vlgmr.msra.gmra.mxu1 %vm1819_vm13, %v5397_v48  ;;  %4056 = vmatprep.subr.mxu1 %v4782_v0 }
 0x3c7   :  { %4057 = vmatpush3.msra.mxu1 %v1894_v45  ;;  %4060 = vmatprep.mubr.msk.f32.mxu1 %vm4783_vm3, %v4782_v0 }
 0x3c8   :  { %4058 = vmatprep.subr.mxu1 %v4782_v0 }
 0x3c9   :  { %4059 = vmatpush3.msra.mxu1 %v1893_v49 }
 0x3ca   :  { %4063 = vmatprep.subr.mxu1 %v4782_v0 }
 0x486   :  { %v1889_v50 = vpop.f32.mrf.mxu1 }
 0x487   :  { %4061 = vmatmul.mubr.msk.f32.vlgmr.msra.gmra.mxu1 %vm329_vm7, %v1889_v50  ;;  %v565_v50 = vadd.f32 %v3571_v21, %v553_v41 }
 0x488   :  { %v4055_v51 = vpop.f32.mrf.mxu1  ;;  %4065 = vmatprep.mubr.msk.f32.mxu1 %vm4783_vm3, %v4782_v0  ;;  %4064 = vmatpush3.msk.msra.mxu1 %vm449_vm2, %v1976_v52 }
 0x489   :  { %4068 = vmatprep.subr.mxu1 %v4782_v0 }
 0x547   :  { %v1971_v55 = vpop.f32.mrf.mxu1 }
 0x548   :  { %v1972_v56 = vadd.f32 %v3636_v53, %v1971_v55 }
 0x549   :  { %v4062_v58 = vpop.f32.mrf.mxu1 }
 0x54a   :  { %v1975_v59 = vmax.f32 %v1972_v56, 0.0 }
 0x54c   :  { %4066 = vmatmul.mubr.msk.f32.vlgmr.msra.gmra.mxu1 %vm321_vm0, %v1975_v59 }
 0x54d   :  { %4070 = vmatprep.mubr.msk.f32.mxu1 %vm4783_vm3, %v4782_v0 }
 0x60c   :  { %v2056_v61 = vpop.f32.mrf.mxu1 }
 0x60d   :  { %v2057_v62 = vadd.f32 %v3638_v60, %v2056_v61 }
 0x60e   :  { %v4067_v63 = vpop.f32.mrf.mxu1 }
 0x60f   :  { %v3641_v1 = vmul.f32 -1.442695, %v2057_v62 }
 0x611   :  { %4278 = vpow2.f32 %v3641_v1 }
 0x61e   :  { %v4279_v2 = vpop.eup %4278 }
 0x61f   :  { %v2063_v5 = vadd.f32 1.0, %v4279_v2 }
 0x621   :  { %4280 = vrcp.f32 %v2063_v5 }
 0x62e   :  { %v4281_v54 = vpop.eup %4280 }
 0x62f   :  { %4069 = vmatpush3.msk.msra.mxu1 %vm2082_vm14, %v4281_v54 }
 0x630   :  { %4071 = vmatmul.mubr.msk.f32.vlgmr.msra.gmra.mxu1 %vm2066_vm15, %v5422_v7  ;;  %4104 = vmatprep.subr.mxu1 %v4782_v0 }
 0x631   :  { %4073 = vmatprep.mubr.msk.f32.mxu1 %vm4783_vm3, %v4782_v0  ;;  %4105 = vmatpush3.msra.mxu1 %v2244_v14 }
 0x632   :  { %4106 = vmatprep.subr.mxu1 %v4782_v0 }
 0x633   :  { %4107 = vmatpush3.msra.mxu1 %v2243_v18 }
 0x634   :  { %4074 = vmatmul.mubr.msk.f32.gmra.mxu1 %vm2066_vm15, %v5430_v9  ;;  %4142 = vmatprep.subr.mxu1 %v4782_v0 }
 0x635   :  { %4076 = vmatprep.mubr.msk.f32.mxu1 %vm4783_vm3, %v4782_v0 }
 0x638   :  { %4077 = vmatmul.mubr.msk.f32.gmra.mxu1 %vm2066_vm15, %v5436_v57 }
 0x639   :  { %4079 = vmatprep.mubr.msk.f32.mxu1 %vm4783_vm3, %v4782_v0 }
 0x63c   :  { %4080 = vmatmul.mubr.msk.f32.gmra.mxu1 %vm2066_vm15, %v5442_v10 }
 0x63d   :  { %4082 = vmatprep.mubr.msk.f32.mxu1 %vm4783_vm3, %v4782_v0 }
 0x640   :  { %4083 = vmatmul.mubr.msk.f32.gmra.mxu1 %vm2066_vm15, %v5448_v11 }
 0x641   :  { %4108 = vmatprep.mubr.msk.f32.mxu1 %vm4783_vm3, %v4782_v0 }
 0x6f0   :  { %v2152_v22 = vpop.f32.mrf.mxu1 }
 0x6f1   :  { %v2176_v26 = vmul.f32 %v2152_v22, %v5391_v47 }
 0x6f2   :  { %v4072_v28 = vpop.f32.mrf.mxu1 }
 0x6f3   :  { %v2181_v31 = vadd.f32 %v2176_v26, %v562_v23 }
 0x6f4   :  { %v2157_v33 = vpop.f32.mrf.mxu1 }
 0x6f5   :  { %v2191_v20 = vmul.f32 0.044715, %v2181_v31  ;;  %v2177_v39 = vmul.f32 %v2157_v33, %v5387_v42  ;;  %v2186_v19 = vmul.f32 0.5, %v2181_v31 }
 0x6f6   :  { %v4075_v30 = vpop.f32.mrf.mxu1 }
 0x6f7   :  { %v2196_v37 = vmul.f32 %v2191_v20, %v2181_v31  ;;  %v2182_v38 = vadd.f32 %v2177_v39, %v563_v32 }
 0x6f8   :  { %v2162_v8 = vpop.f32.mrf.mxu1 }
 0x6f9   :  { %v2201_v27 = vmul.f32 %v2196_v37, %v2181_v31  ;;  %v2192_v34 = vmul.f32 0.044715, %v2182_v38  ;;  %v2178_v12 = vmul.f32 %v2162_v8, %v5383_v46  ;;  %v2187_v17 = vmul.f32 0.5, %v2182_v38 }
 0x6fa   :  { %v4078_v43 = vpop.f32.mrf.mxu1 }
 0x6fb   :  { %v2206_v25 = vadd.f32 %v2201_v27, %v2181_v31  ;;  %v2197_v24 = vmul.f32 %v2192_v34, %v2182_v38  ;;  %v2183_v44 = vadd.f32 %v2178_v12, %v564_v40 }
 0x6fc   :  { %v2167_v47 = vpop.f32.mrf.mxu1 }
 0x6fd   :  { %v2211_v45 = vmul.f32 0.7978846, %v2206_v25  ;;  %v2202_v42 = vmul.f32 %v2197_v24, %v2182_v38  ;;  %v2193_v49 = vmul.f32 0.044715, %v2183_v44  ;;  %v2179_v51 = vmul.f32 %v2167_v47, %v5379_v36 }
 0x6fe   :  { %v4081_v52 = vpop.f32.mrf.mxu1  ;;  %v2188_v32 = vmul.f32 0.5, %v2183_v44 }
 0x6ff   :  { %4282 = vtanh.f32 %v2211_v45  ;;  %v2207_v53 = vadd.f32 %v2202_v42, %v2182_v38  ;;  %v2198_v55 = vmul.f32 %v2193_v49, %v2183_v44  ;;  %v2184_v46 = vadd.f32 %v2179_v51, %v565_v50  ;;  %v3660_v52 = vld [vmem:[%s5749_s16 + $0x20] sm:$0xff] }
 0x700   :  { %v2172_v56 = vpop.f32.mrf.mxu1 }
 0x701   :  { %v2212_v58 = vmul.f32 0.7978846, %v2207_v53  ;;  %v2203_v59 = vmul.f32 %v2198_v55, %v2183_v44  ;;  %v2180_v60 = vmul.f32 %v2172_v56, %v5377_v29  ;;  %v2194_v61 = vmul.f32 0.044715, %v2184_v46 }
 0x702   :  { %v4084_v62 = vpop.f32.mrf.mxu1  ;;  %v2189_v30 = vmul.f32 0.5, %v2184_v46 }
 0x703   :  { %4284 = vtanh.f32 %v2212_v58  ;;  %v2208_v6 = vadd.f32 %v2203_v59, %v2183_v44  ;;  %v2185_v63 = vadd.f32 %v2180_v60, %v566_v4  ;;  %v2199_v1 = vmul.f32 %v2194_v61, %v2184_v46  ;;  %v2242_v61 = vld [vmem:[#allocation3 + $0x28] sm:$0xf] }
 0x705   :  { %v2213_v2 = vmul.f32 0.7978846, %v2208_v6  ;;  %v2195_v5 = vmul.f32 0.044715, %v2185_v63  ;;  %v2204_v36 = vmul.f32 %v2199_v1, %v2184_v46  ;;  %v2190_v38 = vmul.f32 0.5, %v2185_v63 }
 0x706   :  { %v2374_v1 = vrot.slane %v2242_v61, 1 }
 0x707   :  { %4286 = vtanh.f32 %v2213_v2  ;;  %v2200_v54 = vmul.f32 %v2195_v5, %v2185_v63  ;;  %v2209_v13 = vadd.f32 %v2204_v36, %v2184_v46 }
 0x709   :  { %v2205_v14 = vmul.f32 %v2200_v54, %v2185_v63  ;;  %v2214_v15 = vmul.f32 0.7978846, %v2209_v13 }
 0x70b   :  { %v2210_v18 = vadd.f32 %v2205_v14, %v2185_v63  ;;  %4288 = vtanh.f32 %v2214_v15  ;;  %v2263_v63 = vrot.slane %v2242_v61, 2 }
 0x70c   :  { %v4283_v3 = vpop.eup %4282 }
 0x70d   :  { %v2221_v21 = vadd.f32 1.0, %v4283_v3  ;;  %v2215_v29 = vmul.f32 0.7978846, %v2210_v18 }
 0x70f   :  { %v2226_v22 = vmul.f32 %v2221_v21, %v2186_v19  ;;  %4290 = vtanh.f32 %v2215_v29  ;;  %v2488_v29 = vrot.slane %v2242_v61, 3 }
 0x710   :  { %v4285_v23 = vpop.eup %4284 }
 0x711   :  { %2231 = vst.msk [vmem:[#allocation3 + $0x2] sm:$0xfc] %vm1200_vm9, %v2226_v22  ;;  %v2222_v26 = vadd.f32 1.0, %v4285_v23  ;;  %v2680_v23 = vld [vmem:[#allocation27 + $0x18] sm:$0xff] }
 0x713   :  { %v2227_v28 = vmul.f32 %v2222_v26, %v2187_v17  ;;  %v2677_v17 = vld [vmem:[#allocation27 + $0x8] sm:$0xff]  ;;  %v2679_v26 = vld [vmem:[#allocation27 + $0x10] sm:$0xff] }
 0x714   :  { %v4287_v33 = vpop.eup %4286 }
 0x715   :  { %2232 = vst.msk [vmem:[#allocation3 + $0xa] sm:$0xff] %vm329_vm7, %v2227_v28  ;;  %v2223_v35 = vadd.f32 1.0, %v4287_v33  ;;  %v2676_v28 = vld [vmem:[#allocation27] sm:$0xff] }
 0x717   :  { %v2228_v20 = vmul.f32 %v2223_v35, %v2188_v32 }
 0x718   :  { %v4289_v39 = vpop.eup %4288  ;;  %v5484_v31 = vld [vmem:[#allocation3] sm:$0xff] }
 0x719   :  { %2233 = vst.msk [vmem:[#allocation3 + $0x12] sm:$0x3] %vm1203_vm10, %v2228_v20  ;;  %v2224_v37 = vadd.f32 1.0, %v4289_v39  ;;  %v2254_v34 = vrot.slane %v5484_v31, 2  ;;  %v2365_v43 = vrot.slane %v5484_v31, 1  ;;  %v2479_v54 = vrot.slane %v5484_v31, 3 }
 0x71a   :  { %2234 = vst.msk [vmem:[#allocation3 + $0x12] sm:$0xc0] %vm1205_vm11, %v2228_v20 }
 0x71b   :  { %v2229_v40 = vmul.f32 %v2224_v37, %v2189_v30 }
 0x71c   :  { %v4291_v8 = vpop.eup %4290  ;;  %v5486_v27 = vld [vmem:[#allocation3 + $0x8] sm:$0xff] }
 0x71d   :  { %v2225_v12 = vadd.f32 1.0, %v4291_v8  ;;  %v2255_v41 = vrot.slane %v5486_v27, 2  ;;  %v2366_v25 = vrot.slane %v5486_v27, 1  ;;  %2235 = vst.msk [vmem:[#allocation3 + $0x1a] sm:$0xff] %vm329_vm7, %v2229_v40  ;;  %v2480_v36 = vrot.slane %v5486_v27, 3 }
 0x71f   :  { %v2230_v24 = vmul.f32 %v2225_v12, %v2190_v38  ;;  %v5494_v44 = vsel %vm427_vm4, %v2254_v34, %v2255_v41  ;;  %v2367_v47 = vsel %vm570_vm5, %v2365_v43, %v2366_v25  ;;  %v2481_v13 = vsel %vm890_vm6, %v2479_v54, %v2480_v36 }
 0x720   :  { %4090 = vmatmul.mubr.msk.f32.vlgmr.msra.gmra.mxu0 %vm329_vm7, %v5494_v44  ;;  %4109 = vmatmul.mubr.msk.f32.vlgmr.msra.gmra.mxu1 %vm329_vm7, %v2367_v47  ;;  %v2239_v45 = vld [vmem:[#allocation3 + $0x10] sm:$0xff] }
 0x721   :  { %2236 = vst.msk [vmem:[#allocation3 + $0x22] sm:$0x3f] %vm1208_vm12, %v2230_v24  ;;  %4092 = vmatprep.mubr.msk.f32.mxu0 %vm4783_vm3, %v4782_v0  ;;  %4111 = vmatprep.mubr.msk.f32.mxu1 %vm4783_vm3, %v4782_v0  ;;  %v2257_v42 = vrot.slane %v2239_v45, 2  ;;  %v2368_v49 = vrot.slane %v2239_v45, 1  ;;  %v2482_v14 = vrot.slane %v2239_v45, 3 }
 0x722   :  { %4124 = vmatpush3.msra.mxu0 %v3661_v16  ;;  %4143 = vmatpush3.msra.mxu1 %v2680_v23 }
 0x723   :  { %v5509_v50 = vsel %vm427_vm4, %v2255_v41, %v2257_v42  ;;  %v2369_v51 = vsel %vm570_vm5, %v2366_v25, %v2368_v49  ;;  %4125 = vmatprep.subr.mxu0 %v4782_v0  ;;  %v2483_v15 = vsel %vm890_vm6, %v2480_v36, %v2482_v14  ;;  %4144 = vmatprep.subr.mxu1 %v4782_v0 }
 0x724   :  { %4093 = vmatmul.mubr.msk.f32.gmra.mxu0 %vm329_vm7, %v5509_v50  ;;  %4112 = vmatmul.mubr.msk.f32.gmra.mxu1 %vm329_vm7, %v2369_v51  ;;  %v2240_v53 = vld [vmem:[#allocation3 + $0x18] sm:$0xff] }
 0x725   :  { %4095 = vmatprep.mubr.msk.f32.mxu0 %vm4783_vm3, %v4782_v0  ;;  %4114 = vmatprep.mubr.msk.f32.mxu1 %vm4783_vm3, %v4782_v0  ;;  %v2259_v55 = vrot.slane %v2240_v53, 2  ;;  %v2370_v46 = vrot.slane %v2240_v53, 1  ;;  %v2484_v18 = vrot.slane %v2240_v53, 3 }
 0x726   :  { %4126 = vmatpush3.msra.mxu0 %v3660_v52  ;;  %4145 = vmatpush3.msra.mxu1 %v2679_v26  ;;  %v3668_v52 = vld [vmem:[#allocation25] ss:$0 sm:$0xff] }
 0x727   :  { %4161 = vmatprep.subr.mxu0 %v4782_v0  ;;  %v5525_v56 = vsel %vm427_vm4, %v2257_v42, %v2259_v55  ;;  %v2371_v4 = vsel %vm570_vm5, %v2368_v49, %v2370_v46  ;;  %v2485_v3 = vsel %vm890_vm6, %v2482_v14, %v2484_v18  ;;  %4180 = vmatprep.subr.mxu1 %v4782_v0  ;;  %v3667_v49 = vld [vmem:[#allocation24] ss:$0 sm:$0xff] }
 0x728   :  { %v2241_v58 = vld [vmem:[#allocation3 + $0x20] sm:$0xff]  ;;  %4096 = vmatmul.mubr.msk.f32.gmra.mxu0 %vm329_vm7, %v5525_v56  ;;  %4115 = vmatmul.mubr.msk.f32.gmra.mxu1 %vm329_vm7, %v2371_v4 }
 0x729   :  { %v2261_v59 = vrot.slane %v2241_v58, 2  ;;  %v2372_v60 = vrot.slane %v2241_v58, 1  ;;  %4098 = vmatprep.mubr.msk.f32.mxu0 %vm4783_vm3, %v4782_v0  ;;  %4117 = vmatprep.mubr.msk.f32.mxu1 %vm4783_vm3, %v4782_v0  ;;  %v2486_v19 = vrot.slane %v2241_v58, 3 }
 0x72b   :  { %v5536_v62 = vsel %vm427_vm4, %v2259_v55, %v2261_v59  ;;  %v2373_v6 = vsel %vm570_vm5, %v2370_v46, %v2372_v60  ;;  %v5547_v2 = vsel %vm427_vm4, %v2261_v59, %v2263_v63  ;;  %v2375_v5 = vsel %vm570_vm5, %v2372_v60, %v2374_v1 }
 0x72c   :  { %4099 = vmatmul.mubr.msk.f32.gmra.mxu0 %vm329_vm7, %v5536_v62  ;;  %4118 = vmatmul.mubr.msk.f32.gmra.mxu1 %vm329_vm7, %v2373_v6  ;;  %v2487_v21 = vsel %vm890_vm6, %v2484_v18, %v2486_v19  ;;  %v2489_v22 = vsel %vm890_vm6, %v2486_v19, %v2488_v29 }
 0x72d   :  { %4101 = vmatprep.mubr.msk.f32.mxu0 %vm4783_vm3, %v4782_v0  ;;  %4120 = vmatprep.mubr.msk.f32.mxu1 %vm4783_vm3, %v4782_v0 }
 0x730   :  { %4102 = vmatmul.mubr.msk.f32.gmra.mxu0 %vm329_vm7, %v5547_v2  ;;  %4121 = vmatmul.mubr.msk.f32.gmra.mxu1 %vm329_vm7, %v2375_v5 }
 0x731   :  { %4127 = vmatprep.mubr.msk.f32.mxu0 %vm4783_vm3, %v4782_v0  ;;  %4146 = vmatprep.mubr.msk.f32.mxu1 %vm4783_vm3, %v4782_v0 }
 0x734   :  { %4128 = vmatmul.mubr.msk.f32.vlgmr.msra.gmra.mxu0 %vm329_vm7, %v2481_v13 }
 0x735   :  { %4130 = vmatprep.mubr.msk.f32.mxu0 %vm4783_vm3, %v4782_v0  ;;  %4162 = vmatpush3.msra.mxu0 %v2677_v17 }
 0x736   :  { %4163 = vmatprep.subr.mxu0 %v4782_v0 }
 0x737   :  { %4164 = vmatpush3.msra.mxu0 %v2676_v28 }
 0x738   :  { %4131 = vmatmul.mubr.msk.f32.gmra.mxu0 %vm329_vm7, %v2483_v15  ;;  %4199 = vmatprep.subr.mxu0 %v4782_v0 }
 0x739   :  { %4133 = vmatprep.mubr.msk.f32.mxu0 %vm4783_vm3, %v4782_v0 }
 0x73c   :  { %4134 = vmatmul.mubr.msk.f32.gmra.mxu0 %vm329_vm7, %v2485_v3 }
 0x73d   :  { %4136 = vmatprep.mubr.msk.f32.mxu0 %vm4783_vm3, %v4782_v0 }
 0x740   :  { %4137 = vmatmul.mubr.msk.f32.gmra.mxu0 %vm329_vm7, %v2487_v21 }
 0x741   :  { %4139 = vmatprep.mubr.msk.f32.mxu0 %vm4783_vm3, %v4782_v0 }
 0x744   :  { %4140 = vmatmul.mubr.msk.f32.gmra.mxu0 %vm329_vm7, %v2489_v22 }
 0x745   :  { %4165 = vmatprep.mubr.msk.f32.mxu0 %vm4783_vm3, %v4782_v0 }
 0x7e0   :  { %v2341_v33 = vpop.f32.mrf.mxu0  ;;  %v2452_v32 = vpop.f32.mrf.mxu1 }
 0x7e1   :  { %v2453_v45 = vadd.f32 %v2452_v32, %v2341_v33 }
 0x7e2   :  { %v4091_v35 = vpop.f32.mrf.mxu0  ;;  %v4110_v20 = vpop.f32.mrf.mxu1 }
 0x7e4   :  { %v2346_v39 = vpop.f32.mrf.mxu0  ;;  %v2457_v31 = vpop.f32.mrf.mxu1 }
 0x7e5   :  { %v2458_v55 = vadd.f32 %v2457_v31, %v2346_v39 }
 0x7e6   :  { %v4094_v30 = vpop.f32.mrf.mxu0  ;;  %v4113_v37 = vpop.f32.mrf.mxu1 }
 0x7e8   :  { %v2351_v8 = vpop.f32.mrf.mxu0  ;;  %v2462_v40 = vpop.f32.mrf.mxu1 }
 0x7e9   :  { %v2463_v61 = vadd.f32 %v2462_v40, %v2351_v8 }
 0x7ea   :  { %v4097_v38 = vpop.f32.mrf.mxu0  ;;  %v4116_v27 = vpop.f32.mrf.mxu1 }
 0x7ec   :  { %v2356_v34 = vpop.f32.mrf.mxu0  ;;  %v2467_v12 = vpop.f32.mrf.mxu1 }
 0x7ed   :  { %v2468_v14 = vadd.f32 %v2467_v12, %v2356_v34 }
 0x7ee   :  { %v4100_v41 = vpop.f32.mrf.mxu0  ;;  %v4119_v43 = vpop.f32.mrf.mxu1 }
 0x7f0   :  { %v2361_v25 = vpop.f32.mrf.mxu0  ;;  %v2472_v24 = vpop.f32.mrf.mxu1 }
 0x7f1   :  { %v2473_v26 = vadd.f32 %v2472_v24, %v2361_v25 }
 0x7f2   :  { %v4103_v47 = vpop.f32.mrf.mxu0  ;;  %v4122_v16 = vpop.f32.mrf.mxu1 }
 0x7f4   :  { %v2566_v42 = vpop.f32.mrf.mxu0 }
 0x7f5   :  { %v2590_v51 = vadd.f32 %v2566_v42, %v2453_v45 }
 0x7f6   :  { %v4129_v53 = vpop.f32.mrf.mxu0 }
 0x7f7   :  { %v2602_v46 = vmul.f32 %v3667_v49, %v2590_v51 }
 0x7f8   :  { %v2571_v4 = vpop.f32.mrf.mxu0 }
 0x7f9   :  { %v2614_v58 = vadd.f32 %v3668_v52, %v2602_v46  ;;  %v2591_v59 = vadd.f32 %v2571_v4, %v2458_v55 }
 0x7fa   :  { %v4132_v60 = vpop.f32.mrf.mxu0 }
 0x7fb   :  { %v2624_v6 = vmul.f32 0.044715, %v2614_v58  ;;  %v2603_v63 = vmul.f32 %v3667_v49, %v2591_v59  ;;  %v2619_v46 = vmul.f32 0.5, %v2614_v58 }
 0x7fc   :  { %v2576_v1 = vpop.f32.mrf.mxu0 }
 0x7fd   :  { %v2629_v5 = vmul.f32 %v2624_v6, %v2614_v58  ;;  %v2615_v36 = vadd.f32 %v3668_v52, %v2603_v63  ;;  %v2592_v54 = vadd.f32 %v2576_v1, %v2463_v61 }
 0x7fe   :  { %v4135_v13 = vpop.f32.mrf.mxu0 }
 0x7ff   :  { %v2634_v15 = vmul.f32 %v2629_v5, %v2614_v58  ;;  %v2625_v18 = vmul.f32 0.044715, %v2615_v36  ;;  %v2604_v3 = vmul.f32 %v3667_v49, %v2592_v54 }
 0x800   :  { %v2581_v19 = vpop.f32.mrf.mxu0 }
 0x801   :  { %v2639_v21 = vadd.f32 %v2634_v15, %v2614_v58  ;;  %v2630_v29 = vmul.f32 %v2625_v18, %v2615_v36  ;;  %v2616_v22 = vadd.f32 %v3668_v52, %v2604_v3  ;;  %v2593_v23 = vadd.f32 %v2581_v19, %v2468_v14 }
 0x802   :  { %v4138_v17 = vpop.f32.mrf.mxu0 }
 0x803   :  { %v2644_v28 = vmul.f32 0.7978846, %v2639_v21  ;;  %v2635_v33 = vmul.f32 %v2630_v29, %v2615_v36  ;;  %v2626_v32 = vmul.f32 0.044715, %v2616_v22  ;;  %v2605_v35 = vmul.f32 %v3667_v49, %v2593_v23 }
 0x804   :  { %v2586_v20 = vpop.f32.mrf.mxu0  ;;  %v2621_v1 = vmul.f32 0.5, %v2616_v22 }
 0x805   :  { %4292 = vtanh.f32 %v2644_v28  ;;  %v2640_v39 = vadd.f32 %v2635_v33, %v2615_v36  ;;  %v2631_v31 = vmul.f32 %v2626_v32, %v2616_v22  ;;  %v2594_v30 = vadd.f32 %v2586_v20, %v2473_v26  ;;  %v2911_v32 = vld [vmem:[#allocation27 + $0x28] sm:$0xff] }
 0x806   :  { %v2617_v37 = vadd.f32 %v3668_v52, %v2605_v35  ;;  %v4141_v8 = vpop.f32.mrf.mxu0 }
 0x807   :  { %v2645_v40 = vmul.f32 0.7978846, %v2640_v39  ;;  %v2636_v38 = vmul.f32 %v2631_v31, %v2616_v22  ;;  %v2606_v27 = vmul.f32 %v3667_v49, %v2594_v30 }
 0x808   :  { %v2627_v34 = vmul.f32 0.044715, %v2617_v37  ;;  %v2622_v14 = vmul.f32 0.5, %v2617_v37 }
 0x809   :  { %4294 = vtanh.f32 %v2645_v40  ;;  %v2641_v12 = vadd.f32 %v2636_v38, %v2616_v22  ;;  %v2618_v41 = vadd.f32 %v3668_v52, %v2606_v27  ;;  %v2620_v52 = vmul.f32 0.5, %v2615_v36 }
 0x80a   :  { %v2632_v43 = vmul.f32 %v2627_v34, %v2617_v37 }
 0x80b   :  { %v2646_v25 = vmul.f32 0.7978846, %v2641_v12  ;;  %v2628_v24 = vmul.f32 0.044715, %v2618_v41  ;;  %v2623_v36 = vmul.f32 0.5, %v2618_v41 }
 0x80c   :  { %v2637_v47 = vmul.f32 %v2632_v43, %v2617_v37 }
 0x80d   :  { %4296 = vtanh.f32 %v2646_v25  ;;  %v2633_v16 = vmul.f32 %v2628_v24, %v2618_v41  ;;  %v2675_v25 = vld [vmem:[#allocation3 + $0x28] sm:$0xf] }
 0x80e   :  { %v2642_v45 = vadd.f32 %v2637_v47, %v2617_v37  ;;  %v2910_v37 = vld [vmem:[#allocation27 + $0x20] sm:$0xff] }
 0x80f   :  { %v2638_v42 = vmul.f32 %v2633_v16, %v2618_v41  ;;  %v2696_v16 = vrot.slane %v2675_v25, 2 }
 0x810   :  { %v2647_v51 = vmul.f32 0.7978846, %v2642_v45  ;;  %v2807_v45 = vrot.slane %v2675_v25, 1 }
 0x811   :  { %v2643_v53 = vadd.f32 %v2638_v42, %v2618_v41 }
 0x812   :  { %v4293_v55 = vpop.eup %4292  ;;  %4298 = vtanh.f32 %v2647_v51 }
 0x813   :  { %v2654_v4 = vadd.f32 1.0, %v4293_v55  ;;  %v2648_v59 = vmul.f32 0.7978846, %v2643_v53 }
 0x815   :  { %v2659_v49 = vmul.f32 %v2654_v4, %v2619_v46  ;;  %4300 = vtanh.f32 %v2648_v59 }
 0x816   :  { %v4295_v60 = vpop.eup %4294 }
 0x817   :  { %2664 = vst.msk [vmem:[#allocation3 + $0x2] sm:$0xfc] %vm1200_vm9, %v2659_v49  ;;  %v2655_v61 = vadd.f32 1.0, %v4295_v60 }
 0x819   :  { %v2660_v6 = vmul.f32 %v2655_v61, %v2620_v52 }
 0x81a   :  { %v4297_v63 = vpop.eup %4296 }
 0x81b   :  { %2665 = vst.msk [vmem:[#allocation3 + $0xa] sm:$0xff] %vm329_vm7, %v2660_v6  ;;  %v2656_v5 = vadd.f32 1.0, %v4297_v63  ;;  %v2921_v6 = vrot.slane %v2675_v25, 3 }
 0x81d   :  { %v2661_v54 = vmul.f32 %v2656_v5, %v2621_v1 }
 0x81e   :  { %v5587_v58 = vld [vmem:[#allocation3] sm:$0xff] }
 0x81f   :  { %v4299_v13 = vpop.eup %4298  ;;  %2666 = vst.msk [vmem:[#allocation3 + $0x12] sm:$0x3] %vm1203_vm10, %v2661_v54  ;;  %v2687_v21 = vrot.slane %v5587_v58, 2  ;;  %v2798_v23 = vrot.slane %v5587_v58, 1  ;;  %v2912_v55 = vrot.slane %v5587_v58, 3 }
 0x820   :  { %2667 = vst.msk [vmem:[#allocation3 + $0x12] sm:$0xc0] %vm1205_vm11, %v2661_v54  ;;  %v2657_v15 = vadd.f32 1.0, %v4299_v13 }
 0x822   :  { %v4301_v18 = vpop.eup %4300  ;;  %v2662_v3 = vmul.f32 %v2657_v15, %v2622_v14  ;;  %v5589_v19 = vld [vmem:[#allocation3 + $0x8] sm:$0xff] }
 0x823   :  { %v2658_v29 = vadd.f32 1.0, %v4301_v18  ;;  %v2688_v22 = vrot.slane %v5589_v19, 2  ;;  %v2799_v17 = vrot.slane %v5589_v19, 1  ;;  %v2913_v53 = vrot.slane %v5589_v19, 3 }
 0x824   :  { %2668 = vst.msk [vmem:[#allocation3 + $0x1a] sm:$0xff] %vm329_vm7, %v2662_v3 }
 0x825   :  { %v2663_v26 = vmul.f32 %v2658_v29, %v2623_v36  ;;  %v2689_v28 = vsel %vm427_vm4, %v2687_v21, %v2688_v22  ;;  %v2800_v33 = vsel %vm570_vm5, %v2798_v23, %v2799_v17  ;;  %v2914_v46 = vsel %vm890_vm6, %v2912_v55, %v2913_v53  ;;  %v3685_v55 = vld [vmem:[#allocation30] ss:$0 sm:$0xff] }
 0x826   :  { %4147 = vmatmul.mubr.msk.f32.vlgmr.msra.gmra.mxu1 %vm329_vm7, %v2689_v28  ;;  %4166 = vmatmul.mubr.msk.f32.vlgmr.msra.gmra.mxu0 %vm329_vm7, %v2800_v33  ;;  %v2672_v35 = vld [vmem:[#allocation3 + $0x10] sm:$0xff] }
 0x827   :  { %2669 = vst.msk [vmem:[#allocation3 + $0x22] sm:$0x3f] %vm1208_vm12, %v2663_v26  ;;  %4149 = vmatprep.mubr.msk.f32.mxu1 %vm4783_vm3, %v4782_v0  ;;  %4168 = vmatprep.mubr.msk.f32.mxu0 %vm4783_vm3, %v4782_v0  ;;  %v2690_v20 = vrot.slane %v2672_v35, 2  ;;  %v2801_v39 = vrot.slane %v2672_v35, 1  ;;  %v2915_v4 = vrot.slane %v2672_v35, 3 }
 0x828   :  { %4181 = vmatpush3.msra.mxu1 %v2911_v32 }
 0x829   :  { %v2691_v31 = vsel %vm427_vm4, %v2688_v22, %v2690_v20  ;;  %v2802_v30 = vsel %vm570_vm5, %v2799_v17, %v2801_v39  ;;  %4182 = vmatprep.subr.mxu1 %v4782_v0  ;;  %v2916_v59 = vsel %vm890_vm6, %v2913_v53, %v2915_v4 }
 0x82a   :  { %4150 = vmatmul.mubr.msk.f32.gmra.mxu1 %vm329_vm7, %v2691_v31  ;;  %4169 = vmatmul.mubr.msk.f32.gmra.mxu0 %vm329_vm7, %v2802_v30 }
 0x82b   :  { %4152 = vmatprep.mubr.msk.f32.mxu1 %vm4783_vm3, %v4782_v0  ;;  %4171 = vmatprep.mubr.msk.f32.mxu0 %vm4783_vm3, %v4782_v0  ;;  %v2673_v8 = vld [vmem:[#allocation3 + $0x18] sm:$0xff] }
 0x82c   :  { %v2692_v40 = vrot.slane %v2673_v8, 2  ;;  %v2803_v38 = vrot.slane %v2673_v8, 1  ;;  %4183 = vmatpush3.msra.mxu1 %v2910_v37  ;;  %v2917_v49 = vrot.slane %v2673_v8, 3 }
 0x82e   :  { %v2693_v27 = vsel %vm427_vm4, %v2690_v20, %v2692_v40  ;;  %v2804_v34 = vsel %vm570_vm5, %v2801_v39, %v2803_v38  ;;  %v2674_v12 = vld [vmem:[#allocation3 + $0x20] sm:$0xff]  ;;  %v2918_v60 = vsel %vm890_vm6, %v2915_v4, %v2917_v49 }
 0x82f   :  { %4153 = vmatmul.mubr.msk.f32.gmra.mxu1 %vm329_vm7, %v2693_v27  ;;  %4172 = vmatmul.mubr.msk.f32.gmra.mxu0 %vm329_vm7, %v2804_v34  ;;  %v2694_v41 = vrot.slane %v2674_v12, 2  ;;  %v2805_v43 = vrot.slane %v2674_v12, 1  ;;  %v2919_v52 = vrot.slane %v2674_v12, 3 }
 0x830   :  { %4155 = vmatprep.mubr.msk.f32.mxu1 %vm4783_vm3, %v4782_v0  ;;  %4174 = vmatprep.mubr.msk.f32.mxu0 %vm4783_vm3, %v4782_v0 }
 0x831   :  { %v2695_v24 = vsel %vm427_vm4, %v2692_v40, %v2694_v41  ;;  %v2806_v47 = vsel %vm570_vm5, %v2803_v38, %v2805_v43  ;;  %v2697_v42 = vsel %vm427_vm4, %v2694_v41, %v2696_v16  ;;  %v2808_v51 = vsel %vm570_vm5, %v2805_v43, %v2807_v45 }
 0x832   :  { %v2920_v61 = vsel %vm890_vm6, %v2917_v49, %v2919_v52  ;;  %v2922_v63 = vsel %vm890_vm6, %v2919_v52, %v2921_v6 }
 0x833   :  { %4156 = vmatmul.mubr.msk.f32.gmra.mxu1 %vm329_vm7, %v2695_v24  ;;  %4175 = vmatmul.mubr.msk.f32.gmra.mxu0 %vm329_vm7, %v2806_v47  ;;  %v3684_v47 = vld [vmem:[#allocation28] ss:$0 sm:$0xff] }
 0x834   :  { %4158 = vmatprep.mubr.msk.f32.mxu1 %vm4783_vm3, %v4782_v0  ;;  %4177 = vmatprep.mubr.msk.f32.mxu0 %vm4783_vm3, %v4782_v0 }
 0x837   :  { %4159 = vmatmul.mubr.msk.f32.gmra.mxu1 %vm329_vm7, %v2697_v42  ;;  %4178 = vmatmul.mubr.msk.f32.gmra.mxu0 %vm329_vm7, %v2808_v51 }
 0x838   :  { %4184 = vmatprep.mubr.msk.f32.mxu1 %vm4783_vm3, %v4782_v0  ;;  %4209 = vmatprep.mubr.msk.f32.mxu0 %vm4783_vm3, %v4782_v0 }
 0x83b   :  { %4185 = vmatmul.mubr.msk.f32.vlgmr.msra.gmra.mxu1 %vm329_vm7, %v2914_v46 }
 0x83c   :  { %4187 = vmatprep.mubr.msk.f32.mxu1 %vm4783_vm3, %v4782_v0 }
 0x83f   :  { %4188 = vmatmul.mubr.msk.f32.gmra.mxu1 %vm329_vm7, %v2916_v59 }
 0x840   :  { %4190 = vmatprep.mubr.msk.f32.mxu1 %vm4783_vm3, %v4782_v0 }
 0x843   :  { %4191 = vmatmul.mubr.msk.f32.gmra.mxu1 %vm329_vm7, %v2918_v60 }
 0x844   :  { %4193 = vmatprep.mubr.msk.f32.mxu1 %vm4783_vm3, %v4782_v0 }
 0x847   :  { %4194 = vmatmul.mubr.msk.f32.gmra.mxu1 %vm329_vm7, %v2920_v61 }
 0x848   :  { %4196 = vmatprep.mubr.msk.f32.mxu1 %vm4783_vm3, %v4782_v0 }
 0x84b   :  { %4197 = vmatmul.mubr.msk.f32.gmra.mxu1 %vm329_vm7, %v2922_v63 }
 0x8e6   :  { %v2774_v1 = vpop.f32.mrf.mxu1  ;;  %v2885_v5 = vpop.f32.mrf.mxu0 }
 0x8e7   :  { %v2886_v45 = vadd.f32 %v2885_v5, %v2774_v1  ;;  %v3123_v1 = vld [vmem:[%s5755_s22 + $0x8] sm:$0xff]  ;;  %v3122_v5 = vld [vmem:[%s5755_s22] sm:$0xff]  ;;  %s4784_s22 = smov [#allocation36]  }
 0x8e8   :  { %v4148_v54 = vpop.f32.mrf.mxu1  ;;  %v4167_v13 = vpop.f32.mrf.mxu0  ;;  %s3541_s2 = sshll.u32 %s4784_s22, 4  ;;  %s3542_s2 = int_to_ptr.vmem [resolvable:$true] %s3541_s2 }
 0x8e9   :  { %s4716_s17 = scalar_lea.vmem %s3542_s2, 512  ;;  %p4721_p3 = scmp.lt.s32.totalorder %s3542_s2, %s3542_s2 }
 0x8ea   :  { %v2779_v58 = vpop.f32.mrf.mxu1  ;;  %v2890_v14 = vpop.f32.mrf.mxu0  ;;  %p4717_p2 = scmp.ne.s32.totalorder %s3542_s2, %s4716_s17  ;;  %p4722_p4 = scmp.lt.s32.totalorder %s4716_s17, %s4716_s17 }
 0x8eb   :  { %v2891_v43 = vadd.f32 %v2890_v14, %v2779_v58  ;;  %v3687_v58 = vld [vmem:[#allocation31] ss:$0 sm:$0xff] }
 0x8ec   :  { %v4151_v15 = vpop.f32.mrf.mxu1  ;;  %v4170_v18 = vpop.f32.mrf.mxu0  ;;  %p4723_p5 = por %p4722_p4, %p4721_p3 }
 0x8ee   :  { %p4724_p6 = pnand %p4723_p5, %p4717_p2 }
 0x8ef   :  { %v2784_v3 = vpop.f32.mrf.mxu1  ;;  %v2895_v36 = vpop.f32.mrf.mxu0 }
 0x8f0   :  { %v2896_v27 = vadd.f32 %v2895_v36, %v2784_v3  ;;  %v3689_v36 = vld [vmem:[#allocation34] ss:$0 sm:$0xff] }
 0x8f1   :  { %v4154_v19 = vpop.f32.mrf.mxu1  ;;  %v4173_v21 = vpop.f32.mrf.mxu0 }
 0x8f3   :  { %v2789_v29 = vpop.f32.mrf.mxu1  ;;  %v2900_v22 = vpop.f32.mrf.mxu0 }
 0x8f4   :  { %v2901_v40 = vadd.f32 %v2900_v22, %v2789_v29 }
 0x8f5   :  { %v4157_v23 = vpop.f32.mrf.mxu1  ;;  %v4176_v17 = vpop.f32.mrf.mxu0 }
 0x8f7   :  { %v2794_v26 = vpop.f32.mrf.mxu1  ;;  %v2905_v28 = vpop.f32.mrf.mxu0 }
 0x8f8   :  { %v2906_v34 = vadd.f32 %v2905_v28, %v2794_v26 }
 0x8f9   :  { %v4160_v33 = vpop.f32.mrf.mxu1  ;;  %v4179_v32 = vpop.f32.mrf.mxu0 }
 0x8fb   :  { %v2999_v35 = vpop.f32.mrf.mxu1 }
 0x8fc   :  { %v3023_v46 = vadd.f32 %v2999_v35, %v2886_v45 }
 0x8fd   :  { %v4186_v20 = vpop.f32.mrf.mxu1 }
 0x8fe   :  { %v3035_v52 = vmul.f32 %v3684_v47, %v3023_v46 }
 0x8ff   :  { %v3004_v39 = vpop.f32.mrf.mxu1 }
 0x900   :  { %v3024_v42 = vadd.f32 %v3004_v39, %v2891_v43  ;;  %v3047_v63 = vadd.f32 %v3685_v55, %v3035_v52 }
 0x901   :  { %v4189_v31 = vpop.f32.mrf.mxu1 }
 0x902   :  { %v3036_v49 = vmul.f32 %v3684_v47, %v3024_v42 }
 0x903   :  { %v3009_v30 = vpop.f32.mrf.mxu1 }
 0x904   :  { %v3025_v25 = vadd.f32 %v3009_v30, %v2896_v27  ;;  %v3048_v6 = vadd.f32 %v3685_v55, %v3036_v49 }
 0x905   :  { %v4192_v37 = vpop.f32.mrf.mxu1 }
 0x906   :  { %v3037_v4 = vmul.f32 %v3684_v47, %v3025_v25 }
 0x907   :  { %v3014_v8 = vpop.f32.mrf.mxu1 }
 0x908   :  { %v3026_v12 = vadd.f32 %v3014_v8, %v2901_v40  ;;  %v5664_v61 = vadd.f32 %v3685_v55, %v3037_v4 }
 0x909   :  { %v4195_v38 = vpop.f32.mrf.mxu1 }
 0x90a   :  { %v3038_v51 = vmul.f32 %v3684_v47, %v3026_v12 }
 0x90b   :  { %v3019_v41 = vpop.f32.mrf.mxu1 }
 0x90c   :  { %v3027_v24 = vadd.f32 %v3019_v41, %v2906_v34  ;;  %v5660_v60 = vadd.f32 %v3685_v55, %v3038_v51 }
 0x90d   :  { %v4198_v16 = vpop.f32.mrf.mxu1 }
 0x90e   :  { %v3039_v53 = vmul.f32 %v3684_v47, %v3027_v24 }
 0x910   :  { %v5658_v59 = vadd.f32 %v3685_v55, %v3039_v53 }
 0x912   :  { %4200 = vmatpush3.msra.mxu0 %v5658_v59 }
 0x913   :  { %4201 = vmatprep.subr.mxu0 %v4782_v0 }
 0x914   :  { %4202 = vmatpush3.msra.mxu0 %v5660_v60 }
 0x915   :  { %4203 = vmatprep.subr.mxu0 %v4782_v0 }
 0x916   :  { %4204 = vmatpush3.msra.mxu0 %v5664_v61 }
 0x917   :  { %4205 = vmatprep.subr.mxu0 %v4782_v0 }
 0x918   :  { %4206 = vmatpush3.msra.mxu0 %v3048_v6 }
 0x919   :  { %4207 = vmatprep.subr.mxu0 %v4782_v0 }
 0x91a   :  { %4208 = vmatpush3.msra.mxu0 %v3047_v63 }
 0x91b   :  { %4210 = vmatmul.mubr.msk.f32.vlgmr.msra.gmra.mxu0 %vm1819_vm13, %v5397_v48  ;;  %4212 = vmatprep.subr.mxu0 %v4782_v0  ;;  %v3205_v48 = vld [vmem:[#allocation33] sm:$0xf] }
 0x91c   :  { %4213 = vmatpush3.msra.mxu0 %v3123_v1  ;;  %4216 = vmatprep.mubr.msk.f32.mxu0 %vm4783_vm3, %v4782_v0 }
 0x91d   :  { %4214 = vmatprep.subr.mxu0 %v4782_v0 }
 0x91e   :  { %4215 = vmatpush3.msra.mxu0 %v3122_v5 }
 0x91f   :  { %4219 = vmatprep.subr.mxu0 %v4782_v0 }
 0x9db   :  { %v3118_v54 = vpop.f32.mrf.mxu0 }
 0x9dc   :  { %4217 = vmatmul.mubr.msk.f32.vlgmr.msra.gmra.mxu0 %vm329_vm7, %v3118_v54 }
 0x9dd   :  { %v4211_v13 = vpop.f32.mrf.mxu0  ;;  %4221 = vmatprep.mubr.msk.f32.mxu0 %vm4783_vm3, %v4782_v0  ;;  %4220 = vmatpush3.msk.msra.mxu0 %vm449_vm2, %v3205_v48 }
 0x9de   :  { %4224 = vmatprep.subr.mxu0 %v4782_v0 }
 0xa9c   :  { %v3200_v14 = vpop.f32.mrf.mxu0 }
 0xa9d   :  { %v3201_v15 = vadd.f32 %v3687_v58, %v3200_v14 }
 0xa9e   :  { %v4218_v18 = vpop.f32.mrf.mxu0 }
 0xa9f   :  { %v3204_v3 = vmax.f32 %v3201_v15, 0.0 }
 0xaa1   :  { %4222 = vmatmul.mubr.msk.f32.vlgmr.msra.gmra.mxu0 %vm321_vm0, %v3204_v3 }
 0xaa2   :  { %4226 = vmatprep.mubr.msk.f32.mxu0 %vm4783_vm3, %v4782_v0 }
 0xb61   :  { %v3285_v19 = vpop.f32.mrf.mxu0 }
 0xb62   :  { %v3286_v21 = vadd.f32 %v3689_v36, %v3285_v19 }
 0xb63   :  { %v4223_v29 = vpop.f32.mrf.mxu0 }
 0xb64   :  { %v3692_v22 = vmul.f32 -1.442695, %v3286_v21 }
 0xb66   :  { %4302 = vpow2.f32 %v3692_v22 }
 0xb73   :  { %v4303_v23 = vpop.eup %4302 }
 0xb74   :  { %v3292_v17 = vadd.f32 1.0, %v4303_v23 }
 0xb76   :  { %4304 = vrcp.f32 %v3292_v17 }
 0xb83   :  { %v4305_v26 = vpop.eup %4304 }
 0xb84   :  { %4225 = vmatpush3.msk.msra.mxu0 %vm2082_vm14, %v4305_v26 }
 0xb85   :  { %4227 = vmatmul.mubr.msk.f32.vlgmr.msra.gmra.mxu0 %vm2066_vm15, %v5422_v7 }
 0xb86   :  { %4229 = vmatprep.mubr.msk.f32.mxu0 %vm4783_vm3, %v4782_v0 }
 0xb89   :  { %4230 = vmatmul.mubr.msk.f32.gmra.mxu0 %vm2066_vm15, %v5430_v9 }
 0xb8a   :  { %4232 = vmatprep.mubr.msk.f32.mxu0 %vm4783_vm3, %v4782_v0 }
 0xb8d   :  { %4233 = vmatmul.mubr.msk.f32.gmra.mxu0 %vm2066_vm15, %v5436_v57 }
 0xb8e   :  { %4235 = vmatprep.mubr.msk.f32.mxu0 %vm4783_vm3, %v4782_v0 }
 0xb91   :  { %4236 = vmatmul.mubr.msk.f32.gmra.mxu0 %vm2066_vm15, %v5442_v10 }
 0xb92   :  { %4238 = vmatprep.mubr.msk.f32.mxu0 %vm4783_vm3, %v4782_v0 }
 0xb95   :  { %4239 = vmatmul.mubr.msk.f32.gmra.mxu0 %vm2066_vm15, %v5448_v11 }
 0xc45   :  { %v3364_v7 = vpop.f32.mrf.mxu0 }
 0xc46   :  { %v3388_v9 = vmul.f32 %v3364_v7, %v3047_v63 }
 0xc47   :  { %v4228_v28 = vpop.f32.mrf.mxu0 }
 0xc48   :  { %v3398_v33 = vadd.f32 %v3388_v9, %v5494_v44 }
 0xc49   :  { %v3369_v32 = vpop.f32.mrf.mxu0 }
 0xc4a   :  { %v3408_v35 = vmul.f32 0.044715, %v3398_v33  ;;  %v3389_v57 = vmul.f32 %v3369_v32, %v3048_v6  ;;  %v3403_v54 = vmul.f32 0.5, %v3398_v33 }
 0xc4b   :  { %v4231_v20 = vpop.f32.mrf.mxu0 }
 0xc4c   :  { %v3413_v39 = vmul.f32 %v3408_v35, %v3398_v33  ;;  %v3399_v31 = vadd.f32 %v3389_v57, %v5509_v50 }
 0xc4d   :  { %v3374_v30 = vpop.f32.mrf.mxu0 }
 0xc4e   :  { %v3409_v10 = vmul.f32 0.044715, %v3399_v31  ;;  %v3390_v37 = vmul.f32 %v3374_v30, %v5664_v61  ;;  %v3418_v0 = vmul.f32 %v3413_v39, %v3398_v33  ;;  %v3404_v48 = vmul.f32 0.5, %v3399_v31 }
 0xc4f   :  { %v4234_v8 = vpop.f32.mrf.mxu0 }
 0xc50   :  { %v3414_v40 = vmul.f32 %v3409_v10, %v3399_v31  ;;  %v3400_v11 = vadd.f32 %v3390_v37, %v5525_v56  ;;  %v3423_v38 = vadd.f32 %v3418_v0, %v3398_v33 }
 0xc51   :  { %v3379_v27 = vpop.f32.mrf.mxu0 }
 0xc52   :  { %v3410_v34 = vmul.f32 0.044715, %v3400_v11  ;;  %v3391_v44 = vmul.f32 %v3379_v27, %v5660_v60  ;;  %v3419_v12 = vmul.f32 %v3414_v40, %v3399_v31  ;;  %v3428_v41 = vmul.f32 0.7978846, %v3423_v38 }
 0xc53   :  { %v4237_v43 = vpop.f32.mrf.mxu0  ;;  %v3405_v36 = vmul.f32 0.5, %v3400_v11 }
 0xc54   :  { %v3415_v25 = vmul.f32 %v3410_v34, %v3400_v11  ;;  %v3401_v50 = vadd.f32 %v3391_v44, %v5536_v62  ;;  %v3424_v24 = vadd.f32 %v3419_v12, %v3399_v31  ;;  %4306 = vtanh.f32 %v3428_v41 }
 0xc55   :  { %v3384_v47 = vpop.f32.mrf.mxu0 }
 0xc56   :  { %v3420_v16 = vmul.f32 %v3415_v25, %v3400_v11  ;;  %v3411_v45 = vmul.f32 0.044715, %v3401_v50  ;;  %v3392_v42 = vmul.f32 %v3384_v47, %v5658_v59  ;;  %v3429_v51 = vmul.f32 0.7978846, %v3424_v24 }
 0xc57   :  { %v4240_v56 = vpop.f32.mrf.mxu0  ;;  %v3406_v17 = vmul.f32 0.5, %v3401_v50 }
 0xc58   :  { %v3416_v53 = vmul.f32 %v3411_v45, %v3401_v50  ;;  %v3402_v55 = vadd.f32 %v3392_v42, %v5547_v2  ;;  %4308 = vtanh.f32 %v3429_v51  ;;  %v3425_v46 = vadd.f32 %v3420_v16, %v3400_v11 }
 0xc5a   :  { %v3412_v4 = vmul.f32 0.044715, %v3402_v55  ;;  %v3430_v49 = vmul.f32 0.7978846, %v3425_v46  ;;  %v3421_v60 = vmul.f32 %v3416_v53, %v3401_v50  ;;  %v3407_v35 = vmul.f32 0.5, %v3402_v55 }
 0xc5c   :  { %v3417_v52 = vmul.f32 %v3412_v4, %v3402_v55  ;;  %4310 = vtanh.f32 %v3430_v49  ;;  %v3426_v62 = vadd.f32 %v3421_v60, %v3401_v50 }
 0xc5e   :  { %v3422_v61 = vmul.f32 %v3417_v52, %v3402_v55  ;;  %v3431_v6 = vmul.f32 0.7978846, %v3426_v62 }
 0xc60   :  { %4312 = vtanh.f32 %v3431_v6  ;;  %v3427_v63 = vadd.f32 %v3422_v61, %v3402_v55 }
 0xc61   :  { %v4307_v1 = vpop.eup %4306 }
 0xc62   :  { %v3438_v5 = vadd.f32 1.0, %v4307_v1  ;;  %v3432_v59 = vmul.f32 0.7978846, %v3427_v63 }
 0xc64   :  { %4314 = vtanh.f32 %v3432_v59  ;;  %v3443_v58 = vmul.f32 %v3438_v5, %v3403_v54 }
 0xc65   :  { %v4309_v13 = vpop.eup %4308 }
 0xc66   :  { %v3439_v2 = vadd.f32 1.0, %v4309_v13  ;;  %v3451_v18 = vrot.slane %v3443_v58, 2 }
 0xc68   :  { %v3444_v14 = vmul.f32 %v3439_v2, %v3404_v48 }
 0xc69   :  { %v4311_v15 = vpop.eup %4310 }
 0xc6a   :  { %v3452_v3 = vrot.slane %v3444_v14, 2  ;;  %v3440_v19 = vadd.f32 1.0, %v4311_v15 }
 0xc6c   :  { %v3453_v21 = vsel %vm427_vm4, %v3451_v18, %v3452_v3  ;;  %v3445_v29 = vmul.f32 %v3440_v19, %v3405_v36 }
 0xc6d   :  { %v4313_v22 = vpop.eup %4312  ;;  %3458 = vxpose.xlu1.b32.start [1/2] (short) (narrow) %v3453_v21, 16 }
 0xc6e   :  { %v3454_v23 = vrot.slane %v3445_v29, 2  ;;  %v3441_v26 = vadd.f32 1.0, %v4313_v22  ;;  %v3494_v33 = vrot.slane %v3445_v29, 6 }
 0xc70   :  { %v3455_v7 = vsel %vm427_vm4, %v3452_v3, %v3454_v23  ;;  %v3446_v9 = vmul.f32 %v3441_v26, %v3406_v17 }
 0xc71   :  { %v4315_v28 = vpop.eup %4314  ;;  %3459 = vxpose.xlu1.b32.end [2/2] (short) (narrow) %v3455_v7, 16 }
 0xc72   :  { %v3495_v32 = vrot.slane %v3446_v9, 6  ;;  %v3442_v57 = vadd.f32 1.0, %v4315_v28 }
 0xc74   :  { %v3496_v20 = vsel %vm2082_vm14, %v3494_v33, %v3495_v32  ;;  %v3447_v39 = vmul.f32 %v3442_v57, %v3407_v35 }
 0xc75   :  { %3501 = vxpose.xlu1.b32.start [1/2] (short) (narrow) %v3496_v20, 16 }
 0xc76   :  { %v3497_v31 = vrot.slane %v3447_v39, 6 }
 0xc78   :  { %v3498_v30 = vsel %vm2082_vm14, %v3495_v32, %v3497_v31 }
 0xc79   :  { %3502 = vxpose.xlu1.b32.end [2/2] (short) (narrow) %v3498_v30, 16 }
 0xce9   :  { %v3474_v10 = vpop.trf.xlu1 }
 0xcea   :  { %3490 = vst.msk [vmem:[#allocation36] sm:$0xff] %vm329_vm7, %v3474_v10 }
 0xced   :  { %v3475_v37 = vpop.trf.xlu1 }
 0xcee   :  { %3491 = vst.msk [vmem:[#allocation36 + $0x8] sm:$0xff] %vm329_vm7, %v3475_v37 }
 0xcf1   :  { %v3517_v0 = vpop.trf.xlu1 }
 0xcf2   :  { %3534 = vst.msk [vmem:[#allocation36 + $0x10] sm:$0xff] %vm329_vm7, %v3517_v0 }
 0xcf5   :  { %v3518_v8 = vpop.trf.xlu1 }
 0xcf6   :  { %3535 = vst.msk [vmem:[#allocation36 + $0x18] sm:$0xff] %vm329_vm7, %v3518_v8 }
 0xcf7   :  { %4727 = shalt.err (!%p4724_p6)
}
 0xcf8   :  { %s5786_s15 = sld [smem:[#allocation60_spill]] }
 0xcfe   :  { %3547 = dma.vmem_to_hbm [thread:$0]  %s3542_s2, 512, %s5786_s15, [#allocation6], %s4763_s10, %s4763_s10, %s4764_s6  }
 0xcff   :  { %4758 = dma.done.wait [#allocation6], 512  }
 0xd00   :  { %4759 = vsyncadd [#allocation6], 4294966784 }
 0xd01   :  { %3551 = vsyncpa [#allocation5], 1 }
 0xd02   :  { %3552 = vsyncpa [#allocation8], 1 }
 0xd03   :  { %3553 = vsyncpa [#allocation11], 1 }
 0xd04   :  { %3554 = vsyncpa [#allocation14], 1 }
 0xd05   :  { %3555 = vsyncpa [#allocation17], 1 }
 0xd06   :  { %3556 = vsyncpa [#allocation20], 1 }
 0xd07   :  { %3557 = vsyncpa [#allocation23], 1 }
 0xd08   :  { %3558 = vsyncpa [#allocation26], 1 }
 0xd09   :  { %3559 = vsyncpa [#allocation29], 1 }
 0xd0a   :  { %3560 = vsyncpa [#allocation32], 1 }
 0xd0b   :  { %3561 = vsyncpa [#allocation35], 1 }
 0xd0c   :  { %3562 = vsyncpa [#allocation6], 1 }

</bundles_post_ra>
